<compile_context>
chip_gen: v7x
topology: tpu7x:2x2x1
jax: 0.10.0
libtpu: 0.0.40
codegen_flags: <defaults>
</compile_context>

<pallas_src>
import math
import functools

import numpy as np
import jax
import jax.numpy as jnp
from jax.experimental import pallas as pl
from jax.experimental.pallas import tpu as pltpu

_SQRT_HALF = math.sqrt(0.5)


# ----------------------------------------------------------------------------
# Pallas kernels
# ----------------------------------------------------------------------------

def _ct_matmul_kernel(p_ref, w_ref, b_ref, o_ref):
    """out = W @ P + b in (channels, time) layout; one batch element per step."""
    o_ref[0] = (jnp.dot(w_ref[...], p_ref[0], preferred_element_type=jnp.float32)
                + b_ref[...]).astype(o_ref.dtype)


def ct_matmul(p, w, b=None):
    """Per-batch (C,T)-layout matmul.  p: (B, K, T), w: (Cout, K), b: (Cout, 1)."""
    B, K, T = p.shape
    cout = w.shape[0]
    if b is None:
        b = jnp.zeros((cout, 1), jnp.float32)
    return pl.pallas_call(
        _ct_matmul_kernel,
        out_shape=jax.ShapeDtypeStruct((B, cout, T), jnp.float32),
        grid=(B,),
        in_specs=[
            pl.BlockSpec((1, K, T), lambda i: (i, 0, 0)),
            pl.BlockSpec((cout, K), lambda i: (0, 0)),
            pl.BlockSpec((cout, 1), lambda i: (0, 0)),
        ],
        out_specs=pl.BlockSpec((1, cout, T), lambda i: (i, 0, 0)),
        compiler_params=pltpu.CompilerParams(dimension_semantics=("parallel",)),
    )(p.astype(jnp.float32), w.astype(jnp.float32), b.astype(jnp.float32))


def _fused_stack_kernel(x_ref, c_ref, wf_ref, bf_ref, wca_ref, bca_ref,
                        wso_ref, bso_ref, wl1_ref, bl1_ref, wl2_ref, bl2_ref,
                        o_ref, *, layers, layers_per_stack, cskip, ksize):
    """first 1x1 conv -> `layers` WaveNet residual blocks -> last_conv_layers,
    fully fused, (channels, time) layout, one batch element per grid step."""
    f32 = jnp.float32
    x_in = x_ref[0].astype(jnp.bfloat16)          # (S, T)
    c = c_ref[0]                                  # (Caux, T) f32
    # first_conv (Conv1d1x1 in_channels -> residual_channels)
    x = jnp.dot(wf_ref[...], x_in, preferred_element_type=f32) + bf_ref[...]
    T = x.shape[-1]
    t_idx = jax.lax.broadcasted_iota(jnp.int32, x.shape, 1)
    skips = jnp.zeros((cskip, T), f32)
    half = (ksize - 1) // 2

    for l in range(layers):
        d = 2 ** (l % layers_per_stack)
        # dilated conv taps gathered with lane rolls (zero-padded boundaries)
        taps = []
        for k in range(ksize):
            o = (k - half) * d                    # tap k reads x[:, t + o]
            if o == 0:
                taps.append(x)
            else:
                sh = pltpu.roll(x, (-o) % T, axis=1)
                sh = jnp.where((t_idx >= -o) & (t_idx < T - o), sh, 0.0)
                taps.append(sh)
        # merged matmul: [taps | c] against [W_tap0; ...; W_tapK-1; W_aux]
        inp = jnp.concatenate(taps + [c], axis=0).astype(jnp.bfloat16)
        z = jnp.dot(wca_ref[l], inp, preferred_element_type=f32) + bca_ref[l]
        gh = z.shape[0] // 2
        g = jnp.tanh(z[:gh]) * jax.nn.sigmoid(z[gh:])
        # merged skip / residual 1x1 convs
        so = jnp.dot(wso_ref[l], g.astype(jnp.bfloat16),
                     preferred_element_type=f32) + bso_ref[l]
        skips = skips + so[:cskip]
        x = (so[cskip:] + x) * _SQRT_HALF

    # last_conv_layers: ReLU -> 1x1 -> ReLU -> 1x1
    y = jnp.maximum(skips * math.sqrt(1.0 / layers), 0.0)
    y = jnp.dot(wl1_ref[...], y.astype(jnp.bfloat16),
                preferred_element_type=f32) + bl1_ref[...]
    y = jnp.maximum(y, 0.0)
    y = jnp.dot(wl2_ref[...], y.astype(jnp.bfloat16),
                preferred_element_type=f32) + bl2_ref[...]
    o_ref[0] = y.astype(o_ref.dtype)


def fused_stack(x_sub, c_up, params, cfg):
    B, S, T4 = x_sub.shape
    caux = c_up.shape[1]
    L = cfg["layers"]
    kern = functools.partial(
        _fused_stack_kernel,
        layers=L, layers_per_stack=L // cfg["stacks"],
        cskip=cfg["skip_channels"], ksize=cfg["kernel_size"])
    weights = [params["first_w"], params["first_b"],
               params["wconvaux"], params["bconvaux"],
               params["wskipout"], params["bskipout"],
               params["last_w1"], params["last_b1"],
               params["last_w2"], params["last_b2"]]

    def _wspec(a):
        nd = a.ndim
        return pl.BlockSpec(a.shape, lambda b, _nd=nd: (0,) * _nd)

    return pl.pallas_call(
        kern,
        out_shape=jax.ShapeDtypeStruct((B, S, T4), jnp.float32),
        grid=(B,),
        in_specs=[pl.BlockSpec((1, S, T4), lambda b: (b, 0, 0)),
                  pl.BlockSpec((1, caux, T4), lambda b: (b, 0, 0))]
                 + [_wspec(a) for a in weights],
        out_specs=pl.BlockSpec((1, S, T4), lambda b: (b, 0, 0)),
        compiler_params=pltpu.CompilerParams(dimension_semantics=("parallel",)),
    )(x_sub, c_up, *weights)


# ----------------------------------------------------------------------------
# PQMF prototype filters (same math as the torch PQMF module)
# ----------------------------------------------------------------------------

def design_prototype_filter(taps=62, cutoff_ratio=0.142, beta=9.0):
    omega_c = np.pi * cutoff_ratio
    n = np.arange(taps + 1) - 0.5 * taps
    with np.errstate(invalid="ignore"):
        h_i = np.sin(omega_c * n) / (np.pi * n)
    h_i[taps // 2] = cutoff_ratio
    return h_i * np.kaiser(taps + 1, beta)


def pqmf_filters(subbands=4, taps=62, cutoff_ratio=0.142, beta=9.0):
    h_proto = design_prototype_filter(taps, cutoff_ratio, beta)
    n = np.arange(taps + 1)
    h_analysis = np.zeros((subbands, taps + 1))
    h_synthesis = np.zeros((subbands, taps + 1))
    for k in range(subbands):
        h_analysis[k] = 2 * h_proto * np.cos(
            (2 * k + 1) * (np.pi / (2 * subbands)) * (n - taps / 2)
            + (-1) ** k * np.pi / 4)
        h_synthesis[k] = 2 * h_proto * np.cos(
            (2 * k + 1) * (np.pi / (2 * subbands)) * (n - taps / 2)
            - (-1) ** k * np.pi / 4)
    return h_analysis.astype(np.float32), h_synthesis.astype(np.float32)


# ----------------------------------------------------------------------------
# Full forward pass
# ----------------------------------------------------------------------------

def generator1_forward(params, x, c, cfg):
    B = x.shape[0]
    S = cfg["subbands"]
    taps = cfg["taps"]
    caux = cfg["aux_channels"]
    K = cfg["kernel_size"]

    # ---- 1. conditioning upsample network (ConvInUpsampleNetwork) ----------
    w_in = 2 * cfg["aux_context_window"] + 1
    t0 = c.shape[-1] - w_in + 1
    p_in = jnp.concatenate([c[:, :, k:k + t0] for k in range(w_in)], axis=1)
    cc = ct_matmul(p_in, params["conv_in_wmat"])                   # (B, Caux, t0)
    # nearest-stretch x s + (1, 2s+1) FIR, done as a polyphase 3-tap matmul
    for s, wup in zip(cfg["upsample_scales"], params["up_poly_ws"]):
        nin = cc.shape[-1]
        vpad = jnp.pad(cc, ((0, 0), (0, 0), (1, 1)))
        p_up = jnp.concatenate([vpad[:, :, q:q + nin] for q in range(3)], axis=1)
        o = ct_matmul(p_up, wup)                                   # (B, s*Caux, nin)
        cc = o.reshape(B, s, caux, nin).transpose(0, 2, 3, 1).reshape(B, caux, nin * s)
    c_up = cc
    T = x.shape[-1]
    assert c_up.shape[-1] * 4 == T

    # ---- 2. PQMF analysis with the stride folded into the im2col ------------
    T4 = T // S
    xpad = jnp.pad(x[:, 0, :], ((0, 0), (taps // 2, taps // 2)))   # (B, T + taps)
    p_an = jnp.stack([xpad[:, j:j + S * T4:S] for j in range(taps + 1)], axis=1)
    x_sub = ct_matmul(p_an, params["pqmf_analysis_w"])             # (B, S, T4)

    # ---- 3-5. fused first conv + residual stack + last conv layers ----------
    y_sub = fused_stack(x_sub, c_up, params, cfg)                  # (B, S, T4)

    # ---- 6. PQMF synthesis (polyphase, no zero-stuffing) --------------------
    dmin, R = params["pqmf_syn_dmin"], params["pqmf_syn_R"]
    ypad = jnp.pad(y_sub, ((0, 0), (0, 0), (-dmin, dmin + R - 1)))
    p_sy = jnp.stack([ypad[:, :, r:r + T4] for r in range(R)],
                     axis=2).reshape(B, S * R, T4)
    phases = ct_matmul(p_sy, params["pqmf_synthesis_w"])           # (B, S(phase), T4)
    y = phases.transpose(0, 2, 1).reshape(B, 1, S * T4)            # interleave phases

    # ---- 7. pqmf_conv1 / pqmf_conv2 (kernel 3, padding 3, as in torch) ------
    pad = 3
    T1 = T + 2 * pad - K + 1                                       # T + 4
    y0 = jnp.pad(y[:, 0, :], ((0, 0), (pad, pad)))
    p1 = jnp.stack([y0[:, k:k + T1] for k in range(K)], axis=1)    # (B, K, T1)
    h1 = ct_matmul(p1, params["pqmf_conv1_w"], params["pqmf_conv1_b"])  # (B,128,T1)
    T2 = T1 + 2 * pad - K + 1                                      # T + 8
    h1pad = jnp.pad(h1, ((0, 0), (0, 0), (pad, pad)))
    p2 = jnp.concatenate([h1pad[:, :, k:k + T2] for k in range(K)], axis=1)
    out = ct_matmul(p2, params["pqmf_conv2_w"], params["pqmf_conv2_b"])  # (B,1,T2)
    return out


# ----------------------------------------------------------------------------
# Parameters (deterministic in-script init, pre-arranged in kernel layout)
# ----------------------------------------------------------------------------

def init_params(key, cfg):
    Cres, Cgate = cfg["residual_channels"], cfg["gate_channels"]
    Cskip, Caux = cfg["skip_channels"], cfg["aux_channels"]
    Cin, K = cfg["in_channels"], cfg["kernel_size"]
    G = Cgate // 2
    L = cfg["layers"]
    S = cfg["subbands"]
    taps = cfg["taps"]

    def nrm(k, shape, fan_in):
        return jax.random.normal(k, shape, jnp.float32) / math.sqrt(max(fan_in, 1))

    keys = iter(jax.random.split(key, 64))
    p = {}

    # --- ConvInUpsampleNetwork ----------------------------------------------
    w_in = 2 * cfg["aux_context_window"] + 1
    conv_in_w = nrm(next(keys), (Caux, Caux, w_in), Caux * w_in)    # (Cout, Cin, K)
    p["conv_in_wmat"] = jnp.transpose(conv_in_w, (0, 2, 1)).reshape(Caux, w_in * Caux)

    # per-scale Stretch2d(nearest) + Conv2d(1,1,(1,2s+1),pad(0,s)) -> polyphase
    p["up_poly_ws"] = []
    for s in cfg["upsample_scales"]:
        fir = np.asarray(nrm(next(keys), (2 * s + 1,), 2 * s + 1))
        bmat = np.zeros((s, 3), np.float32)          # columns: input offset in {-1,0,+1}
        for ph in range(s):
            for j in range(2 * s + 1):
                q = (ph + j - s) // s                 # floor
                bmat[ph, q + 1] += fir[j]
        p["up_poly_ws"].append(jnp.asarray(np.kron(bmat, np.eye(Caux, dtype=np.float32))))

    # --- PQMF ----------------------------------------------------------------
    ha, hs = pqmf_filters(S, taps)
    p["pqmf_analysis_w"] = jnp.asarray(ha)                          # (S, taps+1)
    pad_syn = taps // 2
    deltas = [(ph + j - pad_syn) // S
              for ph in range(S) for j in range(taps + 1)
              if (ph + j - pad_syn) % S == 0]
    dmin, dmax = min(deltas), max(deltas)
    R = dmax - dmin + 1
    wsyn = np.zeros((S, S, R), np.float32)
    for ph in range(S):
        for k in range(S):
            for j in range(taps + 1):
                num = ph + j - pad_syn
                if num % S == 0:
                    wsyn[ph, k, num // S - dmin] += S * hs[k, j]
    p["pqmf_synthesis_w"] = jnp.asarray(wsyn.reshape(S, S * R))
    p["pqmf_syn_dmin"] = dmin
    p["pqmf_syn_R"] = R

    # --- fused residual stack (bf16 matmul weights, f32 biases) --------------
    p["first_w"] = nrm(next(keys), (Cres, Cin), Cin).astype(jnp.bfloat16)
    p["first_b"] = jnp.zeros((Cres, 1), jnp.float32)
    wca, wso = [], []
    for _ in range(L):
        wc = nrm(next(keys), (Cgate, Cres, K), Cres * K)            # dilated conv
        wa = nrm(next(keys), (Cgate, Caux), Caux)                   # conv1x1_aux (no bias)
        wca.append(jnp.concatenate([wc[:, :, k] for k in range(K)] + [wa], axis=1))
        ws = nrm(next(keys), (Cskip, G), G)                         # conv1x1_skip
        wo = nrm(next(keys), (Cres, G), G)                          # conv1x1_out
        wso.append(jnp.concatenate([ws, wo], axis=0))
    p["wconvaux"] = jnp.stack(wca).astype(jnp.bfloat16)             # (L, Cgate, K*Cres+Caux)
    p["bconvaux"] = jnp.zeros((L, Cgate, 1), jnp.float32)
    p["wskipout"] = jnp.stack(wso).astype(jnp.bfloat16)             # (L, Cskip+Cres, G)
    p["bskipout"] = jnp.zeros((L, Cskip + Cres, 1), jnp.float32)
    p["last_w1"] = nrm(next(keys), (Cskip, Cskip), Cskip).astype(jnp.bfloat16)
    p["last_b1"] = jnp.zeros((Cskip, 1), jnp.float32)
    p["last_w2"] = nrm(next(keys), (Cin, Cskip), Cskip).astype(jnp.bfloat16)
    p["last_b2"] = jnp.zeros((Cin, 1), jnp.float32)

    # --- pqmf_conv1 / pqmf_conv2 ---------------------------------------------
    w1 = nrm(next(keys), (128, 1, K), K)
    p["pqmf_conv1_w"] = w1[:, 0, :]                                 # (128, K)
    p["pqmf_conv1_b"] = jnp.zeros((128, 1), jnp.float32)
    w2 = nrm(next(keys), (1, 128, K), 128 * K)
    p["pqmf_conv2_w"] = jnp.transpose(w2[0], (1, 0)).reshape(1, K * 128)
    p["pqmf_conv2_b"] = jnp.zeros((1, 1), jnp.float32)
    return p


# ----------------------------------------------------------------------------
# main
# ----------------------------------------------------------------------------

if __name__ == "__main__":
    cfg = dict(in_channels=4, out_channels=1, kernel_size=3, layers=6, stacks=3,
               residual_channels=16, gate_channels=32, skip_channels=16,
               aux_channels=8, aux_context_window=2,
               upsample_scales=[4, 4], subbands=4, taps=62)

    key = jax.random.PRNGKey(0)
    kp, kx, kc = jax.random.split(key, 3)
    params = init_params(kp, cfg)

    B = 2
    T_c = 12                                            # includes 2*aux_context_window of context
    T_inner = T_c - 2 * cfg["aux_context_window"]       # 8 frames after conv_in
    up_factor = int(np.prod(cfg["upsample_scales"]))    # 16
    T = T_inner * up_factor * cfg["subbands"]           # 512 audio samples

    x = jax.random.normal(kx, (B, 1, T), jnp.float32)                       # noise (B,1,T)
    c = jax.random.normal(kc, (B, cfg["aux_channels"], T_c), jnp.float32)   # aux (B,C,T')

    fwd = jax.jit(lambda x, c: generator1_forward(params, x, c, cfg))
    y = fwd(x, c)
    jax.block_until_ready(y)

    assert y.shape == (B, 1, T + 8), y.shape   # two kernel-3/pad-3 convs each add 4 samples
    assert bool(jnp.all(jnp.isfinite(y)))
    print("KERNEL_OK")
</pallas_src>

<mosaic_0001>
module attributes {stable_mosaic.version = 11 : i64} {
  func.func @_ct_matmul_kernel(%arg0: i32, %arg1: memref<1x63x128xf32, #tpu.memory_space<vmem>>, %arg2: memref<4x63xf32, #tpu.memory_space<vmem>>, %arg3: memref<4x1xf32, #tpu.memory_space<vmem>>, %arg4: memref<1x4x128xf32, #tpu.memory_space<vmem>>) attributes {dimension_semantics = [#tpu.dimension_semantics<parallel>], iteration_bounds = array<i64: 2>, scalar_prefetch = 0 : i64, scratch_operands = 0 : i64, tpu.core_type = #tpu.core_type<tc>, window_params = [{transform_indices = @transform_0, window_bounds = array<i64: 1, 63, 128>}, {pipeline_mode = #tpu.pipeline_mode<synchronous>, transform_indices = @transform_1, window_bounds = array<i64: 4, 63>}, {pipeline_mode = #tpu.pipeline_mode<synchronous>, transform_indices = @transform_2, window_bounds = array<i64: 4, 1>}, {transform_indices = @transform_3, window_bounds = array<i64: 1, 4, 128>}]} {
    %c0 = arith.constant 0 : index
    %c0_0 = arith.constant 0 : index
    %0 = vector.load %arg2[%c0, %c0_0] : memref<4x63xf32, #tpu.memory_space<vmem>>, vector<4x63xf32>
    %c0_1 = arith.constant 0 : index
    %c0_2 = arith.constant 0 : index
    %c0_3 = arith.constant 0 : index
    %1 = vector.load %arg1[%c0_1, %c0_2, %c0_3] : memref<1x63x128xf32, #tpu.memory_space<vmem>>, vector<1x63x128xf32>
    %2 = vector.shape_cast %1 : vector<1x63x128xf32> to vector<63x128xf32>
    %cst = arith.constant dense<0.000000e+00> : vector<4x128xf32>
    %3 = tpu.matmul %0, %2, %cst {dimension_numbers = #tpu.dot_dimension_numbers<[1], [0], [0], [1], [0, 0, 1, 1], [], []>} : vector<4x63xf32>, vector<63x128xf32>, vector<4x128xf32> -> vector<4x128xf32>
    %c0_4 = arith.constant 0 : index
    %c0_5 = arith.constant 0 : index
    %4 = vector.load %arg3[%c0_4, %c0_5] : memref<4x1xf32, #tpu.memory_space<vmem>>, vector<4x1xf32>
    %5 = vector.broadcast %4 : vector<4x1xf32> to vector<4x128xf32>
    %6 = arith.addf %3, %5 : vector<4x128xf32>
    %c0_6 = arith.constant 0 : index
    %c0_7 = arith.constant 0 : index
    %c0_8 = arith.constant 0 : index
    %7 = vector.load %arg4[%c0_6, %c0_7, %c0_8] : memref<1x4x128xf32, #tpu.memory_space<vmem>>, vector<1x4x128xf32>
    %8 = vector.shape_cast %7 : vector<1x4x128xf32> to vector<4x128xf32>
    %9 = vector.shape_cast %6 : vector<4x128xf32> to vector<1x4x128xf32>
    tpu.vector_store %arg4[%c0_6, %c0_7, %c0_8], %9 {strides = array<i32>} : memref<1x4x128xf32, #tpu.memory_space<vmem>>, vector<1x4x128xf32>,
    return
  }
  func.func @transform_0(%arg0: i32) -> (i32, i32, i32) {
    %c0_i32 = arith.constant 0 : i32
    %c0_i32_0 = arith.constant 0 : i32
    %c0_i32_1 = arith.constant 0 : i32
    return %arg0, %c0_i32, %c0_i32_0 : i32, i32, i32
  }
  func.func @transform_1(%arg0: i32) -> (i32, i32) {
    %c0_i32 = arith.constant 0 : i32
    %c0_i32_0 = arith.constant 0 : i32
    %c0_i32_1 = arith.constant 0 : i32
    return %c0_i32, %c0_i32_0 : i32, i32
  }
  func.func @transform_2(%arg0: i32) -> (i32, i32) {
    %c0_i32 = arith.constant 0 : i32
    %c0_i32_0 = arith.constant 0 : i32
    %c0_i32_1 = arith.constant 0 : i32
    return %c0_i32, %c0_i32_0 : i32, i32
  }
  func.func @transform_3(%arg0: i32) -> (i32, i32, i32) {
    %c0_i32 = arith.constant 0 : i32
    %c0_i32_0 = arith.constant 0 : i32
    %c0_i32_1 = arith.constant 0 : i32
    return %arg0, %c0_i32, %c0_i32_0 : i32, i32, i32
  }
}

module attributes {stable_mosaic.version = 11 : i64} {
  func.func @_ct_matmul_kernel(%arg0: i32, %arg1: memref<1x40x8xf32, #tpu.memory_space<vmem>>, %arg2: memref<8x40xf32, #tpu.memory_space<vmem>>, %arg3: memref<8x1xf32, #tpu.memory_space<vmem>>, %arg4: memref<1x8x8xf32, #tpu.memory_space<vmem>>) attributes {dimension_semantics = [#tpu.dimension_semantics<parallel>], iteration_bounds = array<i64: 2>, scalar_prefetch = 0 : i64, scratch_operands = 0 : i64, tpu.core_type = #tpu.core_type<tc>, window_params = [{transform_indices = @transform_0, window_bounds = array<i64: 1, 40, 8>}, {pipeline_mode = #tpu.pipeline_mode<synchronous>, transform_indices = @transform_1, window_bounds = array<i64: 8, 40>}, {pipeline_mode = #tpu.pipeline_mode<synchronous>, transform_indices = @transform_2, window_bounds = array<i64: 8, 1>}, {transform_indices = @transform_3, window_bounds = array<i64: 1, 8, 8>}]} {
    %c0 = arith.constant 0 : index
    %c0_0 = arith.constant 0 : index
    %0 = vector.load %arg2[%c0, %c0_0] : memref<8x40xf32, #tpu.memory_space<vmem>>, vector<8x40xf32>
    %c0_1 = arith.constant 0 : index
    %c0_2 = arith.constant 0 : index
    %c0_3 = arith.constant 0 : index
    %1 = vector.load %arg1[%c0_1, %c0_2, %c0_3] : memref<1x40x8xf32, #tpu.memory_space<vmem>>, vector<1x40x8xf32>
    %2 = vector.shape_cast %1 : vector<1x40x8xf32> to vector<40x8xf32>
    %cst = arith.constant dense<0.000000e+00> : vector<8x8xf32>
    %3 = tpu.matmul %0, %2, %cst {dimension_numbers = #tpu.dot_dimension_numbers<[1], [0], [0], [1], [0, 0, 1, 1], [], []>} : vector<8x40xf32>, vector<40x8xf32>, vector<8x8xf32> -> vector<8x8xf32>
    %c0_4 = arith.constant 0 : index
    %c0_5 = arith.constant 0 : index
    %4 = vector.load %arg3[%c0_4, %c0_5] : memref<8x1xf32, #tpu.memory_space<vmem>>, vector<8x1xf32>
    %5 = vector.broadcast %4 : vector<8x1xf32> to vector<8x8xf32>
    %6 = arith.addf %3, %5 : vector<8x8xf32>
    %c0_6 = arith.constant 0 : index
    %c0_7 = arith.constant 0 : index
    %c0_8 = arith.constant 0 : index
    %7 = vector.load %arg4[%c0_6, %c0_7, %c0_8] : memref<1x8x8xf32, #tpu.memory_space<vmem>>, vector<1x8x8xf32>
    %8 = vector.shape_cast %7 : vector<1x8x8xf32> to vector<8x8xf32>
    %9 = vector.shape_cast %6 : vector<8x8xf32> to vector<1x8x8xf32>
    tpu.vector_store %arg4[%c0_6, %c0_7, %c0_8], %9 {strides = array<i32>} : memref<1x8x8xf32, #tpu.memory_space<vmem>>, vector<1x8x8xf32>,
    return
  }
  func.func @transform_0(%arg0: i32) -> (i32, i32, i32) {
    %c0_i32 = arith.constant 0 : i32
    %c0_i32_0 = arith.constant 0 : i32
    %c0_i32_1 = arith.constant 0 : i32
    return %arg0, %c0_i32, %c0_i32_0 : i32, i32, i32
  }
  func.func @transform_1(%arg0: i32) -> (i32, i32) {
    %c0_i32 = arith.constant 0 : i32
    %c0_i32_0 = arith.constant 0 : i32
    %c0_i32_1 = arith.constant 0 : i32
    return %c0_i32, %c0_i32_0 : i32, i32
  }
  func.func @transform_2(%arg0: i32) -> (i32, i32) {
    %c0_i32 = arith.constant 0 : i32
    %c0_i32_0 = arith.constant 0 : i32
    %c0_i32_1 = arith.constant 0 : i32
    return %c0_i32, %c0_i32_0 : i32, i32
  }
  func.func @transform_3(%arg0: i32) -> (i32, i32, i32) {
    %c0_i32 = arith.constant 0 : i32
    %c0_i32_0 = arith.constant 0 : i32
    %c0_i32_1 = arith.constant 0 : i32
    return %arg0, %c0_i32, %c0_i32_0 : i32, i32, i32
  }
}

module attributes {stable_mosaic.version = 11 : i64} {
  func.func @_ct_matmul_kernel(%arg0: i32, %arg1: memref<1x24x8xf32, #tpu.memory_space<vmem>>, %arg2: memref<32x24xf32, #tpu.memory_space<vmem>>, %arg3: memref<32x1xf32, #tpu.memory_space<vmem>>, %arg4: memref<1x32x8xf32, #tpu.memory_space<vmem>>) attributes {dimension_semantics = [#tpu.dimension_semantics<parallel>], iteration_bounds = array<i64: 2>, scalar_prefetch = 0 : i64, scratch_operands = 0 : i64, tpu.core_type = #tpu.core_type<tc>, window_params = [{transform_indices = @transform_0, window_bounds = array<i64: 1, 24, 8>}, {pipeline_mode = #tpu.pipeline_mode<synchronous>, transform_indices = @transform_1, window_bounds = array<i64: 32, 24>}, {pipeline_mode = #tpu.pipeline_mode<synchronous>, transform_indices = @transform_2, window_bounds = array<i64: 32, 1>}, {transform_indices = @transform_3, window_bounds = array<i64: 1, 32, 8>}]} {
    %c0 = arith.constant 0 : index
    %c0_0 = arith.constant 0 : index
    %0 = vector.load %arg2[%c0, %c0_0] : memref<32x24xf32, #tpu.memory_space<vmem>>, vector<32x24xf32>
    %c0_1 = arith.constant 0 : index
    %c0_2 = arith.constant 0 : index
    %c0_3 = arith.constant 0 : index
    %1 = vector.load %arg1[%c0_1, %c0_2, %c0_3] : memref<1x24x8xf32, #tpu.memory_space<vmem>>, vector<1x24x8xf32>
    %2 = vector.shape_cast %1 : vector<1x24x8xf32> to vector<24x8xf32>
    %cst = arith.constant dense<0.000000e+00> : vector<32x8xf32>
    %3 = tpu.matmul %0, %2, %cst {dimension_numbers = #tpu.dot_dimension_numbers<[1], [0], [0], [1], [0, 0, 1, 1], [], []>} : vector<32x24xf32>, vector<24x8xf32>, vector<32x8xf32> -> vector<32x8xf32>
    %c0_4 = arith.constant 0 : index
    %c0_5 = arith.constant 0 : index
    %4 = vector.load %arg3[%c0_4, %c0_5] : memref<32x1xf32, #tpu.memory_space<vmem>>, vector<32x1xf32>
    %5 = vector.broadcast %4 : vector<32x1xf32> to vector<32x8xf32>
    %6 = arith.addf %3, %5 : vector<32x8xf32>
    %c0_6 = arith.constant 0 : index
    %c0_7 = arith.constant 0 : index
    %c0_8 = arith.constant 0 : index
    %7 = vector.load %arg4[%c0_6, %c0_7, %c0_8] : memref<1x32x8xf32, #tpu.memory_space<vmem>>, vector<1x32x8xf32>
    %8 = vector.shape_cast %7 : vector<1x32x8xf32> to vector<32x8xf32>
    %9 = vector.shape_cast %6 : vector<32x8xf32> to vector<1x32x8xf32>
    tpu.vector_store %arg4[%c0_6, %c0_7, %c0_8], %9 {strides = array<i32>} : memref<1x32x8xf32, #tpu.memory_space<vmem>>, vector<1x32x8xf32>,
    return
  }
  func.func @transform_0(%arg0: i32) -> (i32, i32, i32) {
    %c0_i32 = arith.constant 0 : i32
    %c0_i32_0 = arith.constant 0 : i32
    %c0_i32_1 = arith.constant 0 : i32
    return %arg0, %c0_i32, %c0_i32_0 : i32, i32, i32
  }
  func.func @transform_1(%arg0: i32) -> (i32, i32) {
    %c0_i32 = arith.constant 0 : i32
    %c0_i32_0 = arith.constant 0 : i32
    %c0_i32_1 = arith.constant 0 : i32
    return %c0_i32, %c0_i32_0 : i32, i32
  }
  func.func @transform_2(%arg0: i32) -> (i32, i32) {
    %c0_i32 = arith.constant 0 : i32
    %c0_i32_0 = arith.constant 0 : i32
    %c0_i32_1 = arith.constant 0 : i32
    return %c0_i32, %c0_i32_0 : i32, i32
  }
  func.func @transform_3(%arg0: i32) -> (i32, i32, i32) {
    %c0_i32 = arith.constant 0 : i32
    %c0_i32_0 = arith.constant 0 : i32
    %c0_i32_1 = arith.constant 0 : i32
    return %arg0, %c0_i32, %c0_i32_0 : i32, i32, i32
  }
}

module attributes {stable_mosaic.version = 11 : i64} {
  func.func @_ct_matmul_kernel(%arg0: i32, %arg1: memref<1x24x32xf32, #tpu.memory_space<vmem>>, %arg2: memref<32x24xf32, #tpu.memory_space<vmem>>, %arg3: memref<32x1xf32, #tpu.memory_space<vmem>>, %arg4: memref<1x32x32xf32, #tpu.memory_space<vmem>>) attributes {dimension_semantics = [#tpu.dimension_semantics<parallel>], iteration_bounds = array<i64: 2>, scalar_prefetch = 0 : i64, scratch_operands = 0 : i64, tpu.core_type = #tpu.core_type<tc>, window_params = [{transform_indices = @transform_0, window_bounds = array<i64: 1, 24, 32>}, {pipeline_mode = #tpu.pipeline_mode<synchronous>, transform_indices = @transform_1, window_bounds = array<i64: 32, 24>}, {pipeline_mode = #tpu.pipeline_mode<synchronous>, transform_indices = @transform_2, window_bounds = array<i64: 32, 1>}, {transform_indices = @transform_3, window_bounds = array<i64: 1, 32, 32>}]} {
    %c0 = arith.constant 0 : index
    %c0_0 = arith.constant 0 : index
    %0 = vector.load %arg2[%c0, %c0_0] : memref<32x24xf32, #tpu.memory_space<vmem>>, vector<32x24xf32>
    %c0_1 = arith.constant 0 : index
    %c0_2 = arith.constant 0 : index
    %c0_3 = arith.constant 0 : index
    %1 = vector.load %arg1[%c0_1, %c0_2, %c0_3] : memref<1x24x32xf32, #tpu.memory_space<vmem>>, vector<1x24x32xf32>
    %2 = vector.shape_cast %1 : vector<1x24x32xf32> to vector<24x32xf32>
    %cst = arith.constant dense<0.000000e+00> : vector<32x32xf32>
    %3 = tpu.matmul %0, %2, %cst {dimension_numbers = #tpu.dot_dimension_numbers<[1], [0], [0], [1], [0, 0, 1, 1], [], []>} : vector<32x24xf32>, vector<24x32xf32>, vector<32x32xf32> -> vector<32x32xf32>
    %c0_4 = arith.constant 0 : index
    %c0_5 = arith.constant 0 : index
    %4 = vector.load %arg3[%c0_4, %c0_5] : memref<32x1xf32, #tpu.memory_space<vmem>>, vector<32x1xf32>
    %5 = vector.broadcast %4 : vector<32x1xf32> to vector<32x32xf32>
    %6 = arith.addf %3, %5 : vector<32x32xf32>
    %c0_6 = arith.constant 0 : index
    %c0_7 = arith.constant 0 : index
    %c0_8 = arith.constant 0 : index
    %7 = vector.load %arg4[%c0_6, %c0_7, %c0_8] : memref<1x32x32xf32, #tpu.memory_space<vmem>>, vector<1x32x32xf32>
    %8 = vector.shape_cast %7 : vector<1x32x32xf32> to vector<32x32xf32>
    %9 = vector.shape_cast %6 : vector<32x32xf32> to vector<1x32x32xf32>
    tpu.vector_store %arg4[%c0_6, %c0_7, %c0_8], %9 {strides = array<i32>} : memref<1x32x32xf32, #tpu.memory_space<vmem>>, vector<1x32x32xf32>,
    return
  }
  func.func @transform_0(%arg0: i32) -> (i32, i32, i32) {
    %c0_i32 = arith.constant 0 : i32
    %c0_i32_0 = arith.constant 0 : i32
    %c0_i32_1 = arith.constant 0 : i32
    return %arg0, %c0_i32, %c0_i32_0 : i32, i32, i32
  }
  func.func @transform_1(%arg0: i32) -> (i32, i32) {
    %c0_i32 = arith.constant 0 : i32
    %c0_i32_0 = arith.constant 0 : i32
    %c0_i32_1 = arith.constant 0 : i32
    return %c0_i32, %c0_i32_0 : i32, i32
  }
  func.func @transform_2(%arg0: i32) -> (i32, i32) {
    %c0_i32 = arith.constant 0 : i32
    %c0_i32_0 = arith.constant 0 : i32
    %c0_i32_1 = arith.constant 0 : i32
    return %c0_i32, %c0_i32_0 : i32, i32
  }
  func.func @transform_3(%arg0: i32) -> (i32, i32, i32) {
    %c0_i32 = arith.constant 0 : i32
    %c0_i32_0 = arith.constant 0 : i32
    %c0_i32_1 = arith.constant 0 : i32
    return %arg0, %c0_i32, %c0_i32_0 : i32, i32, i32
  }
}

module attributes {stable_mosaic.version = 11 : i64} {
  func.func @_fused_stack_kernel(%arg0: i32, %arg1: memref<1x4x128xf32, #tpu.memory_space<vmem>>, %arg2: memref<1x8x128xf32, #tpu.memory_space<vmem>>, %arg3: memref<16x4xbf16, #tpu.memory_space<vmem>>, %arg4: memref<16x1xf32, #tpu.memory_space<vmem>>, %arg5: memref<6x32x56xbf16, #tpu.memory_space<vmem>>, %arg6: memref<6x32x1xf32, #tpu.memory_space<vmem>>, %arg7: memref<6x32x16xbf16, #tpu.memory_space<vmem>>, %arg8: memref<6x32x1xf32, #tpu.memory_space<vmem>>, %arg9: memref<16x16xbf16, #tpu.memory_space<vmem>>, %arg10: memref<16x1xf32, #tpu.memory_space<vmem>>, %arg11: memref<4x16xbf16, #tpu.memory_space<vmem>>, %arg12: memref<4x1xf32, #tpu.memory_space<vmem>>, %arg13: memref<1x4x128xf32, #tpu.memory_space<vmem>>) attributes {dimension_semantics = [#tpu.dimension_semantics<parallel>], iteration_bounds = array<i64: 2>, scalar_prefetch = 0 : i64, scratch_operands = 0 : i64, tpu.core_type = #tpu.core_type<tc>, window_params = [{transform_indices = @transform_0, window_bounds = array<i64: 1, 4, 128>}, {transform_indices = @transform_1, window_bounds = array<i64: 1, 8, 128>}, {pipeline_mode = #tpu.pipeline_mode<synchronous>, transform_indices = @transform_2, window_bounds = array<i64: 16, 4>}, {pipeline_mode = #tpu.pipeline_mode<synchronous>, transform_indices = @transform_3, window_bounds = array<i64: 16, 1>}, {pipeline_mode = #tpu.pipeline_mode<synchronous>, transform_indices = @transform_4, window_bounds = array<i64: 6, 32, 56>}, {pipeline_mode = #tpu.pipeline_mode<synchronous>, transform_indices = @transform_5, window_bounds = array<i64: 6, 32, 1>}, {pipeline_mode = #tpu.pipeline_mode<synchronous>, transform_indices = @transform_6, window_bounds = array<i64: 6, 32, 16>}, {pipeline_mode = #tpu.pipeline_mode<synchronous>, transform_indices = @transform_7, window_bounds = array<i64: 6, 32, 1>}, {pipeline_mode = #tpu.pipeline_mode<synchronous>, transform_indices = @transform_8, window_bounds = array<i64: 16, 16>}, {pipeline_mode = #tpu.pipeline_mode<synchronous>, transform_indices = @transform_9, window_bounds = array<i64: 16, 1>}, {pipeline_mode = #tpu.pipeline_mode<synchronous>, transform_indices = @transform_10, window_bounds = array<i64: 4, 16>}, {pipeline_mode = #tpu.pipeline_mode<synchronous>, transform_indices = @transform_11, window_bounds = array<i64: 4, 1>}, {transform_indices = @transform_12, window_bounds = array<i64: 1, 4, 128>}]} {
    %c0 = arith.constant 0 : index
    %c0_0 = arith.constant 0 : index
    %c0_1 = arith.constant 0 : index
    %0 = vector.load %arg1[%c0, %c0_0, %c0_1] : memref<1x4x128xf32, #tpu.memory_space<vmem>>, vector<1x4x128xf32>
    %1 = vector.shape_cast %0 : vector<1x4x128xf32> to vector<4x128xf32>
    %2 = arith.truncf %1 : vector<4x128xf32> to vector<4x128xbf16>
    %c0_2 = arith.constant 0 : index
    %c0_3 = arith.constant 0 : index
    %c0_4 = arith.constant 0 : index
    %3 = vector.load %arg2[%c0_2, %c0_3, %c0_4] : memref<1x8x128xf32, #tpu.memory_space<vmem>>, vector<1x8x128xf32>
    %4 = vector.shape_cast %3 : vector<1x8x128xf32> to vector<8x128xf32>
    %c0_5 = arith.constant 0 : index
    %c0_6 = arith.constant 0 : index
    %5 = vector.load %arg3[%c0_5, %c0_6] : memref<16x4xbf16, #tpu.memory_space<vmem>>, vector<16x4xbf16>
    %cst = arith.constant dense<0.000000e+00> : vector<16x128xf32>
    %6 = tpu.matmul %5, %2, %cst {dimension_numbers = #tpu.dot_dimension_numbers<[1], [0], [0], [1], [0, 0, 1, 1], [], []>} : vector<16x4xbf16>, vector<4x128xbf16>, vector<16x128xf32> -> vector<16x128xf32>
    %c0_7 = arith.constant 0 : index
    %c0_8 = arith.constant 0 : index
    %7 = vector.load %arg4[%c0_7, %c0_8] : memref<16x1xf32, #tpu.memory_space<vmem>>, vector<16x1xf32>
    %8 = vector.broadcast %7 : vector<16x1xf32> to vector<16x128xf32>
    %9 = arith.addf %6, %8 : vector<16x128xf32>
    %10 = tpu.iota {dimensions = array<i32: 1>} : vector<16x128xi32>
    %cst_9 = arith.constant 0.000000e+00 : f32
    %11 = vector.broadcast %cst_9 : f32 to vector<16x128xf32>
    %c1_i32 = arith.constant 1 : i32
    %12 = tpu.dynamic_rotate %9 by %c1_i32 dim 1 : vector<16x128xf32>, i32 -> vector<16x128xf32>
    %c1_i32_10 = arith.constant 1 : i32
    %13 = vector.broadcast %c1_i32_10 : i32 to vector<16x128xi32>
    %14 = arith.cmpi sge, %10, %13 : vector<16x128xi32>
    %c129_i32 = arith.constant 129 : i32
    %15 = vector.broadcast %c129_i32 : i32 to vector<16x128xi32>
    %16 = arith.cmpi slt, %10, %15 : vector<16x128xi32>
    %17 = arith.andi %14, %16 : vector<16x128xi1>
    %cst_11 = arith.constant 0.000000e+00 : f32
    %18 = vector.broadcast %cst_11 : f32 to vector<16x128xf32>
    %19 = arith.select %17, %12, %18 : vector<16x128xi1>, vector<16x128xf32>
    %c127_i32 = arith.constant 127 : i32
    %20 = tpu.dynamic_rotate %9 by %c127_i32 dim 1 : vector<16x128xf32>, i32 -> vector<16x128xf32>
    %c-1_i32 = arith.constant -1 : i32
    %21 = vector.broadcast %c-1_i32 : i32 to vector<16x128xi32>
    %22 = arith.cmpi sge, %10, %21 : vector<16x128xi32>
    %c127_i32_12 = arith.constant 127 : i32
    %23 = vector.broadcast %c127_i32_12 : i32 to vector<16x128xi32>
    %24 = arith.cmpi slt, %10, %23 : vector<16x128xi32>
    %25 = arith.andi %22, %24 : vector<16x128xi1>
    %cst_13 = arith.constant 0.000000e+00 : f32
    %26 = vector.broadcast %cst_13 : f32 to vector<16x128xf32>
    %27 = arith.select %25, %20, %26 : vector<16x128xi1>, vector<16x128xf32>
    %28 = tpu.concatenate %19, %9, %27, %4 in 0 : vector<16x128xf32>, vector<16x128xf32>, vector<16x128xf32>, vector<8x128xf32> -> vector<56x128xf32>
    %29 = arith.truncf %28 : vector<56x128xf32> to vector<56x128xbf16>
    %c0_14 = arith.constant 0 : index
    %c0_15 = arith.constant 0 : index
    %c0_16 = arith.constant 0 : index
    %30 = vector.load %arg5[%c0_14, %c0_15, %c0_16] : memref<6x32x56xbf16, #tpu.memory_space<vmem>>, vector<1x32x56xbf16>
    %31 = vector.shape_cast %30 : vector<1x32x56xbf16> to vector<32x56xbf16>
    %cst_17 = arith.constant dense<0.000000e+00> : vector<32x128xf32>
    %32 = tpu.matmul %31, %29, %cst_17 {dimension_numbers = #tpu.dot_dimension_numbers<[1], [0], [0], [1], [0, 0, 1, 1], [], []>} : vector<32x56xbf16>, vector<56x128xbf16>, vector<32x128xf32> -> vector<32x128xf32>
    %c0_18 = arith.constant 0 : index
    %c0_19 = arith.constant 0 : index
    %c0_20 = arith.constant 0 : index
    %33 = vector.load %arg6[%c0_18, %c0_19, %c0_20] : memref<6x32x1xf32, #tpu.memory_space<vmem>>, vector<1x32x1xf32>
    %34 = vector.shape_cast %33 : vector<1x32x1xf32> to vector<32x1xf32>
    %35 = vector.broadcast %34 : vector<32x1xf32> to vector<32x128xf32>
    %36 = arith.addf %32, %35 : vector<32x128xf32>
    %37 = vector.extract_strided_slice %36 {offsets = [0, 0], sizes = [16, 128], strides = [1, 1]} : vector<32x128xf32> to vector<16x128xf32>
    %38 = math.tanh %37 : vector<16x128xf32>
    %39 = vector.extract_strided_slice %36 {offsets = [16, 0], sizes = [16, 128], strides = [1, 1]} : vector<32x128xf32> to vector<16x128xf32>
    %40 = arith.negf %39 : vector<16x128xf32>
    %41 = math.exp %40 : vector<16x128xf32>
    %cst_21 = arith.constant 1.000000e+00 : f32
    %42 = vector.broadcast %cst_21 : f32 to vector<16x128xf32>
    %43 = arith.addf %42, %41 : vector<16x128xf32>
    %44 = arith.divf %42, %43 : vector<16x128xf32>
    %45 = arith.mulf %38, %44 : vector<16x128xf32>
    %c0_22 = arith.constant 0 : index
    %c0_23 = arith.constant 0 : index
    %c0_24 = arith.constant 0 : index
    %46 = vector.load %arg7[%c0_22, %c0_23, %c0_24] : memref<6x32x16xbf16, #tpu.memory_space<vmem>>, vector<1x32x16xbf16>
    %47 = vector.shape_cast %46 : vector<1x32x16xbf16> to vector<32x16xbf16>
    %48 = arith.truncf %45 : vector<16x128xf32> to vector<16x128xbf16>
    %cst_25 = arith.constant dense<0.000000e+00> : vector<32x128xf32>
    %49 = tpu.matmul %47, %48, %cst_25 {dimension_numbers = #tpu.dot_dimension_numbers<[1], [0], [0], [1], [0, 0, 1, 1], [], []>} : vector<32x16xbf16>, vector<16x128xbf16>, vector<32x128xf32> -> vector<32x128xf32>
    %c0_26 = arith.constant 0 : index
    %c0_27 = arith.constant 0 : index
    %c0_28 = arith.constant 0 : index
    %50 = vector.load %arg8[%c0_26, %c0_27, %c0_28] : memref<6x32x1xf32, #tpu.memory_space<vmem>>, vector<1x32x1xf32>
    %51 = vector.shape_cast %50 : vector<1x32x1xf32> to vector<32x1xf32>
    %52 = vector.broadcast %51 : vector<32x1xf32> to vector<32x128xf32>
    %53 = arith.addf %49, %52 : vector<32x128xf32>
    %54 = vector.extract_strided_slice %53 {offsets = [0, 0], sizes = [16, 128], strides = [1, 1]} : vector<32x128xf32> to vector<16x128xf32>
    %55 = arith.addf %11, %54 : vector<16x128xf32>
    %56 = vector.extract_strided_slice %53 {offsets = [16, 0], sizes = [16, 128], strides = [1, 1]} : vector<32x128xf32> to vector<16x128xf32>
    %57 = arith.addf %56, %9 : vector<16x128xf32>
    %cst_29 = arith.constant 0.707106769 : f32
    %58 = vector.broadcast %cst_29 : f32 to vector<16x128xf32>
    %59 = arith.mulf %57, %58 : vector<16x128xf32>
    %c2_i32 = arith.constant 2 : i32
    %60 = tpu.dynamic_rotate %59 by %c2_i32 dim 1 : vector<16x128xf32>, i32 -> vector<16x128xf32>
    %c2_i32_30 = arith.constant 2 : i32
    %61 = vector.broadcast %c2_i32_30 : i32 to vector<16x128xi32>
    %62 = arith.cmpi sge, %10, %61 : vector<16x128xi32>
    %c130_i32 = arith.constant 130 : i32
    %63 = vector.broadcast %c130_i32 : i32 to vector<16x128xi32>
    %64 = arith.cmpi slt, %10, %63 : vector<16x128xi32>
    %65 = arith.andi %62, %64 : vector<16x128xi1>
    %cst_31 = arith.constant 0.000000e+00 : f32
    %66 = vector.broadcast %cst_31 : f32 to vector<16x128xf32>
    %67 = arith.select %65, %60, %66 : vector<16x128xi1>, vector<16x128xf32>
    %c126_i32 = arith.constant 126 : i32
    %68 = tpu.dynamic_rotate %59 by %c126_i32 dim 1 : vector<16x128xf32>, i32 -> vector<16x128xf32>
    %c-2_i32 = arith.constant -2 : i32
    %69 = vector.broadcast %c-2_i32 : i32 to vector<16x128xi32>
    %70 = arith.cmpi sge, %10, %69 : vector<16x128xi32>
    %c126_i32_32 = arith.constant 126 : i32
    %71 = vector.broadcast %c126_i32_32 : i32 to vector<16x128xi32>
    %72 = arith.cmpi slt, %10, %71 : vector<16x128xi32>
    %73 = arith.andi %70, %72 : vector<16x128xi1>
    %cst_33 = arith.constant 0.000000e+00 : f32
    %74 = vector.broadcast %cst_33 : f32 to vector<16x128xf32>
    %75 = arith.select %73, %68, %74 : vector<16x128xi1>, vector<16x128xf32>
    %76 = tpu.concatenate %67, %59, %75, %4 in 0 : vector<16x128xf32>, vector<16x128xf32>, vector<16x128xf32>, vector<8x128xf32> -> vector<56x128xf32>
    %77 = arith.truncf %76 : vector<56x128xf32> to vector<56x128xbf16>
    %c1 = arith.constant 1 : index
    %c0_34 = arith.constant 0 : index
    %c0_35 = arith.constant 0 : index
    %78 = vector.load %arg5[%c1, %c0_34, %c0_35] : memref<6x32x56xbf16, #tpu.memory_space<vmem>>, vector<1x32x56xbf16>
    %79 = vector.shape_cast %78 : vector<1x32x56xbf16> to vector<32x56xbf16>
    %cst_36 = arith.constant dense<0.000000e+00> : vector<32x128xf32>
    %80 = tpu.matmul %79, %77, %cst_36 {dimension_numbers = #tpu.dot_dimension_numbers<[1], [0], [0], [1], [0, 0, 1, 1], [], []>} : vector<32x56xbf16>, vector<56x128xbf16>, vector<32x128xf32> -> vector<32x128xf32>
    %c1_37 = arith.constant 1 : index
    %c0_38 = arith.constant 0 : index
    %c0_39 = arith.constant 0 : index
    %81 = vector.load %arg6[%c1_37, %c0_38, %c0_39] : memref<6x32x1xf32, #tpu.memory_space<vmem>>, vector<1x32x1xf32>
    %82 = vector.shape_cast %81 : vector<1x32x1xf32> to vector<32x1xf32>
    %83 = vector.broadcast %82 : vector<32x1xf32> to vector<32x128xf32>
    %84 = arith.addf %80, %83 : vector<32x128xf32>
    %85 = vector.extract_strided_slice %84 {offsets = [0, 0], sizes = [16, 128], strides = [1, 1]} : vector<32x128xf32> to vector<16x128xf32>
    %86 = math.tanh %85 : vector<16x128xf32>
    %87 = vector.extract_strided_slice %84 {offsets = [16, 0], sizes = [16, 128], strides = [1, 1]} : vector<32x128xf32> to vector<16x128xf32>
    %88 = arith.negf %87 : vector<16x128xf32>
    %89 = math.exp %88 : vector<16x128xf32>
    %cst_40 = arith.constant 1.000000e+00 : f32
    %90 = vector.broadcast %cst_40 : f32 to vector<16x128xf32>
    %91 = arith.addf %90, %89 : vector<16x128xf32>
    %92 = arith.divf %90, %91 : vector<16x128xf32>
    %93 = arith.mulf %86, %92 : vector<16x128xf32>
    %c1_41 = arith.constant 1 : index
    %c0_42 = arith.constant 0 : index
    %c0_43 = arith.constant 0 : index
    %94 = vector.load %arg7[%c1_41, %c0_42, %c0_43] : memref<6x32x16xbf16, #tpu.memory_space<vmem>>, vector<1x32x16xbf16>
    %95 = vector.shape_cast %94 : vector<1x32x16xbf16> to vector<32x16xbf16>
    %96 = arith.truncf %93 : vector<16x128xf32> to vector<16x128xbf16>
    %cst_44 = arith.constant dense<0.000000e+00> : vector<32x128xf32>
    %97 = tpu.matmul %95, %96, %cst_44 {dimension_numbers = #tpu.dot_dimension_numbers<[1], [0], [0], [1], [0, 0, 1, 1], [], []>} : vector<32x16xbf16>, vector<16x128xbf16>, vector<32x128xf32> -> vector<32x128xf32>
    %c1_45 = arith.constant 1 : index
    %c0_46 = arith.constant 0 : index
    %c0_47 = arith.constant 0 : index
    %98 = vector.load %arg8[%c1_45, %c0_46, %c0_47] : memref<6x32x1xf32, #tpu.memory_space<vmem>>, vector<1x32x1xf32>
    %99 = vector.shape_cast %98 : vector<1x32x1xf32> to vector<32x1xf32>
    %100 = vector.broadcast %99 : vector<32x1xf32> to vector<32x128xf32>
    %101 = arith.addf %97, %100 : vector<32x128xf32>
    %102 = vector.extract_strided_slice %101 {offsets = [0, 0], sizes = [16, 128], strides = [1, 1]} : vector<32x128xf32> to vector<16x128xf32>
    %103 = arith.addf %55, %102 : vector<16x128xf32>
    %104 = vector.extract_strided_slice %101 {offsets = [16, 0], sizes = [16, 128], strides = [1, 1]} : vector<32x128xf32> to vector<16x128xf32>
    %105 = arith.addf %104, %59 : vector<16x128xf32>
    %cst_48 = arith.constant 0.707106769 : f32
    %106 = vector.broadcast %cst_48 : f32 to vector<16x128xf32>
    %107 = arith.mulf %105, %106 : vector<16x128xf32>
    %c1_i32_49 = arith.constant 1 : i32
    %108 = tpu.dynamic_rotate %107 by %c1_i32_49 dim 1 : vector<16x128xf32>, i32 -> vector<16x128xf32>
    %c1_i32_50 = arith.constant 1 : i32
    %109 = vector.broadcast %c1_i32_50 : i32 to vector<16x128xi32>
    %110 = arith.cmpi sge, %10, %109 : vector<16x128xi32>
    %c129_i32_51 = arith.constant 129 : i32
    %111 = vector.broadcast %c129_i32_51 : i32 to vector<16x128xi32>
    %112 = arith.cmpi slt, %10, %111 : vector<16x128xi32>
    %113 = arith.andi %110, %112 : vector<16x128xi1>
    %cst_52 = arith.constant 0.000000e+00 : f32
    %114 = vector.broadcast %cst_52 : f32 to vector<16x128xf32>
    %115 = arith.select %113, %108, %114 : vector<16x128xi1>, vector<16x128xf32>
    %c127_i32_53 = arith.constant 127 : i32
    %116 = tpu.dynamic_rotate %107 by %c127_i32_53 dim 1 : vector<16x128xf32>, i32 -> vector<16x128xf32>
    %c-1_i32_54 = arith.constant -1 : i32
    %117 = vector.broadcast %c-1_i32_54 : i32 to vector<16x128xi32>
    %118 = arith.cmpi sge, %10, %117 : vector<16x128xi32>
    %c127_i32_55 = arith.constant 127 : i32
    %119 = vector.broadcast %c127_i32_55 : i32 to vector<16x128xi32>
    %120 = arith.cmpi slt, %10, %119 : vector<16x128xi32>
    %121 = arith.andi %118, %120 : vector<16x128xi1>
    %cst_56 = arith.constant 0.000000e+00 : f32
    %122 = vector.broadcast %cst_56 : f32 to vector<16x128xf32>
    %123 = arith.select %121, %116, %122 : vector<16x128xi1>, vector<16x128xf32>
    %124 = tpu.concatenate %115, %107, %123, %4 in 0 : vector<16x128xf32>, vector<16x128xf32>, vector<16x128xf32>, vector<8x128xf32> -> vector<56x128xf32>
    %125 = arith.truncf %124 : vector<56x128xf32> to vector<56x128xbf16>
    %c2 = arith.constant 2 : index
    %c0_57 = arith.constant 0 : index
    %c0_58 = arith.constant 0 : index
    %126 = vector.load %arg5[%c2, %c0_57, %c0_58] : memref<6x32x56xbf16, #tpu.memory_space<vmem>>, vector<1x32x56xbf16>
    %127 = vector.shape_cast %126 : vector<1x32x56xbf16> to vector<32x56xbf16>
    %cst_59 = arith.constant dense<0.000000e+00> : vector<32x128xf32>
    %128 = tpu.matmul %127, %125, %cst_59 {dimension_numbers = #tpu.dot_dimension_numbers<[1], [0], [0], [1], [0, 0, 1, 1], [], []>} : vector<32x56xbf16>, vector<56x128xbf16>, vector<32x128xf32> -> vector<32x128xf32>
    %c2_60 = arith.constant 2 : index
    %c0_61 = arith.constant 0 : index
    %c0_62 = arith.constant 0 : index
    %129 = vector.load %arg6[%c2_60, %c0_61, %c0_62] : memref<6x32x1xf32, #tpu.memory_space<vmem>>, vector<1x32x1xf32>
    %130 = vector.shape_cast %129 : vector<1x32x1xf32> to vector<32x1xf32>
    %131 = vector.broadcast %130 : vector<32x1xf32> to vector<32x128xf32>
    %132 = arith.addf %128, %131 : vector<32x128xf32>
    %133 = vector.extract_strided_slice %132 {offsets = [0, 0], sizes = [16, 128], strides = [1, 1]} : vector<32x128xf32> to vector<16x128xf32>
    %134 = math.tanh %133 : vector<16x128xf32>
    %135 = vector.extract_strided_slice %132 {offsets = [16, 0], sizes = [16, 128], strides = [1, 1]} : vector<32x128xf32> to vector<16x128xf32>
    %136 = arith.negf %135 : vector<16x128xf32>
    %137 = math.exp %136 : vector<16x128xf32>
    %cst_63 = arith.constant 1.000000e+00 : f32
    %138 = vector.broadcast %cst_63 : f32 to vector<16x128xf32>
    %139 = arith.addf %138, %137 : vector<16x128xf32>
    %140 = arith.divf %138, %139 : vector<16x128xf32>
    %141 = arith.mulf %134, %140 : vector<16x128xf32>
    %c2_64 = arith.constant 2 : index
    %c0_65 = arith.constant 0 : index
    %c0_66 = arith.constant 0 : index
    %142 = vector.load %arg7[%c2_64, %c0_65, %c0_66] : memref<6x32x16xbf16, #tpu.memory_space<vmem>>, vector<1x32x16xbf16>
    %143 = vector.shape_cast %142 : vector<1x32x16xbf16> to vector<32x16xbf16>
    %144 = arith.truncf %141 : vector<16x128xf32> to vector<16x128xbf16>
    %cst_67 = arith.constant dense<0.000000e+00> : vector<32x128xf32>
    %145 = tpu.matmul %143, %144, %cst_67 {dimension_numbers = #tpu.dot_dimension_numbers<[1], [0], [0], [1], [0, 0, 1, 1], [], []>} : vector<32x16xbf16>, vector<16x128xbf16>, vector<32x128xf32> -> vector<32x128xf32>
    %c2_68 = arith.constant 2 : index
    %c0_69 = arith.constant 0 : index
    %c0_70 = arith.constant 0 : index
    %146 = vector.load %arg8[%c2_68, %c0_69, %c0_70] : memref<6x32x1xf32, #tpu.memory_space<vmem>>, vector<1x32x1xf32>
    %147 = vector.shape_cast %146 : vector<1x32x1xf32> to vector<32x1xf32>
    %148 = vector.broadcast %147 : vector<32x1xf32> to vector<32x128xf32>
    %149 = arith.addf %145, %148 : vector<32x128xf32>
    %150 = vector.extract_strided_slice %149 {offsets = [0, 0], sizes = [16, 128], strides = [1, 1]} : vector<32x128xf32> to vector<16x128xf32>
    %151 = arith.addf %103, %150 : vector<16x128xf32>
    %152 = vector.extract_strided_slice %149 {offsets = [16, 0], sizes = [16, 128], strides = [1, 1]} : vector<32x128xf32> to vector<16x128xf32>
    %153 = arith.addf %152, %107 : vector<16x128xf32>
    %cst_71 = arith.constant 0.707106769 : f32
    %154 = vector.broadcast %cst_71 : f32 to vector<16x128xf32>
    %155 = arith.mulf %153, %154 : vector<16x128xf32>
    %c2_i32_72 = arith.constant 2 : i32
    %156 = tpu.dynamic_rotate %155 by %c2_i32_72 dim 1 : vector<16x128xf32>, i32 -> vector<16x128xf32>
    %c2_i32_73 = arith.constant 2 : i32
    %157 = vector.broadcast %c2_i32_73 : i32 to vector<16x128xi32>
    %158 = arith.cmpi sge, %10, %157 : vector<16x128xi32>
    %c130_i32_74 = arith.constant 130 : i32
    %159 = vector.broadcast %c130_i32_74 : i32 to vector<16x128xi32>
    %160 = arith.cmpi slt, %10, %159 : vector<16x128xi32>
    %161 = arith.andi %158, %160 : vector<16x128xi1>
    %cst_75 = arith.constant 0.000000e+00 : f32
    %162 = vector.broadcast %cst_75 : f32 to vector<16x128xf32>
    %163 = arith.select %161, %156, %162 : vector<16x128xi1>, vector<16x128xf32>
    %c126_i32_76 = arith.constant 126 : i32
    %164 = tpu.dynamic_rotate %155 by %c126_i32_76 dim 1 : vector<16x128xf32>, i32 -> vector<16x128xf32>
    %c-2_i32_77 = arith.constant -2 : i32
    %165 = vector.broadcast %c-2_i32_77 : i32 to vector<16x128xi32>
    %166 = arith.cmpi sge, %10, %165 : vector<16x128xi32>
    %c126_i32_78 = arith.constant 126 : i32
    %167 = vector.broadcast %c126_i32_78 : i32 to vector<16x128xi32>
    %168 = arith.cmpi slt, %10, %167 : vector<16x128xi32>
    %169 = arith.andi %166, %168 : vector<16x128xi1>
    %cst_79 = arith.constant 0.000000e+00 : f32
    %170 = vector.broadcast %cst_79 : f32 to vector<16x128xf32>
    %171 = arith.select %169, %164, %170 : vector<16x128xi1>, vector<16x128xf32>
    %172 = tpu.concatenate %163, %155, %171, %4 in 0 : vector<16x128xf32>, vector<16x128xf32>, vector<16x128xf32>, vector<8x128xf32> -> vector<56x128xf32>
    %173 = arith.truncf %172 : vector<56x128xf32> to vector<56x128xbf16>
    %c3 = arith.constant 3 : index
    %c0_80 = arith.constant 0 : index
    %c0_81 = arith.constant 0 : index
    %174 = vector.load %arg5[%c3, %c0_80, %c0_81] : memref<6x32x56xbf16, #tpu.memory_space<vmem>>, vector<1x32x56xbf16>
    %175 = vector.shape_cast %174 : vector<1x32x56xbf16> to vector<32x56xbf16>
    %cst_82 = arith.constant dense<0.000000e+00> : vector<32x128xf32>
    %176 = tpu.matmul %175, %173, %cst_82 {dimension_numbers = #tpu.dot_dimension_numbers<[1], [0], [0], [1], [0, 0, 1, 1], [], []>} : vector<32x56xbf16>, vector<56x128xbf16>, vector<32x128xf32> -> vector<32x128xf32>
    %c3_83 = arith.constant 3 : index
    %c0_84 = arith.constant 0 : index
    %c0_85 = arith.constant 0 : index
    %177 = vector.load %arg6[%c3_83, %c0_84, %c0_85] : memref<6x32x1xf32, #tpu.memory_space<vmem>>, vector<1x32x1xf32>
    %178 = vector.shape_cast %177 : vector<1x32x1xf32> to vector<32x1xf32>
    %179 = vector.broadcast %178 : vector<32x1xf32> to vector<32x128xf32>
    %180 = arith.addf %176, %179 : vector<32x128xf32>
    %181 = vector.extract_strided_slice %180 {offsets = [0, 0], sizes = [16, 128], strides = [1, 1]} : vector<32x128xf32> to vector<16x128xf32>
    %182 = math.tanh %181 : vector<16x128xf32>
    %183 = vector.extract_strided_slice %180 {offsets = [16, 0], sizes = [16, 128], strides = [1, 1]} : vector<32x128xf32> to vector<16x128xf32>
    %184 = arith.negf %183 : vector<16x128xf32>
    %185 = math.exp %184 : vector<16x128xf32>
    %cst_86 = arith.constant 1.000000e+00 : f32
    %186 = vector.broadcast %cst_86 : f32 to vector<16x128xf32>
    %187 = arith.addf %186, %185 : vector<16x128xf32>
    %188 = arith.divf %186, %187 : vector<16x128xf32>
    %189 = arith.mulf %182, %188 : vector<16x128xf32>
    %c3_87 = arith.constant 3 : index
    %c0_88 = arith.constant 0 : index
    %c0_89 = arith.constant 0 : index
    %190 = vector.load %arg7[%c3_87, %c0_88, %c0_89] : memref<6x32x16xbf16, #tpu.memory_space<vmem>>, vector<1x32x16xbf16>
    %191 = vector.shape_cast %190 : vector<1x32x16xbf16> to vector<32x16xbf16>
    %192 = arith.truncf %189 : vector<16x128xf32> to vector<16x128xbf16>
    %cst_90 = arith.constant dense<0.000000e+00> : vector<32x128xf32>
    %193 = tpu.matmul %191, %192, %cst_90 {dimension_numbers = #tpu.dot_dimension_numbers<[1], [0], [0], [1], [0, 0, 1, 1], [], []>} : vector<32x16xbf16>, vector<16x128xbf16>, vector<32x128xf32> -> vector<32x128xf32>
    %c3_91 = arith.constant 3 : index
    %c0_92 = arith.constant 0 : index
    %c0_93 = arith.constant 0 : index
    %194 = vector.load %arg8[%c3_91, %c0_92, %c0_93] : memref<6x32x1xf32, #tpu.memory_space<vmem>>, vector<1x32x1xf32>
    %195 = vector.shape_cast %194 : vector<1x32x1xf32> to vector<32x1xf32>
    %196 = vector.broadcast %195 : vector<32x1xf32> to vector<32x128xf32>
    %197 = arith.addf %193, %196 : vector<32x128xf32>
    %198 = vector.extract_strided_slice %197 {offsets = [0, 0], sizes = [16, 128], strides = [1, 1]} : vector<32x128xf32> to vector<16x128xf32>
    %199 = arith.addf %151, %198 : vector<16x128xf32>
    %200 = vector.extract_strided_slice %197 {offsets = [16, 0], sizes = [16, 128], strides = [1, 1]} : vector<32x128xf32> to vector<16x128xf32>
    %201 = arith.addf %200, %155 : vector<16x128xf32>
    %cst_94 = arith.constant 0.707106769 : f32
    %202 = vector.broadcast %cst_94 : f32 to vector<16x128xf32>
    %203 = arith.mulf %201, %202 : vector<16x128xf32>
    %c1_i32_95 = arith.constant 1 : i32
    %204 = tpu.dynamic_rotate %203 by %c1_i32_95 dim 1 : vector<16x128xf32>, i32 -> vector<16x128xf32>
    %c1_i32_96 = arith.constant 1 : i32
    %205 = vector.broadcast %c1_i32_96 : i32 to vector<16x128xi32>
    %206 = arith.cmpi sge, %10, %205 : vector<16x128xi32>
    %c129_i32_97 = arith.constant 129 : i32
    %207 = vector.broadcast %c129_i32_97 : i32 to vector<16x128xi32>
    %208 = arith.cmpi slt, %10, %207 : vector<16x128xi32>
    %209 = arith.andi %206, %208 : vector<16x128xi1>
    %cst_98 = arith.constant 0.000000e+00 : f32
    %210 = vector.broadcast %cst_98 : f32 to vector<16x128xf32>
    %211 = arith.select %209, %204, %210 : vector<16x128xi1>, vector<16x128xf32>
    %c127_i32_99 = arith.constant 127 : i32
    %212 = tpu.dynamic_rotate %203 by %c127_i32_99 dim 1 : vector<16x128xf32>, i32 -> vector<16x128xf32>
    %c-1_i32_100 = arith.constant -1 : i32
    %213 = vector.broadcast %c-1_i32_100 : i32 to vector<16x128xi32>
    %214 = arith.cmpi sge, %10, %213 : vector<16x128xi32>
    %c127_i32_101 = arith.constant 127 : i32
    %215 = vector.broadcast %c127_i32_101 : i32 to vector<16x128xi32>
    %216 = arith.cmpi slt, %10, %215 : vector<16x128xi32>
    %217 = arith.andi %214, %216 : vector<16x128xi1>
    %cst_102 = arith.constant 0.000000e+00 : f32
    %218 = vector.broadcast %cst_102 : f32 to vector<16x128xf32>
    %219 = arith.select %217, %212, %218 : vector<16x128xi1>, vector<16x128xf32>
    %220 = tpu.concatenate %211, %203, %219, %4 in 0 : vector<16x128xf32>, vector<16x128xf32>, vector<16x128xf32>, vector<8x128xf32> -> vector<56x128xf32>
    %221 = arith.truncf %220 : vector<56x128xf32> to vector<56x128xbf16>
    %c4 = arith.constant 4 : index
    %c0_103 = arith.constant 0 : index
    %c0_104 = arith.constant 0 : index
    %222 = vector.load %arg5[%c4, %c0_103, %c0_104] : memref<6x32x56xbf16, #tpu.memory_space<vmem>>, vector<1x32x56xbf16>
    %223 = vector.shape_cast %222 : vector<1x32x56xbf16> to vector<32x56xbf16>
    %cst_105 = arith.constant dense<0.000000e+00> : vector<32x128xf32>
    %224 = tpu.matmul %223, %221, %cst_105 {dimension_numbers = #tpu.dot_dimension_numbers<[1], [0], [0], [1], [0, 0, 1, 1], [], []>} : vector<32x56xbf16>, vector<56x128xbf16>, vector<32x128xf32> -> vector<32x128xf32>
    %c4_106 = arith.constant 4 : index
    %c0_107 = arith.constant 0 : index
    %c0_108 = arith.constant 0 : index
    %225 = vector.load %arg6[%c4_106, %c0_107, %c0_108] : memref<6x32x1xf32, #tpu.memory_space<vmem>>, vector<1x32x1xf32>
    %226 = vector.shape_cast %225 : vector<1x32x1xf32> to vector<32x1xf32>
    %227 = vector.broadcast %226 : vector<32x1xf32> to vector<32x128xf32>
    %228 = arith.addf %224, %227 : vector<32x128xf32>
    %229 = vector.extract_strided_slice %228 {offsets = [0, 0], sizes = [16, 128], strides = [1, 1]} : vector<32x128xf32> to vector<16x128xf32>
    %230 = math.tanh %229 : vector<16x128xf32>
    %231 = vector.extract_strided_slice %228 {offsets = [16, 0], sizes = [16, 128], strides = [1, 1]} : vector<32x128xf32> to vector<16x128xf32>
    %232 = arith.negf %231 : vector<16x128xf32>
    %233 = math.exp %232 : vector<16x128xf32>
    %cst_109 = arith.constant 1.000000e+00 : f32
    %234 = vector.broadcast %cst_109 : f32 to vector<16x128xf32>
    %235 = arith.addf %234, %233 : vector<16x128xf32>
    %236 = arith.divf %234, %235 : vector<16x128xf32>
    %237 = arith.mulf %230, %236 : vector<16x128xf32>
    %c4_110 = arith.constant 4 : index
    %c0_111 = arith.constant 0 : index
    %c0_112 = arith.constant 0 : index
    %238 = vector.load %arg7[%c4_110, %c0_111, %c0_112] : memref<6x32x16xbf16, #tpu.memory_space<vmem>>, vector<1x32x16xbf16>
    %239 = vector.shape_cast %238 : vector<1x32x16xbf16> to vector<32x16xbf16>
    %240 = arith.truncf %237 : vector<16x128xf32> to vector<16x128xbf16>
    %cst_113 = arith.constant dense<0.000000e+00> : vector<32x128xf32>
    %241 = tpu.matmul %239, %240, %cst_113 {dimension_numbers = #tpu.dot_dimension_numbers<[1], [0], [0], [1], [0, 0, 1, 1], [], []>} : vector<32x16xbf16>, vector<16x128xbf16>, vector<32x128xf32> -> vector<32x128xf32>
    %c4_114 = arith.constant 4 : index
    %c0_115 = arith.constant 0 : index
    %c0_116 = arith.constant 0 : index
    %242 = vector.load %arg8[%c4_114, %c0_115, %c0_116] : memref<6x32x1xf32, #tpu.memory_space<vmem>>, vector<1x32x1xf32>
    %243 = vector.shape_cast %242 : vector<1x32x1xf32> to vector<32x1xf32>
    %244 = vector.broadcast %243 : vector<32x1xf32> to vector<32x128xf32>
    %245 = arith.addf %241, %244 : vector<32x128xf32>
    %246 = vector.extract_strided_slice %245 {offsets = [0, 0], sizes = [16, 128], strides = [1, 1]} : vector<32x128xf32> to vector<16x128xf32>
    %247 = arith.addf %199, %246 : vector<16x128xf32>
    %248 = vector.extract_strided_slice %245 {offsets = [16, 0], sizes = [16, 128], strides = [1, 1]} : vector<32x128xf32> to vector<16x128xf32>
    %249 = arith.addf %248, %203 : vector<16x128xf32>
    %cst_117 = arith.constant 0.707106769 : f32
    %250 = vector.broadcast %cst_117 : f32 to vector<16x128xf32>
    %251 = arith.mulf %249, %250 : vector<16x128xf32>
    %c2_i32_118 = arith.constant 2 : i32
    %252 = tpu.dynamic_rotate %251 by %c2_i32_118 dim 1 : vector<16x128xf32>, i32 -> vector<16x128xf32>
    %c2_i32_119 = arith.constant 2 : i32
    %253 = vector.broadcast %c2_i32_119 : i32 to vector<16x128xi32>
    %254 = arith.cmpi sge, %10, %253 : vector<16x128xi32>
    %c130_i32_120 = arith.constant 130 : i32
    %255 = vector.broadcast %c130_i32_120 : i32 to vector<16x128xi32>
    %256 = arith.cmpi slt, %10, %255 : vector<16x128xi32>
    %257 = arith.andi %254, %256 : vector<16x128xi1>
    %cst_121 = arith.constant 0.000000e+00 : f32
    %258 = vector.broadcast %cst_121 : f32 to vector<16x128xf32>
    %259 = arith.select %257, %252, %258 : vector<16x128xi1>, vector<16x128xf32>
    %c126_i32_122 = arith.constant 126 : i32
    %260 = tpu.dynamic_rotate %251 by %c126_i32_122 dim 1 : vector<16x128xf32>, i32 -> vector<16x128xf32>
    %c-2_i32_123 = arith.constant -2 : i32
    %261 = vector.broadcast %c-2_i32_123 : i32 to vector<16x128xi32>
    %262 = arith.cmpi sge, %10, %261 : vector<16x128xi32>
    %c126_i32_124 = arith.constant 126 : i32
    %263 = vector.broadcast %c126_i32_124 : i32 to vector<16x128xi32>
    %264 = arith.cmpi slt, %10, %263 : vector<16x128xi32>
    %265 = arith.andi %262, %264 : vector<16x128xi1>
    %cst_125 = arith.constant 0.000000e+00 : f32
    %266 = vector.broadcast %cst_125 : f32 to vector<16x128xf32>
    %267 = arith.select %265, %260, %266 : vector<16x128xi1>, vector<16x128xf32>
    %268 = tpu.concatenate %259, %251, %267, %4 in 0 : vector<16x128xf32>, vector<16x128xf32>, vector<16x128xf32>, vector<8x128xf32> -> vector<56x128xf32>
    %269 = arith.truncf %268 : vector<56x128xf32> to vector<56x128xbf16>
    %c5 = arith.constant 5 : index
    %c0_126 = arith.constant 0 : index
    %c0_127 = arith.constant 0 : index
    %270 = vector.load %arg5[%c5, %c0_126, %c0_127] : memref<6x32x56xbf16, #tpu.memory_space<vmem>>, vector<1x32x56xbf16>
    %271 = vector.shape_cast %270 : vector<1x32x56xbf16> to vector<32x56xbf16>
    %cst_128 = arith.constant dense<0.000000e+00> : vector<32x128xf32>
    %272 = tpu.matmul %271, %269, %cst_128 {dimension_numbers = #tpu.dot_dimension_numbers<[1], [0], [0], [1], [0, 0, 1, 1], [], []>} : vector<32x56xbf16>, vector<56x128xbf16>, vector<32x128xf32> -> vector<32x128xf32>
    %c5_129 = arith.constant 5 : index
    %c0_130 = arith.constant 0 : index
    %c0_131 = arith.constant 0 : index
    %273 = vector.load %arg6[%c5_129, %c0_130, %c0_131] : memref<6x32x1xf32, #tpu.memory_space<vmem>>, vector<1x32x1xf32>
    %274 = vector.shape_cast %273 : vector<1x32x1xf32> to vector<32x1xf32>
    %275 = vector.broadcast %274 : vector<32x1xf32> to vector<32x128xf32>
    %276 = arith.addf %272, %275 : vector<32x128xf32>
    %277 = vector.extract_strided_slice %276 {offsets = [0, 0], sizes = [16, 128], strides = [1, 1]} : vector<32x128xf32> to vector<16x128xf32>
    %278 = math.tanh %277 : vector<16x128xf32>
    %279 = vector.extract_strided_slice %276 {offsets = [16, 0], sizes = [16, 128], strides = [1, 1]} : vector<32x128xf32> to vector<16x128xf32>
    %280 = arith.negf %279 : vector<16x128xf32>
    %281 = math.exp %280 : vector<16x128xf32>
    %cst_132 = arith.constant 1.000000e+00 : f32
    %282 = vector.broadcast %cst_132 : f32 to vector<16x128xf32>
    %283 = arith.addf %282, %281 : vector<16x128xf32>
    %284 = arith.divf %282, %283 : vector<16x128xf32>
    %285 = arith.mulf %278, %284 : vector<16x128xf32>
    %c5_133 = arith.constant 5 : index
    %c0_134 = arith.constant 0 : index
    %c0_135 = arith.constant 0 : index
    %286 = vector.load %arg7[%c5_133, %c0_134, %c0_135] : memref<6x32x16xbf16, #tpu.memory_space<vmem>>, vector<1x32x16xbf16>
    %287 = vector.shape_cast %286 : vector<1x32x16xbf16> to vector<32x16xbf16>
    %288 = arith.truncf %285 : vector<16x128xf32> to vector<16x128xbf16>
    %cst_136 = arith.constant dense<0.000000e+00> : vector<32x128xf32>
    %289 = tpu.matmul %287, %288, %cst_136 {dimension_numbers = #tpu.dot_dimension_numbers<[1], [0], [0], [1], [0, 0, 1, 1], [], []>} : vector<32x16xbf16>, vector<16x128xbf16>, vector<32x128xf32> -> vector<32x128xf32>
    %c5_137 = arith.constant 5 : index
    %c0_138 = arith.constant 0 : index
    %c0_139 = arith.constant 0 : index
    %290 = vector.load %arg8[%c5_137, %c0_138, %c0_139] : memref<6x32x1xf32, #tpu.memory_space<vmem>>, vector<1x32x1xf32>
    %291 = vector.shape_cast %290 : vector<1x32x1xf32> to vector<32x1xf32>
    %292 = vector.broadcast %291 : vector<32x1xf32> to vector<32x128xf32>
    %293 = arith.addf %289, %292 : vector<32x128xf32>
    %294 = vector.extract_strided_slice %293 {offsets = [0, 0], sizes = [16, 128], strides = [1, 1]} : vector<32x128xf32> to vector<16x128xf32>
    %295 = arith.addf %247, %294 : vector<16x128xf32>
    %cst_140 = arith.constant 0.408248305 : f32
    %296 = vector.broadcast %cst_140 : f32 to vector<16x128xf32>
    %297 = arith.mulf %295, %296 : vector<16x128xf32>
    %cst_141 = arith.constant 0.000000e+00 : f32
    %298 = vector.broadcast %cst_141 : f32 to vector<16x128xf32>
    %299 = arith.maximumf %297, %298 : vector<16x128xf32>
    %c0_142 = arith.constant 0 : index
    %c0_143 = arith.constant 0 : index
    %300 = vector.load %arg9[%c0_142, %c0_143] : memref<16x16xbf16, #tpu.memory_space<vmem>>, vector<16x16xbf16>
    %301 = arith.truncf %299 : vector<16x128xf32> to vector<16x128xbf16>
    %cst_144 = arith.constant dense<0.000000e+00> : vector<16x128xf32>
    %302 = tpu.matmul %300, %301, %cst_144 {dimension_numbers = #tpu.dot_dimension_numbers<[1], [0], [0], [1], [0, 0, 1, 1], [], []>} : vector<16x16xbf16>, vector<16x128xbf16>, vector<16x128xf32> -> vector<16x128xf32>
    %c0_145 = arith.constant 0 : index
    %c0_146 = arith.constant 0 : index
    %303 = vector.load %arg10[%c0_145, %c0_146] : memref<16x1xf32, #tpu.memory_space<vmem>>, vector<16x1xf32>
    %304 = vector.broadcast %303 : vector<16x1xf32> to vector<16x128xf32>
    %305 = arith.addf %302, %304 : vector<16x128xf32>
    %cst_147 = arith.constant 0.000000e+00 : f32
    %306 = vector.broadcast %cst_147 : f32 to vector<16x128xf32>
    %307 = arith.maximumf %305, %306 : vector<16x128xf32>
    %c0_148 = arith.constant 0 : index
    %c0_149 = arith.constant 0 : index
    %308 = vector.load %arg11[%c0_148, %c0_149] : memref<4x16xbf16, #tpu.memory_space<vmem>>, vector<4x16xbf16>
    %309 = arith.truncf %307 : vector<16x128xf32> to vector<16x128xbf16>
    %cst_150 = arith.constant dense<0.000000e+00> : vector<4x128xf32>
    %310 = tpu.matmul %308, %309, %cst_150 {dimension_numbers = #tpu.dot_dimension_numbers<[1], [0], [0], [1], [0, 0, 1, 1], [], []>} : vector<4x16xbf16>, vector<16x128xbf16>, vector<4x128xf32> -> vector<4x128xf32>
    %c0_151 = arith.constant 0 : index
    %c0_152 = arith.constant 0 : index
    %311 = vector.load %arg12[%c0_151, %c0_152] : memref<4x1xf32, #tpu.memory_space<vmem>>, vector<4x1xf32>
    %312 = vector.broadcast %311 : vector<4x1xf32> to vector<4x128xf32>
    %313 = arith.addf %310, %312 : vector<4x128xf32>
    %c0_153 = arith.constant 0 : index
    %c0_154 = arith.constant 0 : index
    %c0_155 = arith.constant 0 : index
    %314 = vector.load %arg13[%c0_153, %c0_154, %c0_155] : memref<1x4x128xf32, #tpu.memory_space<vmem>>, vector<1x4x128xf32>
    %315 = vector.shape_cast %314 : vector<1x4x128xf32> to vector<4x128xf32>
    %316 = vector.shape_cast %313 : vector<4x128xf32> to vector<1x4x128xf32>
    tpu.vector_store %arg13[%c0_153, %c0_154, %c0_155], %316 {strides = array<i32>} : memref<1x4x128xf32, #tpu.memory_space<vmem>>, vector<1x4x128xf32>,
    return
  }
  func.func @transform_0(%arg0: i32) -> (i32, i32, i32) {
    %c0_i32 = arith.constant 0 : i32
    %c0_i32_0 = arith.constant 0 : i32
    %c0_i32_1 = arith.constant 0 : i32
    return %arg0, %c0_i32, %c0_i32_0 : i32, i32, i32
  }
  func.func @transform_1(%arg0: i32) -> (i32, i32, i32) {
    %c0_i32 = arith.constant 0 : i32
    %c0_i32_0 = arith.constant 0 : i32
    %c0_i32_1 = arith.constant 0 : i32
    return %arg0, %c0_i32, %c0_i32_0 : i32, i32, i32
  }
  func.func @transform_2(%arg0: i32) -> (i32, i32) {
    %c0_i32 = arith.constant 0 : i32
    %c0_i32_0 = arith.constant 0 : i32
    %c0_i32_1 = arith.constant 0 : i32
    return %c0_i32, %c0_i32_0 : i32, i32
  }
  func.func @transform_3(%arg0: i32) -> (i32, i32) {
    %c0_i32 = arith.constant 0 : i32
    %c0_i32_0 = arith.constant 0 : i32
    %c0_i32_1 = arith.constant 0 : i32
    return %c0_i32, %c0_i32_0 : i32, i32
  }
  func.func @transform_4(%arg0: i32) -> (i32, i32, i32) {
    %c0_i32 = arith.constant 0 : i32
    %c0_i32_0 = arith.constant 0 : i32
    %c0_i32_1 = arith.constant 0 : i32
    %c0_i32_2 = arith.constant 0 : i32
    return %c0_i32, %c0_i32_0, %c0_i32_1 : i32, i32, i32
  }
  func.func @transform_5(%arg0: i32) -> (i32, i32, i32) {
    %c0_i32 = arith.constant 0 : i32
    %c0_i32_0 = arith.constant 0 : i32
    %c0_i32_1 = arith.constant 0 : i32
    %c0_i32_2 = arith.constant 0 : i32
    return %c0_i32, %c0_i32_0, %c0_i32_1 : i32, i32, i32
  }
  func.func @transform_6(%arg0: i32) -> (i32, i32, i32) {
    %c0_i32 = arith.constant 0 : i32
    %c0_i32_0 = arith.constant 0 : i32
    %c0_i32_1 = arith.constant 0 : i32
    %c0_i32_2 = arith.constant 0 : i32
    return %c0_i32, %c0_i32_0, %c0_i32_1 : i32, i32, i32
  }
  func.func @transform_7(%arg0: i32) -> (i32, i32, i32) {
    %c0_i32 = arith.constant 0 : i32
    %c0_i32_0 = arith.constant 0 : i32
    %c0_i32_1 = arith.constant 0 : i32
    %c0_i32_2 = arith.constant 0 : i32
    return %c0_i32, %c0_i32_0, %c0_i32_1 : i32, i32, i32
  }
  func.func @transform_8(%arg0: i32) -> (i32, i32) {
    %c0_i32 = arith.constant 0 : i32
    %c0_i32_0 = arith.constant 0 : i32
    %c0_i32_1 = arith.constant 0 : i32
    return %c0_i32, %c0_i32_0 : i32, i32
  }
  func.func @transform_9(%arg0: i32) -> (i32, i32) {
    %c0_i32 = arith.constant 0 : i32
    %c0_i32_0 = arith.constant 0 : i32
    %c0_i32_1 = arith.constant 0 : i32
    return %c0_i32, %c0_i32_0 : i32, i32
  }
  func.func @transform_10(%arg0: i32) -> (i32, i32) {
    %c0_i32 = arith.constant 0 : i32
    %c0_i32_0 = arith.constant 0 : i32
    %c0_i32_1 = arith.constant 0 : i32
    return %c0_i32, %c0_i32_0 : i32, i32
  }
  func.func @transform_11(%arg0: i32) -> (i32, i32) {
    %c0_i32 = arith.constant 0 : i32
    %c0_i32_0 = arith.constant 0 : i32
    %c0_i32_1 = arith.constant 0 : i32
    return %c0_i32, %c0_i32_0 : i32, i32
  }
  func.func @transform_12(%arg0: i32) -> (i32, i32, i32) {
    %c0_i32 = arith.constant 0 : i32
    %c0_i32_0 = arith.constant 0 : i32
    %c0_i32_1 = arith.constant 0 : i32
    return %arg0, %c0_i32, %c0_i32_0 : i32, i32, i32
  }
}

module attributes {stable_mosaic.version = 11 : i64} {
  func.func @_ct_matmul_kernel(%arg0: i32, %arg1: memref<1x64x128xf32, #tpu.memory_space<vmem>>, %arg2: memref<4x64xf32, #tpu.memory_space<vmem>>, %arg3: memref<4x1xf32, #tpu.memory_space<vmem>>, %arg4: memref<1x4x128xf32, #tpu.memory_space<vmem>>) attributes {dimension_semantics = [#tpu.dimension_semantics<parallel>], iteration_bounds = array<i64: 2>, scalar_prefetch = 0 : i64, scratch_operands = 0 : i64, tpu.core_type = #tpu.core_type<tc>, window_params = [{transform_indices = @transform_0, window_bounds = array<i64: 1, 64, 128>}, {pipeline_mode = #tpu.pipeline_mode<synchronous>, transform_indices = @transform_1, window_bounds = array<i64: 4, 64>}, {pipeline_mode = #tpu.pipeline_mode<synchronous>, transform_indices = @transform_2, window_bounds = array<i64: 4, 1>}, {transform_indices = @transform_3, window_bounds = array<i64: 1, 4, 128>}]} {
    %c0 = arith.constant 0 : index
    %c0_0 = arith.constant 0 : index
    %0 = vector.load %arg2[%c0, %c0_0] : memref<4x64xf32, #tpu.memory_space<vmem>>, vector<4x64xf32>
    %c0_1 = arith.constant 0 : index
    %c0_2 = arith.constant 0 : index
    %c0_3 = arith.constant 0 : index
    %1 = vector.load %arg1[%c0_1, %c0_2, %c0_3] : memref<1x64x128xf32, #tpu.memory_space<vmem>>, vector<1x64x128xf32>
    %2 = vector.shape_cast %1 : vector<1x64x128xf32> to vector<64x128xf32>
    %cst = arith.constant dense<0.000000e+00> : vector<4x128xf32>
    %3 = tpu.matmul %0, %2, %cst {dimension_numbers = #tpu.dot_dimension_numbers<[1], [0], [0], [1], [0, 0, 1, 1], [], []>} : vector<4x64xf32>, vector<64x128xf32>, vector<4x128xf32> -> vector<4x128xf32>
    %c0_4 = arith.constant 0 : index
    %c0_5 = arith.constant 0 : index
    %4 = vector.load %arg3[%c0_4, %c0_5] : memref<4x1xf32, #tpu.memory_space<vmem>>, vector<4x1xf32>
    %5 = vector.broadcast %4 : vector<4x1xf32> to vector<4x128xf32>
    %6 = arith.addf %3, %5 : vector<4x128xf32>
    %c0_6 = arith.constant 0 : index
    %c0_7 = arith.constant 0 : index
    %c0_8 = arith.constant 0 : index
    %7 = vector.load %arg4[%c0_6, %c0_7, %c0_8] : memref<1x4x128xf32, #tpu.memory_space<vmem>>, vector<1x4x128xf32>
    %8 = vector.shape_cast %7 : vector<1x4x128xf32> to vector<4x128xf32>
    %9 = vector.shape_cast %6 : vector<4x128xf32> to vector<1x4x128xf32>
    tpu.vector_store %arg4[%c0_6, %c0_7, %c0_8], %9 {strides = array<i32>} : memref<1x4x128xf32, #tpu.memory_space<vmem>>, vector<1x4x128xf32>,
    return
  }
  func.func @transform_0(%arg0: i32) -> (i32, i32, i32) {
    %c0_i32 = arith.constant 0 : i32
    %c0_i32_0 = arith.constant 0 : i32
    %c0_i32_1 = arith.constant 0 : i32
    return %arg0, %c0_i32, %c0_i32_0 : i32, i32, i32
  }
  func.func @transform_1(%arg0: i32) -> (i32, i32) {
    %c0_i32 = arith.constant 0 : i32
    %c0_i32_0 = arith.constant 0 : i32
    %c0_i32_1 = arith.constant 0 : i32
    return %c0_i32, %c0_i32_0 : i32, i32
  }
  func.func @transform_2(%arg0: i32) -> (i32, i32) {
    %c0_i32 = arith.constant 0 : i32
    %c0_i32_0 = arith.constant 0 : i32
    %c0_i32_1 = arith.constant 0 : i32
    return %c0_i32, %c0_i32_0 : i32, i32
  }
  func.func @transform_3(%arg0: i32) -> (i32, i32, i32) {
    %c0_i32 = arith.constant 0 : i32
    %c0_i32_0 = arith.constant 0 : i32
    %c0_i32_1 = arith.constant 0 : i32
    return %arg0, %c0_i32, %c0_i32_0 : i32, i32, i32
  }
}

module attributes {stable_mosaic.version = 11 : i64} {
  func.func @_ct_matmul_kernel(%arg0: i32, %arg1: memref<1x3x516xf32, #tpu.memory_space<vmem>>, %arg2: memref<128x3xf32, #tpu.memory_space<vmem>>, %arg3: memref<128x1xf32, #tpu.memory_space<vmem>>, %arg4: memref<1x128x516xf32, #tpu.memory_space<vmem>>) attributes {dimension_semantics = [#tpu.dimension_semantics<parallel>], iteration_bounds = array<i64: 2>, scalar_prefetch = 0 : i64, scratch_operands = 0 : i64, tpu.core_type = #tpu.core_type<tc>, window_params = [{transform_indices = @transform_0, window_bounds = array<i64: 1, 3, 516>}, {pipeline_mode = #tpu.pipeline_mode<synchronous>, transform_indices = @transform_1, window_bounds = array<i64: 128, 3>}, {pipeline_mode = #tpu.pipeline_mode<synchronous>, transform_indices = @transform_2, window_bounds = array<i64: 128, 1>}, {transform_indices = @transform_3, window_bounds = array<i64: 1, 128, 516>}]} {
    %c0 = arith.constant 0 : index
    %c0_0 = arith.constant 0 : index
    %0 = vector.load %arg2[%c0, %c0_0] : memref<128x3xf32, #tpu.memory_space<vmem>>, vector<128x3xf32>
    %c0_1 = arith.constant 0 : index
    %c0_2 = arith.constant 0 : index
    %c0_3 = arith.constant 0 : index
    %1 = vector.load %arg1[%c0_1, %c0_2, %c0_3] : memref<1x3x516xf32, #tpu.memory_space<vmem>>, vector<1x3x516xf32>
    %2 = vector.shape_cast %1 : vector<1x3x516xf32> to vector<3x516xf32>
    %cst = arith.constant dense<0.000000e+00> : vector<128x516xf32>
    %3 = tpu.matmul %0, %2, %cst {dimension_numbers = #tpu.dot_dimension_numbers<[1], [0], [0], [1], [0, 0, 1, 1], [], []>} : vector<128x3xf32>, vector<3x516xf32>, vector<128x516xf32> -> vector<128x516xf32>
    %c0_4 = arith.constant 0 : index
    %c0_5 = arith.constant 0 : index
    %4 = vector.load %arg3[%c0_4, %c0_5] : memref<128x1xf32, #tpu.memory_space<vmem>>, vector<128x1xf32>
    %5 = vector.broadcast %4 : vector<128x1xf32> to vector<128x516xf32>
    %6 = arith.addf %3, %5 : vector<128x516xf32>
    %c0_6 = arith.constant 0 : index
    %c0_7 = arith.constant 0 : index
    %c0_8 = arith.constant 0 : index
    %7 = vector.load %arg4[%c0_6, %c0_7, %c0_8] : memref<1x128x516xf32, #tpu.memory_space<vmem>>, vector<1x128x516xf32>
    %8 = vector.shape_cast %7 : vector<1x128x516xf32> to vector<128x516xf32>
    %9 = vector.shape_cast %6 : vector<128x516xf32> to vector<1x128x516xf32>
    tpu.vector_store %arg4[%c0_6, %c0_7, %c0_8], %9 {strides = array<i32>} : memref<1x128x516xf32, #tpu.memory_space<vmem>>, vector<1x128x516xf32>,
    return
  }
  func.func @transform_0(%arg0: i32) -> (i32, i32, i32) {
    %c0_i32 = arith.constant 0 : i32
    %c0_i32_0 = arith.constant 0 : i32
    %c0_i32_1 = arith.constant 0 : i32
    return %arg0, %c0_i32, %c0_i32_0 : i32, i32, i32
  }
  func.func @transform_1(%arg0: i32) -> (i32, i32) {
    %c0_i32 = arith.constant 0 : i32
    %c0_i32_0 = arith.constant 0 : i32
    %c0_i32_1 = arith.constant 0 : i32
    return %c0_i32, %c0_i32_0 : i32, i32
  }
  func.func @transform_2(%arg0: i32) -> (i32, i32) {
    %c0_i32 = arith.constant 0 : i32
    %c0_i32_0 = arith.constant 0 : i32
    %c0_i32_1 = arith.constant 0 : i32
    return %c0_i32, %c0_i32_0 : i32, i32
  }
  func.func @transform_3(%arg0: i32) -> (i32, i32, i32) {
    %c0_i32 = arith.constant 0 : i32
    %c0_i32_0 = arith.constant 0 : i32
    %c0_i32_1 = arith.constant 0 : i32
    return %arg0, %c0_i32, %c0_i32_0 : i32, i32, i32
  }
}

module attributes {stable_mosaic.version = 11 : i64} {
  func.func @_ct_matmul_kernel(%arg0: i32, %arg1: memref<1x384x520xf32, #tpu.memory_space<vmem>>, %arg2: memref<1x384xf32, #tpu.memory_space<vmem>>, %arg3: memref<1x1xf32, #tpu.memory_space<vmem>>, %arg4: memref<1x1x520xf32, #tpu.memory_space<vmem>>) attributes {dimension_semantics = [#tpu.dimension_semantics<parallel>], iteration_bounds = array<i64: 2>, scalar_prefetch = 0 : i64, scratch_operands = 0 : i64, tpu.core_type = #tpu.core_type<tc>, window_params = [{transform_indices = @transform_0, window_bounds = array<i64: 1, 384, 520>}, {pipeline_mode = #tpu.pipeline_mode<synchronous>, transform_indices = @transform_1, window_bounds = array<i64: 1, 384>}, {pipeline_mode = #tpu.pipeline_mode<synchronous>, transform_indices = @transform_2, window_bounds = array<i64: 1, 1>}, {transform_indices = @transform_3, window_bounds = array<i64: 1, 1, 520>}]} {
    %c0 = arith.constant 0 : index
    %c0_0 = arith.constant 0 : index
    %0 = vector.load %arg2[%c0, %c0_0] : memref<1x384xf32, #tpu.memory_space<vmem>>, vector<1x384xf32>
    %c0_1 = arith.constant 0 : index
    %c0_2 = arith.constant 0 : index
    %c0_3 = arith.constant 0 : index
    %1 = vector.load %arg1[%c0_1, %c0_2, %c0_3] : memref<1x384x520xf32, #tpu.memory_space<vmem>>, vector<1x384x520xf32>
    %2 = vector.shape_cast %1 : vector<1x384x520xf32> to vector<384x520xf32>
    %cst = arith.constant dense<0.000000e+00> : vector<1x520xf32>
    %3 = tpu.matmul %0, %2, %cst {dimension_numbers = #tpu.dot_dimension_numbers<[1], [0], [0], [1], [0, 0, 1, 1], [], []>} : vector<1x384xf32>, vector<384x520xf32>, vector<1x520xf32> -> vector<1x520xf32>
    %c0_4 = arith.constant 0 : index
    %c0_5 = arith.constant 0 : index
    %4 = vector.load %arg3[%c0_4, %c0_5] : memref<1x1xf32, #tpu.memory_space<vmem>>, vector<1x1xf32>
    %5 = vector.broadcast %4 : vector<1x1xf32> to vector<1x520xf32>
    %6 = arith.addf %3, %5 : vector<1x520xf32>
    %c0_6 = arith.constant 0 : index
    %c0_7 = arith.constant 0 : index
    %c0_8 = arith.constant 0 : index
    %7 = vector.load %arg4[%c0_6, %c0_7, %c0_8] : memref<1x1x520xf32, #tpu.memory_space<vmem>>, vector<1x1x520xf32>
    %8 = vector.shape_cast %7 : vector<1x1x520xf32> to vector<1x520xf32>
    %9 = vector.shape_cast %6 : vector<1x520xf32> to vector<1x1x520xf32>
    tpu.vector_store %arg4[%c0_6, %c0_7, %c0_8], %9 {strides = array<i32>} : memref<1x1x520xf32, #tpu.memory_space<vmem>>, vector<1x1x520xf32>,
    return
  }
  func.func @transform_0(%arg0: i32) -> (i32, i32, i32) {
    %c0_i32 = arith.constant 0 : i32
    %c0_i32_0 = arith.constant 0 : i32
    %c0_i32_1 = arith.constant 0 : i32
    return %arg0, %c0_i32, %c0_i32_0 : i32, i32, i32
  }
  func.func @transform_1(%arg0: i32) -> (i32, i32) {
    %c0_i32 = arith.constant 0 : i32
    %c0_i32_0 = arith.constant 0 : i32
    %c0_i32_1 = arith.constant 0 : i32
    return %c0_i32, %c0_i32_0 : i32, i32
  }
  func.func @transform_2(%arg0: i32) -> (i32, i32) {
    %c0_i32 = arith.constant 0 : i32
    %c0_i32_0 = arith.constant 0 : i32
    %c0_i32_1 = arith.constant 0 : i32
    return %c0_i32, %c0_i32_0 : i32, i32
  }
  func.func @transform_3(%arg0: i32) -> (i32, i32, i32) {
    %c0_i32 = arith.constant 0 : i32
    %c0_i32_0 = arith.constant 0 : i32
    %c0_i32_1 = arith.constant 0 : i32
    return %arg0, %c0_i32, %c0_i32_0 : i32, i32, i32
  }
}

</mosaic_0001>

<bundles_post_ra>
// kernel: _lambda_.11
= control target key start
LH: loop header
LB: loop body
LE: loop exit
PB: predicated region body
PF: predicated region fallthrough
CT: control target
= control target key end

     0   :  { %8 = vsyncpa [#allocation3], 0  ;;  %s488_s12 = smov 0   ;;  %s551_s0 = inlined_call_operand.vmem [shape: f32[2,63,128], index: 0, kind: input, shape index: {}]   ;;  %s552_s1 = inlined_call_operand.hbm [shape: f32[4,63], index: 1, kind: input, shape index: {}]   ;;  %s553_s2 = inlined_call_operand.vmem [shape: f32[4,1], index: 2, kind: input, shape index: {}]   ;;  %s554_s3 = inlined_call_operand.vmem [shape: f32[2,4,128], index: 3, kind: output, shape index: {}]  }
   0x1 LB: > { %s494_s13 = sadd.s32 4294967295, %s460_s12   ;;  %p343_p0 = scmp.ge.s32.totalorder %s460_s12, 1  ;;  %s460_s12 = sphi %s488_s12, %s14_s12  }
   0x2   : > { %p113_p1 = scmp.lt.s32.totalorder %s460_s12, 3  ;;  %p555_p3 = scmp.eq.s32.totalorder %s494_s13, 0 }
   0x3   : > { %s462_s15 = smov [#allocation2]   ;;  %s422_s20 = scalar_lea.hbm %s552_s1, 64 }
   0x4   : > { %p498_p2 = pnand %p343_p0, %p113_p1  ;;  %s126_s16 = sshll.u32 %s462_s15, 4  ;;  %s127_s16 = int_to_ptr.vmem [resolvable:$true] %s126_s16 }
   0x5   : > { %p423_p6 = scmp.ne.s32.totalorder %s552_s1, %s422_s20  ;;  %p429_p10 = scmp.lt.u32.totalorder %s422_s20, %s552_s1 }
   0x6   : > { %s557_s14 = scalar_select %p498_p2, 1, 0 }
   0x7   : > { %p401_p4 = pneg %p498_p2 }
   0x9   : > { %p507_p5 = pnand %p555_p3, %p401_p4 }
   0xb   : > { %p424_p7 = pneg %p507_p5 }
   0xd   : > { %p425_p8 = pnand %p424_p7, %p423_p6 }
   0xf   : > { %p426_p9 = pneg %p425_p8 }
  0x11   : > { %p431_p11 = pnand %p429_p10, %p426_p9 }
  0x13   : > { %434 = shalt.err (!%p431_p11)
}
  0x14   : > { %s435_s25 = scalar_lea.vmem %s127_s16, 64  ;;  %p443_p1 = scmp.lt.s32.totalorder %s127_s16, %s127_s16 }
  0x15   : > { %p436_p12 = scmp.ne.s32.totalorder %s127_s16, %s435_s25  ;;  %p444_p4 = scmp.lt.s32.totalorder %s435_s25, %s435_s25 }
  0x17   : > { %p438_p13 = pnand %p436_p12, %p424_p7  ;;  %p445_p3 = por %p444_p4, %p443_p1 }
  0x19   : > { %p439_p0 = pneg %p438_p13 }
  0x1b   : > { %p446_p2 = pnand %p445_p3, %p439_p0 }
  0x1d   : > { %449 = shalt.err (!%p446_p2)
}
  0x1e   : > { %404 = dma.hbm_to_vmem [thread:$0]  (!%p507_p5), %s552_s1, 64, %s127_s16, [#allocation3]  }
  0x1f   : > { %p559_p6 = scmp.ne.s32.totalorder %s557_s14, 0 }
  0x20   : > { %p560_p8 = scmp.eq.s32.totalorder (!%p559_p6), %s494_s13, 0 }
  0x21   : > { %150 = sbr.rel (%p559_p6) target bundleno = 279 (0x117), region = 32 }
  0x28   : > { %455 = dma.done.wait (%p560_p8), [#allocation3], 64   ;;  %p561_p7 = pmov %p560_p8 }
  0x29   : > { %p173_p9 = scmp.lt.s32.totalorder %s494_s13, 1  ;;  %v463_v0 = vmov 0.0|0.0   ;;  %vm464_vm0 = vmmov 0   ;;  %v465_v1 = vmov 0.0   ;;  %v466_v2 = vmov 0  }
  0x2a   : > { %457 = vsyncadd (%p561_p7), [#allocation3], 4294967232  ;;  %384 = vmatprep.subr.bf16.mxu0 %v463_v0  ;;  %381 = vmatprep.mubr.msk.f32.mxu0 %vm464_vm0, %v465_v1  ;;  %v191_v9 = vld [vmem:[%s553_s2] sm:$0xf]  ;;  %vm201_vm1 = vcmask 1046528   ;;  %vm467_vm2 = vmmov 1  }
  0x2b   : > { %s563_s13 = smov (!%p173_p9, %s494_s13), 1  ;;  %421 = vset.pattern.permute.xlu0 %v466_v2  ;;  %vm395_vm3 = vmpackc.low %vm201_vm1, %vm467_vm2  ;;  %v182_v16 = vld [vmem:[#allocation2] sm:$0xf]  ;;  %vm197_vm4 = vcmask 515072  }
  0x2c   : > { %s355_s28 = sshll.u32 %s563_s13, 6  ;;  %194 = vperm.xlu0 %421, %v191_v9   ;;  %s350_s7 = sshll.u32 %s563_s13, 2 }
  0x2d   : > { %s177_s4 = scalar_lea.vmem %s551_s0, %s355_s28  ;;  %s181_s10 = scalar_lea.vmem %s554_s3, %s350_s7 }
  0x2e   : > { %v183_v3 = vld [vmem:[%s177_s4] sm:$0xff]  ;;  %v184_v4 = vld [vmem:[%s177_s4 + $0x8] sm:$0xff]  ;;  %v185_v5 = vld [vmem:[%s177_s4 + $0x10] sm:$0xff] }
  0x2f   : > { %v385_v6 = vpack.c.bf16 %v184_v4, %v183_v3  ;;  %v186_v7 = vld [vmem:[%s177_s4 + $0x18] sm:$0xff]  ;;  %v187_v10 = vld [vmem:[%s177_s4 + $0x20] sm:$0xff]  ;;  %v188_v11 = vld [vmem:[%s177_s4 + $0x28] sm:$0xff] }
  0x30   : > { %v388_v8 = vpack.c.bf16 %v186_v7, %v185_v5  ;;  %v391_v12 = vpack.c.bf16 %v188_v11, %v187_v10  ;;  %v189_v13 = vld [vmem:[%s177_s4 + $0x30] sm:$0xff]  ;;  %v190_v14 = vld [vmem:[%s177_s4 + $0x38] sm:$0x7f] }
  0x31   : > { %386 = vmatpush3.bf16.msra.mxu0 %v385_v6  ;;  %v394_v15 = vpack.c.bf16 %v190_v14, %v189_v13 }
  0x32   : > { %387 = vmatprep.subr.bf16.mxu0 %v463_v0 }
  0x35   : > { %389 = vmatpush3.bf16.msra.mxu0 %v388_v8 }
  0x36   : > { %390 = vmatprep.subr.bf16.mxu0 %v463_v0 }
  0x39   : > { %392 = vmatpush3.bf16.msra.mxu0 %v391_v12 }
  0x3a   : > { %393 = vmatprep.subr.bf16.mxu0 %v463_v0 }
  0x3d   : > { %396 = vmatpush3.bf16.msk.msra.mxu0 %vm395_vm3, %v394_v15 }
  0x40   : > { %382 = vmatmul.mubr.msk.f32.vlgmr.msra.gmra.mrb[0].mxu0 %vm197_vm4, %v182_v16 }
  0xab   : > { %v195_v17 = vpop.permute.xlu0 %194 }
 0x113   : > { %v271_v18 = vpop.f32.mrb[0].mxu0 }
 0x114   : > { %v272_v19 = vadd.f32 %v271_v18, %v195_v17  ;;  %v383_v20 = vpop.f32.mrb[1].mxu0 }
 0x116   : > { %275 = vst [vmem:[%s181_s10] sm:$0xf] %v272_v19 }
 0x117 PF: > { %s14_s12 = sadd.s32 1, %s460_s12  }
 0x118   : > { %p11_p2 = scmp.ge.s32.totalorder %s14_s12, 4  }
 0x11a   :  { %13 = sbr.rel (!%p11_p2) target bundleno = 1 (0x1), region = 67 }
 0x121   :  { %295 = vsyncpa [#allocation3], 1 }
 0x122   :  { %297 = vsyncpa [#allocation3 + $0x1], 1 }

// kernel: _lambda_.8
= control target key start
LH: loop header
LB: loop body
LE: loop exit
PB: predicated region body
PF: predicated region fallthrough
CT: control target
= control target key end

     0   :  { %8 = vsyncpa [#allocation3], 0  ;;  %s462_s12 = smov 0   ;;  %s521_s0 = inlined_call_operand.vmem [shape: f32[2,40,8], index: 0, kind: input, shape index: {}]   ;;  %s522_s1 = inlined_call_operand.hbm [shape: f32[8,40], index: 1, kind: input, shape index: {}]   ;;  %s523_s2 = inlined_call_operand.vmem [shape: f32[8,1], index: 2, kind: input, shape index: {}]   ;;  %s524_s3 = inlined_call_operand.vmem [shape: f32[2,8,8], index: 3, kind: output, shape index: {}]  }
   0x1 LB: > { %s468_s13 = sadd.s32 4294967295, %s435_s12   ;;  %p337_p0 = scmp.ge.s32.totalorder %s435_s12, 1  ;;  %s435_s12 = sphi %s462_s12, %s14_s12  }
   0x2   : > { %p113_p1 = scmp.lt.s32.totalorder %s435_s12, 3  ;;  %p525_p3 = scmp.eq.s32.totalorder %s468_s13, 0 }
   0x3   : > { %s437_s15 = smov [#allocation2]   ;;  %s397_s20 = scalar_lea.hbm %s522_s1, 128 }
   0x4   : > { %p472_p2 = pnand %p337_p0, %p113_p1  ;;  %s126_s16 = sshll.u32 %s437_s15, 4  ;;  %s127_s16 = int_to_ptr.vmem [resolvable:$true] %s126_s16 }
   0x5   : > { %p398_p6 = scmp.ne.s32.totalorder %s522_s1, %s397_s20  ;;  %p404_p10 = scmp.lt.u32.totalorder %s397_s20, %s522_s1 }
   0x6   : > { %s527_s14 = scalar_select %p472_p2, 1, 0 }
   0x7   : > { %p377_p4 = pneg %p472_p2 }
   0x9   : > { %p481_p5 = pnand %p525_p3, %p377_p4 }
   0xb   : > { %p399_p7 = pneg %p481_p5 }
   0xd   : > { %p400_p8 = pnand %p399_p7, %p398_p6 }
   0xf   : > { %p401_p9 = pneg %p400_p8 }
  0x11   : > { %p406_p11 = pnand %p404_p10, %p401_p9 }
  0x13   : > { %409 = shalt.err (!%p406_p11)
}
  0x14   : > { %s410_s25 = scalar_lea.vmem %s127_s16, 128  ;;  %p418_p1 = scmp.lt.s32.totalorder %s127_s16, %s127_s16 }
  0x15   : > { %p411_p12 = scmp.ne.s32.totalorder %s127_s16, %s410_s25  ;;  %p419_p4 = scmp.lt.s32.totalorder %s410_s25, %s410_s25 }
  0x17   : > { %p413_p13 = pnand %p411_p12, %p399_p7  ;;  %p420_p3 = por %p419_p4, %p418_p1 }
  0x19   : > { %p414_p0 = pneg %p413_p13 }
  0x1b   : > { %p421_p2 = pnand %p420_p3, %p414_p0 }
  0x1d   : > { %424 = shalt.err (!%p421_p2)
}
  0x1e   : > { %380 = dma.hbm_to_vmem [thread:$0]  (!%p481_p5), %s522_s1, 128, %s127_s16, [#allocation3]  }
  0x1f   : > { %p529_p6 = scmp.ne.s32.totalorder %s527_s14, 0 }
  0x20   : > { %p530_p8 = scmp.eq.s32.totalorder (!%p529_p6), %s468_s13, 0 }
  0x21   : > { %150 = sbr.rel (%p529_p6) target bundleno = 274 (0x112), region = 32 }
  0x28   : > { %430 = dma.done.wait (%p530_p8), [#allocation3], 128   ;;  %p531_p7 = pmov %p530_p8 }
  0x29   : > { %p173_p9 = scmp.lt.s32.totalorder %s468_s13, 1  ;;  %v438_v0 = vmov 0.0|0.0   ;;  %vm439_vm0 = vmmov 0   ;;  %v440_v1 = vmov 0.0   ;;  %v441_v2 = vmov 0   ;;  %v188_v8 = vld [vmem:[%s523_s2] sm:$0xff] }
  0x2a   : > { %432 = vsyncadd (%p531_p7), [#allocation3], 4294967168  ;;  %366 = vmatprep.subr.bf16.mxu0 %v438_v0  ;;  %363 = vmatprep.mubr.msk.f32.mxu0 %vm439_vm0, %v440_v1  ;;  %v182_v11 = vld [vmem:[#allocation2] sm:$0xff]  ;;  %vm194_vm1 = vcmask 326656   ;;  %vm268_vm2 = vcmask 64512  }
  0x2b   : > { %s533_s13 = smov (!%p173_p9, %s468_s13), 1  ;;  %396 = vset.pattern.permute.xlu0 %v441_v2 }
  0x2c   : > { %s372_s28 = smul.u32 40, %s533_s13  ;;  %191 = vperm.xlu0 %396, %v188_v8   ;;  %s343_s7 = sshll.u32 %s533_s13, 3 }
  0x2d   : > { %s181_s10 = scalar_lea.vmem %s524_s3, %s343_s7 }
  0x2e   : > { %s177_s4 = scalar_lea.vmem %s521_s0, %s372_s28 }
  0x2f   : > { %v183_v3 = vld [vmem:[%s177_s4] sm:$0xff]  ;;  %v184_v4 = vld [vmem:[%s177_s4 + $0x8] sm:$0xff]  ;;  %v185_v5 = vld [vmem:[%s177_s4 + $0x10] sm:$0xff] }
  0x30   : > { %v367_v6 = vpack.c.bf16 %v184_v4, %v183_v3  ;;  %v186_v7 = vld [vmem:[%s177_s4 + $0x18] sm:$0xff]  ;;  %v187_v10 = vld [vmem:[%s177_s4 + $0x20] sm:$0xff] }
  0x31   : > { %v370_v9 = vpack.c.bf16 %v186_v7, %v185_v5 }
  0x32   : > { %368 = vmatpush3.bf16.msra.mxu0 %v367_v6 }
  0x33   : > { %369 = vmatprep.subr.bf16.mxu0 %v438_v0 }
  0x36   : > { %371 = vmatpush3.bf16.msra.mxu0 %v370_v9 }
  0x37   : > { %361 = vmatprep.subr.mxu0 %v440_v1 }
  0x3a   : > { %362 = vmatpush3.msra.mxu0 %v187_v10 }
  0x3b   : > { %364 = vmatmul.mubr.msk.f32.vlgmr.msra.gmra.mrb[0].mxu0 %vm194_vm1, %v182_v11 }
  0xab   : > { %v192_v12 = vpop.permute.xlu0 %191 }
 0x10e   : > { %v264_v13 = vpop.f32.mrb[0].mxu0 }
 0x10f   : > { %v265_v14 = vadd.f32 %v264_v13, %v192_v12  ;;  %v365_v15 = vpop.f32.mrb[1].mxu0 }
 0x111   : > { %269 = vst.msk [vmem:[%s181_s10] sm:$0xff] %vm268_vm2, %v265_v14 }
 0x112 PF: > { %s14_s12 = sadd.s32 1, %s435_s12  }
 0x113   : > { %p11_p2 = scmp.ge.s32.totalorder %s14_s12, 4  }
 0x115   :  { %13 = sbr.rel (!%p11_p2) target bundleno = 1 (0x1), region = 67 }
 0x11c   :  { %289 = vsyncpa [#allocation3], 1 }
 0x11d   :  { %291 = vsyncpa [#allocation3 + $0x1], 1 }

// kernel: _lambda_.9
= control target key start
LH: loop header
LB: loop body
LE: loop exit
PB: predicated region body
PF: predicated region fallthrough
CT: control target
= control target key end

     0   :  { %8 = vsyncpa [#allocation3], 0  ;;  %s520_s12 = smov 0   ;;  %s596_s0 = inlined_call_operand.vmem [shape: f32[2,24,8], index: 0, kind: input, shape index: {}]   ;;  %s597_s1 = inlined_call_operand.hbm [shape: f32[32,24], index: 1, kind: input, shape index: {}]   ;;  %s598_s2 = inlined_call_operand.vmem [shape: f32[32,1], index: 2, kind: input, shape index: {}]   ;;  %s599_s3 = inlined_call_operand.vmem [shape: f32[2,32,8], index: 3, kind: output, shape index: {}]  }
   0x1 LB: > { %s526_s13 = sadd.s32 4294967295, %s494_s12   ;;  %p389_p0 = scmp.ge.s32.totalorder %s494_s12, 1  ;;  %s494_s12 = sphi %s520_s12, %s14_s12  }
   0x2   : > { %p113_p1 = scmp.lt.s32.totalorder %s494_s12, 3  ;;  %s496_s14 = smov [#allocation2]  }
   0x3   : > { %s125_s15 = sshll.u32 %s496_s14, 4  ;;  %p600_p3 = scmp.eq.s32.totalorder %s526_s13, 0  ;;  %s126_s15 = int_to_ptr.vmem [resolvable:$true] %s125_s15 }
   0x4   : > { %p530_p2 = pnand %p389_p0, %p113_p1  ;;  %s456_s20 = scalar_lea.hbm %s597_s1, 512 }
   0x5   : > { %p457_p6 = scmp.ne.s32.totalorder %s597_s1, %s456_s20  ;;  %p463_p10 = scmp.lt.u32.totalorder %s456_s20, %s597_s1 }
   0x6   : > { %s602_s16 = scalar_select %p530_p2, 1, 0 }
   0x7   : > { %p436_p4 = pneg %p530_p2 }
   0x9   : > { %p539_p5 = pnand %p600_p3, %p436_p4 }
   0xb   : > { %p458_p7 = pneg %p539_p5 }
   0xd   : > { %p459_p8 = pnand %p458_p7, %p457_p6 }
   0xf   : > { %p460_p9 = pneg %p459_p8 }
  0x11   : > { %p465_p11 = pnand %p463_p10, %p460_p9 }
  0x13   : > { %468 = shalt.err (!%p465_p11)
}
  0x14   : > { %s469_s25 = scalar_lea.vmem %s126_s15, 512  ;;  %p477_p1 = scmp.lt.s32.totalorder %s126_s15, %s126_s15 }
  0x15   : > { %p470_p12 = scmp.ne.s32.totalorder %s126_s15, %s469_s25  ;;  %p478_p4 = scmp.lt.s32.totalorder %s469_s25, %s469_s25 }
  0x17   : > { %p472_p13 = pnand %p470_p12, %p458_p7  ;;  %p479_p3 = por %p478_p4, %p477_p1 }
  0x19   : > { %p473_p0 = pneg %p472_p13 }
  0x1b   : > { %p480_p2 = pnand %p479_p3, %p473_p0 }
  0x1d   : > { %483 = shalt.err (!%p480_p2)
}
  0x1e   : > { %s497_s26 = smov 128   ;;  %s498_s27 = smov 8  }
  0x1f   : > { %439 = dma.hbm_to_vmem [thread:$0]  (!%p539_p5), %s597_s1, 512, %s126_s15, [#allocation3], %s497_s26, %s497_s26, %s498_s27  }
  0x20   : > { %p604_p6 = scmp.ne.s32.totalorder %s602_s16, 0 }
  0x21   : > { %p605_p8 = scmp.eq.s32.totalorder (!%p604_p6), %s526_s13, 0 }
  0x22   : > { %152 = sbr.rel (%p604_p6) target bundleno = 273 (0x111), region = 32 }
  0x29   : > { %489 = dma.done.wait (%p605_p8), [#allocation3], 512   ;;  %p606_p7 = pmov %p605_p8 }
  0x2a   : > { %p176_p2 = scmp.lt.s32.totalorder %s526_s13, 1  ;;  %v499_v0 = vmov 0   ;;  %vm217_vm0 = vcmask 195584   ;;  %v186_v4 = vld [vmem:[#allocation2] sm:$0xff]  ;;  %v188_v5 = vld [vmem:[#allocation2 + $0x10] sm:$0xff]  ;;  %v187_v9 = vld [vmem:[#allocation2 + $0x8] sm:$0xff] }
  0x2b   : > { %491 = vsyncadd (%p606_p7), [#allocation3], 4294966784  ;;  %455 = vset.pattern.permute.xlu1 %v499_v0  ;;  %454 = vset.pattern.permute.xlu0 %v499_v0  ;;  %v195_v7 = vld [vmem:[%s598_s2 + $0x10] sm:$0xff]  ;;  %v193_v8 = vld [vmem:[%s598_s2] sm:$0xff]  ;;  %vm315_vm1 = vcmask 64512  }
  0x2c   : > { %s608_s13 = smov (!%p176_p2, %s526_s13), 1  ;;  %417 = vmatprep.mubr.msk.f32.mxu0 %vm217_vm0, %v186_v4  ;;  %420 = vmatprep.mubr.msk.f32.mxu1 %vm217_vm0, %v188_v5  ;;  %v189_v10 = vld [vmem:[#allocation2 + $0x18] sm:$0xff]  ;;  %v194_v12 = vld [vmem:[%s598_s2 + $0x8] sm:$0xff] }
  0x2d   : > { %s431_s30 = smul.u32 24, %s608_s13  ;;  %209 = vperm.xlu1 %455, %v195_v7   ;;  %199 = vperm.xlu0 %454, %v193_v8   ;;  %v196_v11 = vld [vmem:[%s598_s2 + $0x18] sm:$0xff]  ;;  %s403_s17 = sshll.u32 %s608_s13, 5 }
  0x2e   : > { %s185_s20 = scalar_lea.vmem %s599_s3, %s403_s17 }
  0x2f   : > { %s180_s6 = scalar_lea.vmem %s596_s0, %s431_s30 }
  0x30   : > { %v190_v1 = vld [vmem:[%s180_s6] sm:$0xff]  ;;  %v191_v2 = vld [vmem:[%s180_s6 + $0x8] sm:$0xff]  ;;  %v192_v6 = vld [vmem:[%s180_s6 + $0x10] sm:$0xff] }
  0x31   : > { %v423_v3 = vpack.c.bf16 %v191_v2, %v190_v1  ;;  %214 = vperm.xlu1 %455, %v196_v11   ;;  %204 = vperm.xlu0 %454, %v194_v12  }
  0x33   : > { %424 = vmatprep.subr.bf16.mxu0 %v423_v3  ;;  %427 = vmatprep.subr.bf16.mxu1 %v423_v3 }
  0x34   : > { %426 = vmatpush3.bf16.msra.mxu0 %v423_v3  ;;  %429 = vmatpush3.bf16.msra.mxu1 %v423_v3 }
  0x35   : > { %415 = vmatprep.subr.mxu0 %v192_v6  ;;  %428 = vmatprep.subr.mxu1 %v192_v6 }
  0x38   : > { %416 = vmatpush3.msra.mxu0 %v192_v6  ;;  %430 = vmatpush3.msra.mxu1 %v192_v6 }
  0x39   : > { %418 = vmatmul.mubr.msk.f32.vlgmr.msra.gmra.mrb[0].mxu0 %vm217_vm0, %v187_v9  ;;  %421 = vmatmul.mubr.msk.f32.vlgmr.msra.gmra.mrb[0].mxu1 %vm217_vm0, %v189_v10 }
  0xac   : > { %v210_v13 = vpop.permute.xlu1 %209  ;;  %v200_v14 = vpop.permute.xlu0 %199 }
  0xb0   : > { %v215_v15 = vpop.permute.xlu1 %214  ;;  %v205_v16 = vpop.permute.xlu0 %204 }
 0x10c   : > { %v419_v17 = vpop.f32.mrb[0].mxu0  ;;  %v422_v18 = vpop.f32.mrb[0].mxu1 }
 0x10d   : > { %v302_v19 = vadd.f32 %v419_v17, %v205_v16  ;;  %v312_v20 = vadd.f32 %v422_v18, %v215_v15  ;;  %v296_v21 = vpop.f32.mrb[1].mxu0  ;;  %v306_v22 = vpop.f32.mrb[1].mxu1 }
 0x10e   : > { %v297_v23 = vadd.f32 %v296_v21, %v200_v14  ;;  %v307_v24 = vadd.f32 %v306_v22, %v210_v13 }
 0x10f   : > { %317 = vst.msk [vmem:[%s185_s20 + $0x8] sm:$0xff] %vm315_vm1, %v302_v19  ;;  %319 = vst.msk [vmem:[%s185_s20 + $0x18] sm:$0xff] %vm315_vm1, %v312_v20 }
 0x110   : > { %316 = vst.msk [vmem:[%s185_s20] sm:$0xff] %vm315_vm1, %v297_v23  ;;  %318 = vst.msk [vmem:[%s185_s20 + $0x10] sm:$0xff] %vm315_vm1, %v307_v24 }
 0x111 PF: > { %s14_s12 = sadd.s32 1, %s494_s12  }
 0x112   : > { %p11_p3 = scmp.ge.s32.totalorder %s14_s12, 4  }
 0x114   :  { %13 = sbr.rel (!%p11_p3) target bundleno = 1 (0x1), region = 67 }
 0x11b   :  { %341 = vsyncpa [#allocation3], 1 }
 0x11c   :  { %343 = vsyncpa [#allocation3 + $0x1], 1 }

// kernel: _lambda_.10
= control target key start
LH: loop header
LB: loop body
LE: loop exit
PB: predicated region body
PF: predicated region fallthrough
CT: control target
= control target key end

     0   :  { %8 = vsyncpa [#allocation3], 0  ;;  %s520_s12 = smov 0   ;;  %s596_s0 = inlined_call_operand.vmem [shape: f32[2,24,32], index: 0, kind: input, shape index: {}]   ;;  %s597_s1 = inlined_call_operand.hbm [shape: f32[32,24], index: 1, kind: input, shape index: {}]   ;;  %s598_s2 = inlined_call_operand.vmem [shape: f32[32,1], index: 2, kind: input, shape index: {}]   ;;  %s599_s3 = inlined_call_operand.vmem [shape: f32[2,32,32], index: 3, kind: output, shape index: {}]  }
   0x1 LB: > { %s526_s13 = sadd.s32 4294967295, %s494_s12   ;;  %p389_p0 = scmp.ge.s32.totalorder %s494_s12, 1  ;;  %s494_s12 = sphi %s520_s12, %s14_s12  }
   0x2   : > { %p113_p1 = scmp.lt.s32.totalorder %s494_s12, 3  ;;  %s496_s14 = smov [#allocation2]  }
   0x3   : > { %s125_s15 = sshll.u32 %s496_s14, 4  ;;  %p600_p3 = scmp.eq.s32.totalorder %s526_s13, 0  ;;  %s126_s15 = int_to_ptr.vmem [resolvable:$true] %s125_s15 }
   0x4   : > { %p530_p2 = pnand %p389_p0, %p113_p1  ;;  %s456_s20 = scalar_lea.hbm %s597_s1, 512 }
   0x5   : > { %p457_p6 = scmp.ne.s32.totalorder %s597_s1, %s456_s20  ;;  %p463_p10 = scmp.lt.u32.totalorder %s456_s20, %s597_s1 }
   0x6   : > { %s602_s16 = scalar_select %p530_p2, 1, 0 }
   0x7   : > { %p436_p4 = pneg %p530_p2 }
   0x9   : > { %p539_p5 = pnand %p600_p3, %p436_p4 }
   0xb   : > { %p458_p7 = pneg %p539_p5 }
   0xd   : > { %p459_p8 = pnand %p458_p7, %p457_p6 }
   0xf   : > { %p460_p9 = pneg %p459_p8 }
  0x11   : > { %p465_p11 = pnand %p463_p10, %p460_p9 }
  0x13   : > { %468 = shalt.err (!%p465_p11)
}
  0x14   : > { %s469_s25 = scalar_lea.vmem %s126_s15, 512  ;;  %p477_p1 = scmp.lt.s32.totalorder %s126_s15, %s126_s15 }
  0x15   : > { %p470_p12 = scmp.ne.s32.totalorder %s126_s15, %s469_s25  ;;  %p478_p4 = scmp.lt.s32.totalorder %s469_s25, %s469_s25 }
  0x17   : > { %p472_p13 = pnand %p470_p12, %p458_p7  ;;  %p479_p3 = por %p478_p4, %p477_p1 }
  0x19   : > { %p473_p0 = pneg %p472_p13 }
  0x1b   : > { %p480_p2 = pnand %p479_p3, %p473_p0 }
  0x1d   : > { %483 = shalt.err (!%p480_p2)
}
  0x1e   : > { %s497_s26 = smov 128   ;;  %s498_s27 = smov 8  }
  0x1f   : > { %439 = dma.hbm_to_vmem [thread:$0]  (!%p539_p5), %s597_s1, 512, %s126_s15, [#allocation3], %s497_s26, %s497_s26, %s498_s27  }
  0x20   : > { %p604_p6 = scmp.ne.s32.totalorder %s602_s16, 0 }
  0x21   : > { %p605_p8 = scmp.eq.s32.totalorder (!%p604_p6), %s526_s13, 0 }
  0x22   : > { %152 = sbr.rel (%p604_p6) target bundleno = 273 (0x111), region = 32 }
  0x29   : > { %489 = dma.done.wait (%p605_p8), [#allocation3], 512   ;;  %p606_p7 = pmov %p605_p8 }
  0x2a   : > { %p176_p2 = scmp.lt.s32.totalorder %s526_s13, 1  ;;  %v499_v0 = vmov 0   ;;  %vm217_vm0 = vcmask 195584   ;;  %v186_v4 = vld [vmem:[#allocation2] sm:$0xff]  ;;  %v188_v5 = vld [vmem:[#allocation2 + $0x10] sm:$0xff]  ;;  %v187_v9 = vld [vmem:[#allocation2 + $0x8] sm:$0xff] }
  0x2b   : > { %491 = vsyncadd (%p606_p7), [#allocation3], 4294966784  ;;  %455 = vset.pattern.permute.xlu1 %v499_v0  ;;  %454 = vset.pattern.permute.xlu0 %v499_v0  ;;  %v195_v7 = vld [vmem:[%s598_s2 + $0x10] sm:$0xff]  ;;  %v193_v8 = vld [vmem:[%s598_s2] sm:$0xff]  ;;  %vm315_vm1 = vcmask 261120  }
  0x2c   : > { %s608_s13 = smov (!%p176_p2, %s526_s13), 1  ;;  %417 = vmatprep.mubr.msk.f32.mxu0 %vm217_vm0, %v186_v4  ;;  %420 = vmatprep.mubr.msk.f32.mxu1 %vm217_vm0, %v188_v5  ;;  %v189_v10 = vld [vmem:[#allocation2 + $0x18] sm:$0xff]  ;;  %v194_v12 = vld [vmem:[%s598_s2 + $0x8] sm:$0xff] }
  0x2d   : > { %s431_s30 = smul.u32 24, %s608_s13  ;;  %209 = vperm.xlu1 %455, %v195_v7   ;;  %199 = vperm.xlu0 %454, %v193_v8   ;;  %v196_v11 = vld [vmem:[%s598_s2 + $0x18] sm:$0xff]  ;;  %s403_s17 = sshll.u32 %s608_s13, 5 }
  0x2e   : > { %s185_s20 = scalar_lea.vmem %s599_s3, %s403_s17 }
  0x2f   : > { %s180_s6 = scalar_lea.vmem %s596_s0, %s431_s30 }
  0x30   : > { %v190_v1 = vld [vmem:[%s180_s6] sm:$0xff]  ;;  %v191_v2 = vld [vmem:[%s180_s6 + $0x8] sm:$0xff]  ;;  %v192_v6 = vld [vmem:[%s180_s6 + $0x10] sm:$0xff] }
  0x31   : > { %v423_v3 = vpack.c.bf16 %v191_v2, %v190_v1  ;;  %214 = vperm.xlu1 %455, %v196_v11   ;;  %204 = vperm.xlu0 %454, %v194_v12  }
  0x33   : > { %424 = vmatprep.subr.bf16.mxu0 %v423_v3  ;;  %427 = vmatprep.subr.bf16.mxu1 %v423_v3 }
  0x34   : > { %426 = vmatpush3.bf16.msra.mxu0 %v423_v3  ;;  %429 = vmatpush3.bf16.msra.mxu1 %v423_v3 }
  0x35   : > { %415 = vmatprep.subr.mxu0 %v192_v6  ;;  %428 = vmatprep.subr.mxu1 %v192_v6 }
  0x38   : > { %416 = vmatpush3.msra.mxu0 %v192_v6  ;;  %430 = vmatpush3.msra.mxu1 %v192_v6 }
  0x39   : > { %418 = vmatmul.mubr.msk.f32.vlgmr.msra.gmra.mrb[0].mxu0 %vm217_vm0, %v187_v9  ;;  %421 = vmatmul.mubr.msk.f32.vlgmr.msra.gmra.mrb[0].mxu1 %vm217_vm0, %v189_v10 }
  0xac   : > { %v210_v13 = vpop.permute.xlu1 %209  ;;  %v200_v14 = vpop.permute.xlu0 %199 }
  0xb0   : > { %v215_v15 = vpop.permute.xlu1 %214  ;;  %v205_v16 = vpop.permute.xlu0 %204 }
 0x10c   : > { %v419_v17 = vpop.f32.mrb[0].mxu0  ;;  %v422_v18 = vpop.f32.mrb[0].mxu1 }
 0x10d   : > { %v302_v19 = vadd.f32 %v419_v17, %v205_v16  ;;  %v312_v20 = vadd.f32 %v422_v18, %v215_v15  ;;  %v296_v21 = vpop.f32.mrb[1].mxu0  ;;  %v306_v22 = vpop.f32.mrb[1].mxu1 }
 0x10e   : > { %v297_v23 = vadd.f32 %v296_v21, %v200_v14  ;;  %v307_v24 = vadd.f32 %v306_v22, %v210_v13 }
 0x10f   : > { %317 = vst.msk [vmem:[%s185_s20 + $0x8] sm:$0xff] %vm315_vm1, %v302_v19  ;;  %319 = vst.msk [vmem:[%s185_s20 + $0x18] sm:$0xff] %vm315_vm1, %v312_v20 }
 0x110   : > { %316 = vst.msk [vmem:[%s185_s20] sm:$0xff] %vm315_vm1, %v297_v23  ;;  %318 = vst.msk [vmem:[%s185_s20 + $0x10] sm:$0xff] %vm315_vm1, %v307_v24 }
 0x111 PF: > { %s14_s12 = sadd.s32 1, %s494_s12  }
 0x112   : > { %p11_p3 = scmp.ge.s32.totalorder %s14_s12, 4  }
 0x114   :  { %13 = sbr.rel (!%p11_p3) target bundleno = 1 (0x1), region = 67 }
 0x11b   :  { %341 = vsyncpa [#allocation3], 1 }
 0x11c   :  { %343 = vsyncpa [#allocation3 + $0x1], 1 }

// kernel: _lambda_.13
= control target key start
LH: loop header
LB: loop body
LE: loop exit
PB: predicated region body
PF: predicated region fallthrough
CT: control target
= control target key end

     0   :  { %s409_s12 = smov 0   ;;  %s436_s0 = inlined_call_operand.vmem [shape: f32[2,64,128], index: 0, kind: input, shape index: {}]   ;;  %s437_s1 = inlined_call_operand.vmem [shape: f32[4,64], index: 1, kind: input, shape index: {}]   ;;  %s438_s2 = inlined_call_operand.vmem [shape: f32[4,1], index: 2, kind: input, shape index: {}]   ;;  %s439_s3 = inlined_call_operand.vmem [shape: f32[2,4,128], index: 3, kind: output, shape index: {}]  }
   0x1 LB: > { %s312_s13 = sadd.s32 4294967295, %s383_s12   ;;  %p316_p0 = scmp.ge.s32.totalorder %s383_s12, 1  ;;  %s383_s12 = sphi %s409_s12, %s13_s12  }
   0x2   : > { %p137_p1 = scmp.lt.s32.totalorder %s383_s12, 3 }
   0x4   : > { %p138_p2 = pnand %p316_p0, %p137_p1 }
   0x5   : > { %p160_p3 = scmp.lt.s32.totalorder (!%p138_p2), %s312_s13, 1  ;;  %v385_v0 = vmov (!%p138_p2), 0.0|0.0   ;;  %vm386_vm0 = vmmov (!%p138_p2), 0   ;;  %v387_v1 = vmov (!%p138_p2), 0.0   ;;  %v178_v2 = vld [vmem:[%s438_s2] sm:$0xf] (!%p138_p2) }
   0x6   : > { %141 = sbr.rel (%p138_p2) target bundleno = 249 (0xf9), region = 32  ;;  %352 = vmatprep.subr.bf16.mxu0 (!%p138_p2), %v385_v0  ;;  %349 = vmatprep.mubr.msk.f32.mxu0 (!%p138_p2), %vm386_vm0, %v387_v1  ;;  %v388_v3 = vmov (!%p138_p2), 0   ;;  %v169_v16 = vld [vmem:[%s437_s1] sm:$0xf] (!%p138_p2)  ;;  %vm184_vm1 = vcmask (!%p138_p2), 523264  }
   0x7   : > { %376 = vset.pattern.permute.xlu0 (!%p138_p2), %v388_v3 }
   0x8   : > { %181 = vperm.xlu0 (!%p138_p2), %376, %v178_v2  }
   0xd   : > { %s441_s13 = smov (!%p160_p3, %s312_s13), 1 }
   0xe   : > { %s323_s16 = sshll.u32 %s441_s13, 6  ;;  %s319_s22 = sshll.u32 %s441_s13, 2 }
   0xf   : > { %s164_s19 = scalar_lea.vmem %s436_s0, %s323_s16  ;;  %s168_s25 = scalar_lea.vmem %s439_s3, %s319_s22 }
  0x10   : > { %v170_v4 = vld [vmem:[%s164_s19] sm:$0xff]  ;;  %v171_v5 = vld [vmem:[%s164_s19 + $0x8] sm:$0xff]  ;;  %v172_v6 = vld [vmem:[%s164_s19 + $0x10] sm:$0xff] }
  0x11   : > { %v353_v7 = vpack.c.bf16 %v171_v5, %v170_v4  ;;  %v173_v8 = vld [vmem:[%s164_s19 + $0x18] sm:$0xff]  ;;  %v174_v10 = vld [vmem:[%s164_s19 + $0x20] sm:$0xff]  ;;  %v175_v11 = vld [vmem:[%s164_s19 + $0x28] sm:$0xff] }
  0x12   : > { %v356_v9 = vpack.c.bf16 %v173_v8, %v172_v6  ;;  %v359_v12 = vpack.c.bf16 %v175_v11, %v174_v10  ;;  %v176_v13 = vld [vmem:[%s164_s19 + $0x30] sm:$0xff]  ;;  %v177_v14 = vld [vmem:[%s164_s19 + $0x38] sm:$0xff] }
  0x13   : > { %354 = vmatpush3.bf16.msra.mxu0 %v353_v7  ;;  %v362_v15 = vpack.c.bf16 %v177_v14, %v176_v13 }
  0x14   : > { %355 = vmatprep.subr.bf16.mxu0 %v385_v0 }
  0x17   : > { %357 = vmatpush3.bf16.msra.mxu0 %v356_v9 }
  0x18   : > { %358 = vmatprep.subr.bf16.mxu0 %v385_v0 }
  0x1b   : > { %360 = vmatpush3.bf16.msra.mxu0 %v359_v12 }
  0x1c   : > { %361 = vmatprep.subr.bf16.mxu0 %v385_v0 }
  0x1f   : > { %363 = vmatpush3.bf16.msra.mxu0 %v362_v15 }
  0x22   : > { %350 = vmatmul.mubr.msk.f32.vlgmr.msra.gmra.mrb[0].mxu0 %vm184_vm1, %v169_v16 }
  0x87   : > { %v182_v17 = vpop.permute.xlu0 %181 }
  0xf5   : > { %v254_v18 = vpop.f32.mrb[0].mxu0 }
  0xf6   : > { %v255_v19 = vadd.f32 %v254_v18, %v182_v17  ;;  %v351_v20 = vpop.f32.mrb[1].mxu0 }
  0xf8   : > { %258 = vst [vmem:[%s168_s25] sm:$0xf] %v255_v19 }
  0xf9 PF: > { %s13_s12 = sadd.s32 1, %s383_s12  }
  0xfa   : > { %p10_p4 = scmp.ge.s32.totalorder %s13_s12, 4  }
  0xfc   :  { %12 = sbr.rel (!%p10_p4) target bundleno = 1 (0x1), region = 62 }

// kernel: _lambda_.12
= control target key start
LH: loop header
LB: loop body
LE: loop exit
PB: predicated region body
PF: predicated region fallthrough
CT: control target
= control target key end

     0   :  { %s3568_s0 = inlined_call_operand.vmem [shape: f32[2,4,128], index: 0, kind: input, shape index: {}]   ;;  %s3569_s1 = inlined_call_operand.vmem [shape: f32[2,8,128], index: 1, kind: input, shape index: {}]   ;;  %s3570_s2 = inlined_call_operand.hbm [shape: bf16[16,4], index: 2, kind: input, shape index: {}]   ;;  %s3571_s3 = inlined_call_operand.vmem [shape: f32[16,1], index: 3, kind: input, shape index: {}, may-alias: {3,9}]   ;;  %s3572_s4 = inlined_call_operand.hbm [shape: bf16[6,32,56], index: 4, kind: input, shape index: {}]   ;;  %s3573_s5 = inlined_call_operand.vmem [shape: f32[6,32,1], index: 5, kind: input, shape index: {}, may-alias: {5,7}]   ;;  %s3574_s6 = inlined_call_operand.hbm [shape: bf16[6,32,16], index: 6, kind: input, shape index: {}]   ;;  %s3575_s7 = inlined_call_operand.vmem [shape: f32[6,32,1], index: 7, kind: input, shape index: {}, may-alias: {5,7}]   ;;  %s3576_s8 = inlined_call_operand.hbm [shape: bf16[16,16], index: 8, kind: input, shape index: {}]   ;;  %s3577_s9 = inlined_call_operand.vmem [shape: f32[16,1], index: 9, kind: input, shape index: {}, may-alias: {3,9}]   ;;  %s3578_s10 = inlined_call_operand.hbm [shape: bf16[4,16], index: 10, kind: input, shape index: {}]   ;;  %s3579_s11 = inlined_call_operand.vmem [shape: f32[4,1], index: 11, kind: input, shape index: {}]   ;;  %s3580_s12 = inlined_call_operand.vmem [shape: f32[2,4,128], index: 12, kind: output, shape index: {}]  }
   0x1   :  { %3584 = sst [smem:[#allocation14_spill]] %s3580_s12 }
   0x2   :  { %17 = vsyncpa [#allocation3], 0 }
   0x3   :  { %18 = vsyncpa [#allocation5], 0 }
   0x4   :  { %19 = vsyncpa [#allocation8], 0  ;;  %s3003_s21 = smov 0  }
   0x5 LB: > { %3585 = sst [smem:[#allocation13_spill]] %s2922_s21  ;;  %s3009_s22 = sadd.s32 4294967295, %s2922_s21   ;;  %s2922_s21 = sphi %s3003_s21, %s25_s21  }
   0x6   : > { %p2185_p0 = scmp.ge.s32.totalorder %s2922_s21, 1  ;;  %p318_p1 = scmp.lt.s32.totalorder %s2922_s21, 3 }
   0x7   : > { %p3582_p2 = scmp.eq.s32.totalorder %s3009_s22, 0  ;;  %s2924_s24 = smov [#allocation4]  }
   0x8   : > { %p3014_p3 = pnand %p2185_p0, %p318_p1  ;;  %s346_s25 = sshll.u32 %s2924_s24, 4  ;;  %s3018_s25 = int_to_ptr.vmem [resolvable:$true] %s346_s25 }
   0x9   : > { %s2925_s26 = smov [#allocation7]   ;;  %s2926_s29 = smov [#allocation2]  }
   0xa   : > { %s3586_s23 = scalar_select %p3014_p3, 1, 0 }
   0xb   : > { %p2556_p4 = pneg %p3014_p3  ;;  %s378_s27 = sshll.u32 %s2925_s26, 4  ;;  %s3022_s27 = int_to_ptr.vmem [resolvable:$true] %s378_s27 }
   0xc   : > { %s330_s30 = sshll.u32 %s2926_s29, 4  ;;  %s2927_s13 = smov [#allocation6]   ;;  %s3030_s30 = int_to_ptr.vmem [resolvable:$true] %s330_s30 }
   0xd   : > { %p3026_p5 = pnand %p3582_p2, %p2556_p4  ;;  %s3032_s14 = sshll.u32 %s2927_s13, 4  ;;  %s363_s14 = int_to_ptr.vmem [resolvable:$true] %s3032_s14 }
   0xe   : > { %s2764_s17 = scalar_lea.hbm %s3572_s4, 1536 }
   0xf   : > { %p2765_p6 = scmp.ne.s32.totalorder %s3572_s4, %s2764_s17  ;;  %p3042_p7 = pneg %p3026_p5 }
  0x10   : > { %p2771_p10 = scmp.lt.u32.totalorder %s2764_s17, %s3572_s4 }
  0x11   : > { %p2767_p8 = pnand %p3042_p7, %p2765_p6 }
  0x13   : > { %p2768_p9 = pneg %p2767_p8 }
  0x15   : > { %p2773_p11 = pnand %p2771_p10, %p2768_p9 }
  0x17   : > { %2776 = shalt.err (!%p2773_p11)
}
  0x18   : > { %s2777_s29 = scalar_lea.vmem %s3018_s25, 1536  ;;  %p2785_p1 = scmp.lt.s32.totalorder %s3018_s25, %s3018_s25 }
  0x19   : > { %p2778_p12 = scmp.ne.s32.totalorder %s3018_s25, %s2777_s29  ;;  %p2786_p4 = scmp.lt.s32.totalorder %s2777_s29, %s2777_s29 }
  0x1b   : > { %p2780_p13 = pnand %p2778_p12, %p3042_p7  ;;  %p2787_p6 = por %p2786_p4, %p2785_p1 }
  0x1d   : > { %p2781_p0 = pneg %p2780_p13 }
  0x1f   : > { %p2788_p8 = pnand %p2787_p6, %p2781_p0 }
  0x21   : > { %2791 = shalt.err (!%p2788_p8)
}
  0x22   : > { %s2928_s13 = smov 64   ;;  %s2929_s15 = smov 4  }
  0x23   : > { %2562 = dma.hbm_to_vmem [thread:$0]  (!%p3026_p5), %s3572_s4, 1536, %s3018_s25, [#allocation5], %s2928_s13, %s2928_s13, %s2929_s15  }
  0x24   : > { %s2792_s24 = scalar_lea.hbm %s3576_s8, 128 }
  0x25   : > { %p2793_p9 = scmp.ne.s32.totalorder %s3576_s8, %s2792_s24  ;;  %p2799_p12 = scmp.lt.u32.totalorder %s2792_s24, %s3576_s8 }
  0x27   : > { %p2795_p10 = pnand %p2793_p9, %p3042_p7 }
  0x29   : > { %p2796_p11 = pneg %p2795_p10 }
  0x2b   : > { %p2801_p13 = pnand %p2799_p12, %p2796_p11 }
  0x2d   : > { %2804 = shalt.err (!%p2801_p13)
}
  0x2e   : > { %s2805_s25 = scalar_lea.vmem %s3022_s27, 128  ;;  %p2813_p6 = scmp.lt.s32.totalorder %s3022_s27, %s3022_s27 }
  0x2f   : > { %p2806_p0 = scmp.ne.s32.totalorder %s3022_s27, %s2805_s25  ;;  %p2814_p8 = scmp.lt.s32.totalorder %s2805_s25, %s2805_s25 }
  0x31   : > { %p2808_p1 = pnand %p2806_p0, %p3042_p7  ;;  %p2815_p9 = por %p2814_p8, %p2813_p6 }
  0x33   : > { %p2809_p4 = pneg %p2808_p1 }
  0x35   : > { %p2816_p10 = pnand %p2815_p9, %p2809_p4 }
  0x37   : > { %2819 = shalt.err (!%p2816_p10)
}
  0x38   : > { %2568 = dma.hbm_to_vmem [thread:$0]  (!%p3026_p5), %s3576_s8, 128, %s3022_s27, [#allocation8], %s2928_s13, %s2928_s13, %s2929_s15  }
  0x39   : > { %s2820_s18 = scalar_lea.hbm %s3570_s2, 128 }
  0x3a   : > { %p2821_p11 = scmp.ne.s32.totalorder %s3570_s2, %s2820_s18  ;;  %p2827_p0 = scmp.lt.u32.totalorder %s2820_s18, %s3570_s2 }
  0x3c   : > { %p2823_p12 = pnand %p2821_p11, %p3042_p7 }
  0x3e   : > { %p2824_p13 = pneg %p2823_p12 }
  0x40   : > { %p2829_p1 = pnand %p2827_p0, %p2824_p13 }
  0x42   : > { %2832 = shalt.err (!%p2829_p1)
}
  0x43   : > { %s2833_s27 = scalar_lea.vmem %s3030_s30, 128  ;;  %p2841_p9 = scmp.lt.s32.totalorder %s3030_s30, %s3030_s30 }
  0x44   : > { %p2834_p4 = scmp.ne.s32.totalorder %s3030_s30, %s2833_s27  ;;  %p2842_p10 = scmp.lt.s32.totalorder %s2833_s27, %s2833_s27 }
  0x46   : > { %p2836_p6 = pnand %p2834_p4, %p3042_p7  ;;  %p2843_p11 = por %p2842_p10, %p2841_p9 }
  0x48   : > { %p2837_p8 = pneg %p2836_p6 }
  0x4a   : > { %p2844_p12 = pnand %p2843_p11, %p2837_p8 }
  0x4c   : > { %2847 = shalt.err (!%p2844_p12)
}
  0x4d   : > { %2559 = dma.hbm_to_vmem [thread:$0]  (!%p3026_p5), %s3570_s2, 128, %s3030_s30, [#allocation3], %s2928_s13, %s2928_s13, %s2929_s15  }
  0x4e   : > { %s2848_s17 = scalar_lea.hbm %s3574_s6, 1536 }
  0x4f   : > { %p2849_p13 = scmp.ne.s32.totalorder %s3574_s6, %s2848_s17  ;;  %p2855_p4 = scmp.lt.u32.totalorder %s2848_s17, %s3574_s6 }
  0x51   : > { %p2851_p0 = pnand %p2849_p13, %p3042_p7 }
  0x53   : > { %p2852_p1 = pneg %p2851_p0 }
  0x55   : > { %p2857_p6 = pnand %p2855_p4, %p2852_p1 }
  0x57   : > { %2860 = shalt.err (!%p2857_p6)
}
  0x58   : > { %s2861_s29 = scalar_lea.vmem %s363_s14, 1536  ;;  %p2869_p11 = scmp.lt.s32.totalorder %s363_s14, %s363_s14 }
  0x59   : > { %p2862_p8 = scmp.ne.s32.totalorder %s363_s14, %s2861_s29  ;;  %p2870_p12 = scmp.lt.s32.totalorder %s2861_s29, %s2861_s29 }
  0x5b   : > { %p2864_p9 = pnand %p2862_p8, %p3042_p7  ;;  %p2871_p2 = por %p2870_p12, %p2869_p11 }
  0x5d   : > { %p2865_p10 = pneg %p2864_p9 }
  0x5f   : > { %p2872_p3 = pnand %p2871_p2, %p2865_p10 }
  0x61   : > { %2875 = shalt.err (!%p2872_p3)
}
  0x62   : > { %2565 = dma.hbm_to_vmem [thread:$0]  (!%p3026_p5), %s3574_s6, 1536, %s363_s14, [#allocation5], %s2928_s13, %s2928_s13, %s2929_s15  }
  0x63   : > { %s2930_s25 = smov [#allocation9]   ;;  %s2876_s17 = scalar_lea.hbm %s3578_s10, 32 }
  0x64   : > { %s395_s12 = sshll.u32 %s2930_s25, 4  ;;  %p2877_p2 = scmp.ne.s32.totalorder %s3578_s10, %s2876_s17  ;;  %s396_s12 = int_to_ptr.vmem [resolvable:$true] %s395_s12 }
  0x65   : > { %p2883_p0 = scmp.lt.u32.totalorder %s2876_s17, %s3578_s10 }
  0x66   : > { %p2879_p3 = pnand %p2877_p2, %p3042_p7 }
  0x68   : > { %p2880_p13 = pneg %p2879_p3 }
  0x6a   : > { %p2885_p1 = pnand %p2883_p0, %p2880_p13 }
  0x6c   : > { %2888 = shalt.err (!%p2885_p1)
}
  0x6d   : > { %s2889_s14 = scalar_lea.vmem %s396_s12, 32  ;;  %p2897_p9 = scmp.lt.s32.totalorder %s396_s12, %s396_s12 }
  0x6e   : > { %p2890_p4 = scmp.ne.s32.totalorder %s396_s12, %s2889_s14  ;;  %p2898_p10 = scmp.lt.s32.totalorder %s2889_s14, %s2889_s14 }
  0x70   : > { %p2892_p6 = pnand %p2890_p4, %p3042_p7  ;;  %p2899_p11 = por %p2898_p10, %p2897_p9 }
  0x72   : > { %p2893_p8 = pneg %p2892_p6 }
  0x74   : > { %p2900_p12 = pnand %p2899_p11, %p2893_p8 }
  0x76   : > { %2903 = shalt.err (!%p2900_p12)
}
  0x77   : > { %2571 = dma.hbm_to_vmem [thread:$0]  (!%p3026_p5), %s3578_s10, 32, %s396_s12, [#allocation8]  }
  0x78   : > { %p3589_p2 = scmp.ne.s32.totalorder %s3586_s23, 0 }
  0x79   : > { %p3590_p3 = scmp.eq.s32.totalorder (!%p3589_p2), %s3009_s22, 0 }
  0x7a   : > { %425 = sbr.rel (%p3589_p2) target bundleno = 4453 (0x1165), region = 68 }
  0x81   : > { %2909 = dma.done.wait (%p3590_p3), [#allocation3], 128   ;;  %p3591_p7 = pmov %p3590_p3 }
  0x82   : > { %p3592_p13 = pmov %p3590_p3 }
  0x83   : > { %2911 = vsyncadd (%p3591_p7), [#allocation3], 4294967168 }
  0x84   : > { %2913 = dma.done.wait (%p3592_p13), [#allocation5], 3072   ;;  %p3593_p0 = pmov %p3590_p3 }
  0x86   : > { %2915 = vsyncadd (%p3593_p0), [#allocation5], 4294964224  ;;  %p3594_p1 = pmov %p3593_p0 }
  0x87   : > { %p3595_p5 = pmov %p3593_p0 }
  0x88   : > { %2917 = dma.done.wait (%p3594_p1), [#allocation8], 160  }
  0x89   : > { %2919 = vsyncadd (%p3595_p5), [#allocation8], 4294967136  ;;  %p485_p4 = scmp.lt.s32.totalorder %s3009_s22, 1  ;;  %v2931_v0 = vmov 0.0   ;;  %vm2932_vm0 = vmmov 0   ;;  %v2933_v1 = vmov 0   ;;  %v569_v24 = vlaneseq }
  0x8a   : > { %2404 = vmatprep.subr.bf16.mxu0 %v2931_v0  ;;  %2406 = vmatprep.mubr.msk.bf16.mxu0 %vm2932_vm0, %v2931_v0  ;;  %vm524_vm1 = vcmask 1041408   ;;  %v503_v4 = vld [vmem:[%s3571_s3] sm:$0xff]  ;;  %vm520_vm2 = vcmask 31744   ;;  %v504_v7 = vld [vmem:[%s3571_s3 + $0x8] sm:$0xff]  ;;  %v599_v8 = vld [vmem:[%s3573_s5 + $0x10] sm:$0xff]  ;;  %s2934_s26 = smov 1  }
  0x8b   : > { %s3607_s22 = smov (!%p485_p4, %s3009_s22), 1  ;;  %2604 = vset.pattern.permute.xlu0 %v2933_v1  ;;  %2615 = vset.pattern.permute.xlu1 %v2933_v1  ;;  %v2666_v5 = vld [vmem:[#allocation2] sm:$0xff]   ;;  %v714_v10 = vld [vmem:[%s3575_s7 + $0x10] sm:$0xff]  ;;  %s2935_s14 = smov 127   ;;  %v2667_v20 = vld [vmem:[#allocation4] sm:$0xff]   ;;  %vm631_vm3 = vcmask 457728  }
  0x8c   : > { %s2198_s23 = sshll.u32 %s3607_s22, 2  ;;  %507 = vperm.xlu0 %2604, %v503_v4   ;;  %v597_v9 = vld [vmem:[%s3573_s5] sm:$0xff]  ;;  %2418 = vmatprep.mubr.msk.bf16.mxu1 %vm631_vm3, %v2667_v20  ;;  %v600_v21 = vld [vmem:[%s3573_s5 + $0x18] sm:$0xff]  ;;  %v598_v22 = vld [vmem:[%s3573_s5 + $0x8] sm:$0xff]  ;;  %v3218_v25 = vand.u32 127, %v569_v24  ;;  %s2199_s27 = sshll.u32 %s3607_s22, 3 }
  0x8d   : > { %s488_s29 = scalar_lea.vmem %s3568_s0, %s2198_s23  ;;  %v715_v23 = vld [vmem:[%s3575_s7 + $0x18] sm:$0xff]  ;;  %s492_s21 = scalar_lea.vmem %s3569_s1, %s2199_s27  ;;  %vm638_vm8 = vcmask 1043456   ;;  %v2668_v40 = vld [vmem:[#allocation4 + $0x8] sm:$0xff]   ;;  %v2669_v41 = vld [vmem:[#allocation6] sm:$0xff]   ;;  %vm746_vm9 = vcmask 130048  }
  0x8e   : > { %v498_v2 = vld [vmem:[%s488_s29] sm:$0xf]  ;;  %vm575_vm4 = vcmp.ge.s32.totalorder %v3218_v25, 1  ;;  %vm585_vm6 = vcmp.lt.s32.totalorder %v3218_v25, 127  ;;  %v2670_v4 = vld [vmem:[#allocation6 + $0x8] sm:$0xff]   ;;  %s2936_s16 = smov 126  }
  0x8f   : > { %v499_v3 = vpack.c.bf16 %v498_v2, %v498_v2  ;;  %vm3222_vm5 = vmpackc.low %vm575_vm4, %vm575_vm4  ;;  %v500_v35 = vld [vmem:[%s492_s21] sm:$0xff]  ;;  %s2937_s17 = smov 2   ;;  %v2671_v20 = vld [vmem:[#allocation4 + $0x10] sm:$0xff]   ;;  %vm812_vm10 = vcmp.ge.s32.totalorder %v3218_v25, 2  ;;  %vm822_vm12 = vcmp.lt.s32.totalorder %v3218_v25, 126  ;;  %s3604_s18 = sld [smem:[#allocation14_spill]] }
  0x90   : > { %512 = vperm.xlu0 %2604, %v504_v7   ;;  %vm3236_vm7 = vmpackc.low %vm585_vm6, %vm585_vm6  ;;  %v3240_v38 = vpack.c.bf16 %v500_v35, %v500_v35  ;;  %v2237_v24 = vld [vmem:[%s3575_s7 + $0x30] sm:$0xff]  ;;  %v2672_v25 = vld [vmem:[#allocation4 + $0x18] sm:$0xff]  }
  0x91   : > { %v526_v6 = vsel %vm524_vm1, %v499_v3, 0  ;;  %vm3290_vm11 = vmpackc.low %vm812_vm10, %vm812_vm10 }
  0x92   : > { %2405 = vmatpush3.bf16.msra.mxu0 %v526_v6  ;;  %v3250_v39 = vsel %vm638_vm8, %v3240_v38, 0  ;;  %vm3301_vm13 = vmpackc.low %vm822_vm12, %vm822_vm12 }
  0x94   : > { %613 = vperm.xlu0 %2604, %v599_v8  }
  0x95   : > { %2407 = vmatmul.mubr.msk.bf16.vlgmr.msra.gmra.mrb[0].mxu0 %vm520_vm2, %v2666_v5  ;;  %s496_s19 = scalar_lea.vmem %s3604_s18, %s2198_s23 }
  0x96   : > { %2424 = vmatprep.mubr.msk.bf16.mxu0 %vm746_vm9, %v2669_v41  ;;  %v2673_v41 = vld [vmem:[#allocation6 + $0x10] sm:$0xff]  }
  0x98   : > { %603 = vperm.xlu0 %2604, %v597_v9  }
  0x9c   : > { %728 = vperm.xlu0 %2604, %v714_v10  }
 0x10b   : > { %v508_v11 = vpop.permute.xlu0 %507 }
 0x10f   : > { %v513_v14 = vpop.permute.xlu0 %512 }
 0x113   : > { %v614_v42 = vpop.permute.xlu0 %613 }
 0x117   : > { %v604_v52 = vpop.permute.xlu0 %603 }
 0x11b   : > { %v729_v5 = vpop.permute.xlu0 %728 }
 0x168   : > { %v562_v12 = vpop.f32.mrb[0].mxu0 }
 0x169   : > { %v2408_v13 = vpop.f32.mrb[1].mxu0  ;;  %v3200_v16 = vadd.f32 %v562_v12, %v508_v11 }
 0x16a   : > { %v565_v15 = vpop.f32.mrb[2].mxu0 }
 0x16b   : > { %v3202_v17 = vadd.f32 %v565_v15, %v513_v14  ;;  %v2409_v18 = vpop.f32.mrb[3].mxu0 }
 0x16d   : > { %v2605_v19 = vpack.i.bf16 %v3202_v17, %v3200_v16  ;;  %v590_v34 = vpack.c.bf16 %v3202_v17, %v3200_v16 }
 0x16f   : > { %2606 = vrot.lane.b32.xlu1 %v2605_v19, %s2934_s26 }
 0x173   : > { %2611 = vrot.lane.b32.xlu1 %v2605_v19, %s2935_s14 }
 0x177   : > { %618 = vperm.xlu1 %2615, %v600_v21   ;;  %v2220_v21 = vld [vmem:[%s3573_s5 + $0x28] sm:$0xff] }
 0x17b   : > { %608 = vperm.xlu1 %2615, %v598_v22   ;;  %v2219_v22 = vld [vmem:[%s3573_s5 + $0x20] sm:$0xff] }
 0x17f   : > { %733 = vperm.xlu1 %2615, %v715_v23   ;;  %v2238_v23 = vld [vmem:[%s3575_s7 + $0x38] sm:$0xff] }
 0x1e1   : > { %v2607_v26 = vpop.permute.xlu1 %2606 }
 0x1e2   : > { %v2609_v27 = vunpack.i.h.bf16 %v2607_v26  ;;  %v2608_v28 = vunpack.i.l.bf16 %v2607_v26 }
 0x1e4   : > { %v2206_v30 = vpack.c.bf16 %v2609_v27, %v2608_v28 }
 0x1e5   : > { %v2612_v31 = vpop.permute.xlu1 %2611 }
 0x1e6   : > { %v2614_v32 = vunpack.i.h.bf16 %v2612_v31  ;;  %v2613_v33 = vunpack.i.l.bf16 %v2612_v31  ;;  %2410 = vmatprep.subr.msk.bf16.mxu1 %vm3222_vm5, %v2206_v30 }
 0x1e7   : > { %2411 = vmatpush3.bf16.msk.msra.mxu1 %vm3222_vm5, %v2206_v30 }
 0x1e8   : > { %2412 = vmatprep.subr.bf16.mxu1 %v590_v34  ;;  %v2209_v37 = vpack.c.bf16 %v2614_v32, %v2613_v33 }
 0x1eb   : > { %2413 = vmatpush3.bf16.msra.mxu1 %v590_v34 }
 0x1ec   : > { %2414 = vmatprep.subr.msk.bf16.mxu1 %vm3236_vm7, %v2209_v37 }
 0x1ef   : > { %2415 = vmatpush3.bf16.msk.msra.mxu1 %vm3236_vm7, %v2209_v37 }
 0x1f0   : > { %2530 = vmatprep.subr.msk.bf16.mxu1 %vm638_vm8, %v3240_v38 }
 0x1f3   : > { %2417 = vmatpush3.bf16.msra.mxu1 %v3250_v39 }
 0x1f6   : > { %2419 = vmatmul.mubr.msk.bf16.vlgmr.msra.gmra.mrb[0].mxu1 %vm631_vm3, %v2668_v40  ;;  %v619_v46 = vpop.permute.xlu1 %618 }
 0x1f7   : > { %2442 = vmatprep.mubr.msk.bf16.mxu1 %vm746_vm9, %v2673_v41 }
 0x1fa   : > { %v609_v54 = vpop.permute.xlu1 %608 }
 0x1fe   : > { %v734_v9 = vpop.permute.xlu1 %733 }
 0x2c9   : > { %v2420_v43 = vpop.f32.mrb[0].mxu1 }
 0x2ca   : > { %v685_v44 = vadd.f32 %v2420_v43, %v614_v42  ;;  %v676_v45 = vpop.f32.mrb[1].mxu1 }
 0x2cb   : > { %v2421_v47 = vpop.f32.mrb[2].mxu1  ;;  %v677_v53 = vadd.f32 %v676_v45, %v604_v52 }
 0x2cc   : > { %v2213_v48 = vmul.f32 -1.442695, %v685_v44  ;;  %v688_v49 = vadd.f32 %v2421_v47, %v619_v46  ;;  %v679_v50 = vpop.f32.mrb[3].mxu1 }
 0x2cd   : > { %v680_v56 = vadd.f32 %v679_v50, %v609_v54 }
 0x2ce   : > { %2692 = vpow2.f32 %v2213_v48  ;;  %v2214_v51 = vmul.f32 -1.442695, %v688_v49 }
 0x2d0   : > { %2694 = vpow2.f32 %v2214_v51 }
 0x2d1   : > { %2696 = vtanh.f32 %v677_v53 }
 0x2d8   : > { %v2693_v55 = vpop.eup %2692 }
 0x2d9   : > { %v699_v57 = vadd.f32 1.0, %v2693_v55 }
 0x2da   : > { %v2695_v58 = vpop.eup %2694 }
 0x2db   : > { %2698 = vrcp.f32 %v699_v57  ;;  %v700_v59 = vadd.f32 1.0, %v2695_v58  ;;  %v2697_v60 = vpop.eup %2696 }
 0x2dc   : > { %2700 = vtanh.f32 %v680_v56 }
 0x2dd   : > { %2702 = vrcp.f32 %v700_v59 }
 0x2e5   : > { %v2699_v61 = vpop.eup %2698 }
 0x2e6   : > { %v2701_v62 = vpop.eup %2700  ;;  %v705_v63 = vmul.f32 %v2699_v61, %v2697_v60 }
 0x2e7   : > { %v2703_v1 = vpop.eup %2702 }
 0x2e8   : > { %v706_v2 = vmul.f32 %v2703_v1, %v2701_v62 }
 0x2ea   : > { %v711_v3 = vpack.c.bf16 %v706_v2, %v705_v63 }
 0x2ec   : > { %2422 = vmatprep.subr.bf16.mxu0 %v711_v3 }
 0x2ed   : > { %2423 = vmatpush3.bf16.msra.mxu0 %v711_v3 }
 0x2f0   : > { %2425 = vmatmul.mubr.msk.bf16.vlgmr.msra.gmra.mrb[4].mxu0 %vm746_vm9, %v2670_v4  ;;  %v2674_v4 = vld [vmem:[#allocation6 + $0x18] sm:$0xff]  }
 0x2f1   : > { %2436 = vmatprep.mubr.msk.bf16.mxu0 %vm631_vm3, %v2671_v20 }
 0x3c3   : > { %v2426_v6 = vpop.f32.mrb[4].mxu0 }
 0x3c4   : > { %v796_v7 = vadd.f32 %v2426_v6, %v729_v5  ;;  %v3256_v8 = vpop.f32.mrb[5].mxu0 }
 0x3c5   : > { %v2427_v10 = vpop.f32.mrb[6].mxu0 }
 0x3c6   : > { %v804_v11 = vadd.f32 %v796_v7, %v3200_v16  ;;  %v799_v12 = vadd.f32 %v2427_v10, %v734_v9  ;;  %v3259_v13 = vpop.f32.mrb[7].mxu0  ;;  %v2222_v16 = vld [vmem:[%s3573_s5 + $0x38] sm:$0xff] }
 0x3c8   : > { %v805_v14 = vadd.f32 %v799_v12, %v3202_v17  ;;  %v3262_v15 = vmul.f32 0.70710677, %v804_v11  ;;  %v2221_v17 = vld [vmem:[%s3573_s5 + $0x30] sm:$0xff] }
 0x3ca   : > { %v3264_v18 = vmul.f32 0.70710677, %v805_v14 }
 0x3cc   : > { %v2621_v19 = vpack.i.bf16 %v3264_v18, %v3262_v15  ;;  %v827_v35 = vpack.c.bf16 %v3264_v18, %v3262_v15 }
 0x3ce   : > { %2622 = vrot.lane.b32.xlu1 %v2621_v19, %s2936_s16  ;;  %2617 = vrot.lane.b32.xlu0 %v2621_v19, %s2937_s17 }
 0x3d2   : > { %856 = vperm.xlu1 %2615, %v2222_v16   ;;  %851 = vperm.xlu0 %2604, %v2221_v17  }
 0x3d6   : > { %846 = vperm.xlu1 %2615, %v2220_v21   ;;  %841 = vperm.xlu0 %2604, %v2219_v22   ;;  %v2245_v22 = vld [vmem:[%s3573_s5 + $0x50] sm:$0xff] }
 0x3da   : > { %968 = vperm.xlu1 %2615, %v2238_v23   ;;  %963 = vperm.xlu0 %2604, %v2237_v24   ;;  %v2244_v23 = vld [vmem:[%s3573_s5 + $0x48] sm:$0xff]  ;;  %v2243_v24 = vld [vmem:[%s3573_s5 + $0x40] sm:$0xff] }
 0x440   : > { %v2618_v26 = vpop.permute.xlu0 %2617  ;;  %v2623_v30 = vpop.permute.xlu1 %2622 }
 0x441   : > { %v2620_v27 = vunpack.i.h.bf16 %v2618_v26  ;;  %v2619_v28 = vunpack.i.l.bf16 %v2618_v26  ;;  %v2625_v33 = vunpack.i.h.bf16 %v2623_v30  ;;  %v2624_v34 = vunpack.i.l.bf16 %v2623_v30  ;;  %v2262_v26 = vld [vmem:[%s3575_s7 + $0x58] sm:$0xff] }
 0x443   : > { %v2226_v32 = vpack.c.bf16 %v2620_v27, %v2619_v28  ;;  %v2229_v40 = vpack.c.bf16 %v2625_v33, %v2624_v34  ;;  %v2261_v27 = vld [vmem:[%s3575_s7 + $0x50] sm:$0xff] }
 0x445   : > { %2428 = vmatprep.subr.msk.bf16.mxu0 %vm3290_vm11, %v2226_v32 }
 0x446   : > { %2429 = vmatpush3.bf16.msk.msra.mxu0 %vm3290_vm11, %v2226_v32 }
 0x447   : > { %2430 = vmatprep.subr.bf16.mxu0 %v827_v35 }
 0x44a   : > { %2431 = vmatpush3.bf16.msra.mxu0 %v827_v35 }
 0x44b   : > { %2432 = vmatprep.subr.msk.bf16.mxu0 %vm3301_vm13, %v2229_v40 }
 0x44e   : > { %2433 = vmatpush3.bf16.msk.msra.mxu0 %vm3301_vm13, %v2229_v40 }
 0x44f   : > { %2531 = vmatprep.subr.msk.bf16.mxu0 %vm638_vm8, %v3240_v38 }
 0x451   : > { %v852_v42 = vpop.permute.xlu0 %851  ;;  %v857_v46 = vpop.permute.xlu1 %856 }
 0x452   : > { %2435 = vmatpush3.bf16.msra.mxu0 %v3250_v39 }
 0x455   : > { %2437 = vmatmul.mubr.msk.bf16.vlgmr.msra.gmra.mrb[8].mxu0 %vm631_vm3, %v2672_v25  ;;  %v842_v52 = vpop.permute.xlu0 %841  ;;  %v847_v54 = vpop.permute.xlu1 %846 }
 0x459   : > { %v964_v5 = vpop.permute.xlu0 %963  ;;  %v969_v10 = vpop.permute.xlu1 %968 }
 0x528   : > { %v2438_v43 = vpop.f32.mrb[8].mxu0 }
 0x529   : > { %v918_v44 = vadd.f32 %v2438_v43, %v852_v42  ;;  %v909_v45 = vpop.f32.mrb[9].mxu0  ;;  %v2676_v42 = vld [vmem:[#allocation4 + $0x28] sm:$0xff]   ;;  %v2677_v43 = vld [vmem:[#allocation6 + $0x20] sm:$0xff]  }
 0x52a   : > { %v2439_v47 = vpop.f32.mrb[10].mxu0  ;;  %v910_v53 = vadd.f32 %v909_v45, %v842_v52  ;;  %2460 = vmatprep.mubr.msk.bf16.mxu0 %vm746_vm9, %v2677_v43 }
 0x52b   : > { %v2233_v48 = vmul.f32 -1.442695, %v918_v44  ;;  %v921_v49 = vadd.f32 %v2439_v47, %v857_v46  ;;  %v912_v50 = vpop.f32.mrb[11].mxu0 }
 0x52c   : > { %v913_v56 = vadd.f32 %v912_v50, %v847_v54 }
 0x52d   : > { %2704 = vpow2.f32 %v2233_v48  ;;  %v2234_v51 = vmul.f32 -1.442695, %v921_v49 }
 0x52f   : > { %2706 = vpow2.f32 %v2234_v51 }
 0x530   : > { %2708 = vtanh.f32 %v910_v53 }
 0x537   : > { %v2705_v55 = vpop.eup %2704 }
 0x538   : > { %v932_v57 = vadd.f32 1.0, %v2705_v55 }
 0x539   : > { %v2707_v58 = vpop.eup %2706 }
 0x53a   : > { %2710 = vrcp.f32 %v932_v57  ;;  %v933_v59 = vadd.f32 1.0, %v2707_v58  ;;  %v2709_v60 = vpop.eup %2708 }
 0x53b   : > { %2712 = vtanh.f32 %v913_v56 }
 0x53c   : > { %2714 = vrcp.f32 %v933_v59 }
 0x544   : > { %v2711_v61 = vpop.eup %2710 }
 0x545   : > { %v2713_v62 = vpop.eup %2712  ;;  %v938_v63 = vmul.f32 %v2711_v61, %v2709_v60 }
 0x546   : > { %v2715_v1 = vpop.eup %2714 }
 0x547   : > { %v939_v2 = vmul.f32 %v2715_v1, %v2713_v62 }
 0x549   : > { %v945_v3 = vpack.c.bf16 %v939_v2, %v938_v63 }
 0x54b   : > { %2440 = vmatprep.subr.bf16.mxu1 %v945_v3 }
 0x54c   : > { %2441 = vmatpush3.bf16.msra.mxu1 %v945_v3 }
 0x54f   : > { %2443 = vmatmul.mubr.msk.bf16.vlgmr.msra.gmra.mrb[4].mxu1 %vm746_vm9, %v2674_v4 }
 0x622   : > { %v2444_v6 = vpop.f32.mrb[4].mxu1 }
 0x623   : > { %v1030_v7 = vadd.f32 %v2444_v6, %v964_v5  ;;  %v3315_v9 = vpop.f32.mrb[5].mxu1  ;;  %v2678_v6 = vld [vmem:[#allocation6 + $0x28] sm:$0xff]  }
 0x624   : > { %v2445_v11 = vpop.f32.mrb[6].mxu1 }
 0x625   : > { %v1038_v12 = vadd.f32 %v1030_v7, %v3262_v15  ;;  %v1033_v14 = vadd.f32 %v2445_v11, %v969_v10  ;;  %v3318_v19 = vpop.f32.mrb[7].mxu1  ;;  %v2246_v15 = vld [vmem:[%s3573_s5 + $0x58] sm:$0xff] }
 0x627   : > { %v1039_v16 = vadd.f32 %v1033_v14, %v3264_v18  ;;  %v3321_v17 = vmul.f32 0.70710677, %v1038_v12  ;;  %v2675_v18 = vld [vmem:[#allocation4 + $0x20] sm:$0xff]  }
 0x628   : > { %2454 = vmatprep.mubr.msk.bf16.mxu1 %vm631_vm3, %v2675_v18 }
 0x629   : > { %v3323_v20 = vmul.f32 0.70710677, %v1039_v16 }
 0x62b   : > { %v2631_v21 = vpack.i.bf16 %v3323_v20, %v3321_v17  ;;  %v1055_v25 = vpack.c.bf16 %v3323_v20, %v3321_v17 }
 0x62d   : > { %2632 = vrot.lane.b32.xlu1 %v2631_v21, %s2935_s14  ;;  %2627 = vrot.lane.b32.xlu0 %v2631_v21, %s2934_s26 }
 0x631   : > { %1084 = vperm.xlu1 %2615, %v2246_v15   ;;  %1079 = vperm.xlu0 %2604, %v2245_v22  }
 0x635   : > { %1074 = vperm.xlu1 %2615, %v2244_v23   ;;  %1069 = vperm.xlu0 %2604, %v2243_v24  }
 0x639   : > { %1196 = vperm.xlu1 %2615, %v2262_v26   ;;  %1191 = vperm.xlu0 %2604, %v2261_v27   ;;  %v2269_v27 = vld [vmem:[%s3573_s5 + $0x70] sm:$0xff] }
 0x69f   : > { %v2628_v28 = vpop.permute.xlu0 %2627  ;;  %v2633_v33 = vpop.permute.xlu1 %2632 }
 0x6a0   : > { %v2630_v30 = vunpack.i.h.bf16 %v2628_v28  ;;  %v2629_v32 = vunpack.i.l.bf16 %v2628_v28  ;;  %v2635_v35 = vunpack.i.h.bf16 %v2633_v33  ;;  %v2634_v40 = vunpack.i.l.bf16 %v2633_v33  ;;  %v2268_v28 = vld [vmem:[%s3573_s5 + $0x68] sm:$0xff]  ;;  %v2285_v33 = vld [vmem:[%s3575_s7 + $0x70] sm:$0xff] }
 0x6a2   : > { %v2250_v34 = vpack.c.bf16 %v2630_v30, %v2629_v32  ;;  %v2253_v41 = vpack.c.bf16 %v2635_v35, %v2634_v40  ;;  %v2267_v30 = vld [vmem:[%s3573_s5 + $0x60] sm:$0xff]  ;;  %v2286_v32 = vld [vmem:[%s3575_s7 + $0x78] sm:$0xff] }
 0x6a4   : > { %2446 = vmatprep.subr.msk.bf16.mxu1 %vm3222_vm5, %v2250_v34 }
 0x6a5   : > { %2447 = vmatpush3.bf16.msk.msra.mxu1 %vm3222_vm5, %v2250_v34 }
 0x6a6   : > { %2448 = vmatprep.subr.bf16.mxu1 %v1055_v25 }
 0x6a9   : > { %2449 = vmatpush3.bf16.msra.mxu1 %v1055_v25 }
 0x6aa   : > { %2450 = vmatprep.subr.msk.bf16.mxu1 %vm3236_vm7, %v2253_v41 }
 0x6ad   : > { %2451 = vmatpush3.bf16.msk.msra.mxu1 %vm3236_vm7, %v2253_v41 }
 0x6ae   : > { %2532 = vmatprep.subr.msk.bf16.mxu1 %vm638_vm8, %v3240_v38 }
 0x6b0   : > { %v1080_v44 = vpop.permute.xlu0 %1079  ;;  %v1085_v48 = vpop.permute.xlu1 %1084 }
 0x6b1   : > { %2453 = vmatpush3.bf16.msra.mxu1 %v3250_v39 }
 0x6b4   : > { %2455 = vmatmul.mubr.msk.bf16.vlgmr.msra.gmra.mrb[8].mxu1 %vm631_vm3, %v2676_v42  ;;  %v1070_v54 = vpop.permute.xlu0 %1069  ;;  %v1075_v56 = vpop.permute.xlu1 %1074 }
 0x6b8   : > { %v1192_v7 = vpop.permute.xlu0 %1191  ;;  %v1197_v14 = vpop.permute.xlu1 %1196 }
 0x787   : > { %v2456_v45 = vpop.f32.mrb[8].mxu1 }
 0x788   : > { %v1146_v46 = vadd.f32 %v2456_v45, %v1080_v44  ;;  %v1137_v47 = vpop.f32.mrb[9].mxu1 }
 0x789   : > { %v2457_v49 = vpop.f32.mrb[10].mxu1  ;;  %v1138_v55 = vadd.f32 %v1137_v47, %v1070_v54  ;;  %v2681_v47 = vld [vmem:[#allocation6 + $0x30] sm:$0xff]  }
 0x78a   : > { %v2257_v50 = vmul.f32 -1.442695, %v1146_v46  ;;  %v1149_v51 = vadd.f32 %v2457_v49, %v1085_v48  ;;  %v1140_v52 = vpop.f32.mrb[11].mxu1  ;;  %v2680_v46 = vld [vmem:[#allocation4 + $0x38] sm:$0xff]   ;;  %2478 = vmatprep.mubr.msk.bf16.mxu1 %vm746_vm9, %v2681_v47 }
 0x78b   : > { %v1141_v58 = vadd.f32 %v1140_v52, %v1075_v56 }
 0x78c   : > { %2716 = vpow2.f32 %v2257_v50  ;;  %v2258_v53 = vmul.f32 -1.442695, %v1149_v51 }
 0x78e   : > { %2718 = vpow2.f32 %v2258_v53 }
 0x78f   : > { %2720 = vtanh.f32 %v1138_v55 }
 0x796   : > { %v2717_v57 = vpop.eup %2716 }
 0x797   : > { %v1160_v59 = vadd.f32 1.0, %v2717_v57 }
 0x798   : > { %v2719_v60 = vpop.eup %2718 }
 0x799   : > { %2722 = vrcp.f32 %v1160_v59  ;;  %v1161_v61 = vadd.f32 1.0, %v2719_v60  ;;  %v2721_v62 = vpop.eup %2720 }
 0x79a   : > { %2724 = vtanh.f32 %v1141_v58 }
 0x79b   : > { %2726 = vrcp.f32 %v1161_v61 }
 0x7a3   : > { %v2723_v63 = vpop.eup %2722 }
 0x7a4   : > { %v2725_v1 = vpop.eup %2724  ;;  %v1166_v2 = vmul.f32 %v2723_v63, %v2721_v62 }
 0x7a5   : > { %v2727_v3 = vpop.eup %2726 }
 0x7a6   : > { %v1167_v4 = vmul.f32 %v2727_v3, %v2725_v1 }
 0x7a8   : > { %v1173_v5 = vpack.c.bf16 %v1167_v4, %v1166_v2 }
 0x7aa   : > { %2458 = vmatprep.subr.bf16.mxu0 %v1173_v5 }
 0x7ab   : > { %2459 = vmatpush3.bf16.msra.mxu0 %v1173_v5 }
 0x7ae   : > { %2461 = vmatmul.mubr.msk.bf16.vlgmr.msra.gmra.mrb[12].mxu0 %vm746_vm9, %v2678_v6 }
 0x881   : > { %v2462_v10 = vpop.f32.mrb[12].mxu0 }
 0x882   : > { %v1258_v11 = vadd.f32 %v2462_v10, %v1192_v7  ;;  %v3364_v12 = vpop.f32.mrb[13].mxu0 }
 0x883   : > { %v2463_v16 = vpop.f32.mrb[14].mxu0 }
 0x884   : > { %v1266_v21 = vadd.f32 %v1258_v11, %v3321_v17  ;;  %v1261_v15 = vadd.f32 %v2463_v16, %v1197_v14  ;;  %v3367_v22 = vpop.f32.mrb[15].mxu0  ;;  %v2270_v17 = vld [vmem:[%s3573_s5 + $0x78] sm:$0xff]  ;;  %v2682_v14 = vld [vmem:[#allocation6 + $0x38] sm:$0xff]  }
 0x886   : > { %v1267_v18 = vadd.f32 %v1261_v15, %v3323_v20  ;;  %v3370_v23 = vmul.f32 0.70710677, %v1266_v21  ;;  %v2679_v20 = vld [vmem:[#allocation4 + $0x30] sm:$0xff]  }
 0x887   : > { %2472 = vmatprep.mubr.msk.bf16.mxu0 %vm631_vm3, %v2679_v20 }
 0x888   : > { %v3372_v24 = vmul.f32 0.70710677, %v1267_v18 }
 0x88a   : > { %v2641_v26 = vpack.i.bf16 %v3372_v24, %v3370_v23  ;;  %v1283_v44 = vpack.c.bf16 %v3372_v24, %v3370_v23 }
 0x88c   : > { %2642 = vrot.lane.b32.xlu1 %v2641_v26, %s2936_s16  ;;  %2637 = vrot.lane.b32.xlu0 %v2641_v26, %s2937_s17 }
 0x890   : > { %1312 = vperm.xlu1 %2615, %v2270_v17   ;;  %1307 = vperm.xlu0 %2604, %v2269_v27  }
 0x894   : > { %1302 = vperm.xlu1 %2615, %v2268_v28   ;;  %1297 = vperm.xlu0 %2604, %v2267_v30  }
 0x898   : > { %1424 = vperm.xlu1 %2615, %v2286_v32   ;;  %1419 = vperm.xlu0 %2604, %v2285_v33  }
 0x8fe   : > { %v2638_v34 = vpop.permute.xlu0 %2637  ;;  %v2643_v25 = vpop.permute.xlu1 %2642 }
 0x8ff   : > { %v2640_v35 = vunpack.i.h.bf16 %v2638_v34  ;;  %v2639_v40 = vunpack.i.l.bf16 %v2638_v34  ;;  %v2645_v42 = vunpack.i.h.bf16 %v2643_v25  ;;  %v2644_v43 = vunpack.i.l.bf16 %v2643_v25  ;;  %v2291_v25 = vld [vmem:[%s3573_s5 + $0x80] sm:$0xff] }
 0x901   : > { %v2274_v41 = vpack.c.bf16 %v2640_v35, %v2639_v40  ;;  %v2277_v45 = vpack.c.bf16 %v2645_v42, %v2644_v43  ;;  %v2293_v35 = vld [vmem:[%s3573_s5 + $0x90] sm:$0xff]  ;;  %v2292_v40 = vld [vmem:[%s3573_s5 + $0x88] sm:$0xff] }
 0x902   : > { %v2309_v42 = vld [vmem:[%s3575_s7 + $0x90] sm:$0xff] }
 0x903   : > { %2464 = vmatprep.subr.msk.bf16.mxu0 %vm3290_vm11, %v2274_v41 }
 0x904   : > { %2465 = vmatpush3.bf16.msk.msra.mxu0 %vm3290_vm11, %v2274_v41  ;;  %v2310_v41 = vld [vmem:[%s3575_s7 + $0x98] sm:$0xff] }
 0x905   : > { %2466 = vmatprep.subr.bf16.mxu0 %v1283_v44 }
 0x908   : > { %2467 = vmatpush3.bf16.msra.mxu0 %v1283_v44 }
 0x909   : > { %2468 = vmatprep.subr.msk.bf16.mxu0 %vm3301_vm13, %v2277_v45 }
 0x90c   : > { %2469 = vmatpush3.bf16.msk.msra.mxu0 %vm3301_vm13, %v2277_v45 }
 0x90d   : > { %2533 = vmatprep.subr.msk.bf16.mxu0 %vm638_vm8, %v3240_v38 }
 0x90f   : > { %v1308_v48 = vpop.permute.xlu0 %1307  ;;  %v1313_v52 = vpop.permute.xlu1 %1312 }
 0x910   : > { %2471 = vmatpush3.bf16.msra.mxu0 %v3250_v39 }
 0x913   : > { %2473 = vmatmul.mubr.msk.bf16.vlgmr.msra.gmra.mrb[16].mxu0 %vm631_vm3, %v2680_v46  ;;  %v1298_v58 = vpop.permute.xlu0 %1297  ;;  %v1303_v60 = vpop.permute.xlu1 %1302 }
 0x917   : > { %v1420_v16 = vpop.permute.xlu0 %1419  ;;  %v1425_v26 = vpop.permute.xlu1 %1424 }
 0x9e6   : > { %v2474_v49 = vpop.f32.mrb[16].mxu0 }
 0x9e7   : > { %v1374_v50 = vadd.f32 %v2474_v49, %v1308_v48  ;;  %v1365_v51 = vpop.f32.mrb[17].mxu0 }
 0x9e8   : > { %v2475_v53 = vpop.f32.mrb[18].mxu0  ;;  %v1366_v59 = vadd.f32 %v1365_v51, %v1298_v58 }
 0x9e9   : > { %v2281_v54 = vmul.f32 -1.442695, %v1374_v50  ;;  %v1377_v55 = vadd.f32 %v2475_v53, %v1313_v52  ;;  %v1368_v56 = vpop.f32.mrb[19].mxu0  ;;  %v2684_v52 = vld [vmem:[#allocation4 + $0x48] sm:$0xff]   ;;  %v2685_v53 = vld [vmem:[#allocation6 + $0x40] sm:$0xff]  }
 0x9ea   : > { %v1369_v62 = vadd.f32 %v1368_v56, %v1303_v60  ;;  %2496 = vmatprep.mubr.msk.bf16.mxu0 %vm746_vm9, %v2685_v53  ;;  %v2259_v53 = vld [vmem:[%s3575_s7 + $0x40] sm:$0xff] }
 0x9eb   : > { %2728 = vpow2.f32 %v2281_v54  ;;  %v2282_v57 = vmul.f32 -1.442695, %v1377_v55 }
 0x9ed   : > { %2730 = vpow2.f32 %v2282_v57 }
 0x9ee   : > { %2732 = vtanh.f32 %v1366_v59 }
 0x9f5   : > { %v2729_v61 = vpop.eup %2728 }
 0x9f6   : > { %v1388_v63 = vadd.f32 1.0, %v2729_v61 }
 0x9f7   : > { %v2731_v1 = vpop.eup %2730 }
 0x9f8   : > { %2734 = vrcp.f32 %v1388_v63  ;;  %v1389_v2 = vadd.f32 1.0, %v2731_v1  ;;  %v2733_v3 = vpop.eup %2732 }
 0x9f9   : > { %2736 = vtanh.f32 %v1369_v62 }
 0x9fa   : > { %2738 = vrcp.f32 %v1389_v2 }
 0xa02   : > { %v2735_v4 = vpop.eup %2734 }
 0xa03   : > { %v2737_v5 = vpop.eup %2736  ;;  %v1394_v6 = vmul.f32 %v2735_v4, %v2733_v3 }
 0xa04   : > { %v2739_v7 = vpop.eup %2738 }
 0xa05   : > { %v1395_v10 = vmul.f32 %v2739_v7, %v2737_v5 }
 0xa07   : > { %v1401_v11 = vpack.c.bf16 %v1395_v10, %v1394_v6 }
 0xa09   : > { %2476 = vmatprep.subr.bf16.mxu1 %v1401_v11 }
 0xa0a   : > { %2477 = vmatpush3.bf16.msra.mxu1 %v1401_v11 }
 0xa0d   : > { %2479 = vmatmul.mubr.msk.bf16.vlgmr.msra.gmra.mrb[12].mxu1 %vm746_vm9, %v2682_v14 }
 0xae0   : > { %v2480_v21 = vpop.f32.mrb[12].mxu1 }
 0xae1   : > { %v1486_v15 = vadd.f32 %v2480_v21, %v1420_v16  ;;  %v3413_v18 = vpop.f32.mrb[13].mxu1 }
 0xae2   : > { %v2481_v17 = vpop.f32.mrb[14].mxu1 }
 0xae3   : > { %v1494_v27 = vadd.f32 %v1486_v15, %v3370_v23  ;;  %v1489_v20 = vadd.f32 %v2481_v17, %v1425_v26  ;;  %v3416_v28 = vpop.f32.mrb[15].mxu1  ;;  %v2294_v23 = vld [vmem:[%s3573_s5 + $0x98] sm:$0xff]  ;;  %v2686_v26 = vld [vmem:[#allocation6 + $0x48] sm:$0xff]  }
 0xae5   : > { %v1495_v30 = vadd.f32 %v1489_v20, %v3372_v24  ;;  %v3419_v32 = vmul.f32 0.70710677, %v1494_v27  ;;  %v2683_v24 = vld [vmem:[#allocation4 + $0x40] sm:$0xff]  }
 0xae6   : > { %2490 = vmatprep.mubr.msk.bf16.mxu1 %vm631_vm3, %v2683_v24 }
 0xae7   : > { %v3421_v33 = vmul.f32 0.70710677, %v1495_v30 }
 0xae9   : > { %v2651_v34 = vpack.i.bf16 %v3421_v33, %v3419_v32  ;;  %v1511_v50 = vpack.c.bf16 %v3421_v33, %v3419_v32 }
 0xaeb   : > { %2652 = vrot.lane.b32.xlu1 %v2651_v34, %s2935_s14  ;;  %2647 = vrot.lane.b32.xlu0 %v2651_v34, %s2934_s26 }
 0xaef   : > { %1540 = vperm.xlu1 %2615, %v2294_v23   ;;  %1535 = vperm.xlu0 %2604, %v2293_v35  }
 0xaf3   : > { %1530 = vperm.xlu1 %2615, %v2292_v40   ;;  %1525 = vperm.xlu0 %2604, %v2291_v25  }
 0xaf7   : > { %1652 = vperm.xlu1 %2615, %v2310_v41   ;;  %1647 = vperm.xlu0 %2604, %v2309_v42  }
 0xb5d   : > { %v2648_v43 = vpop.permute.xlu0 %2647  ;;  %v2653_v46 = vpop.permute.xlu1 %2652 }
 0xb5e   : > { %v2650_v44 = vunpack.i.h.bf16 %v2648_v43  ;;  %v2649_v45 = vunpack.i.l.bf16 %v2648_v43  ;;  %v2655_v48 = vunpack.i.h.bf16 %v2653_v46  ;;  %v2654_v49 = vunpack.i.l.bf16 %v2653_v46  ;;  %v2687_v46 = vld [vmem:[#allocation4 + $0x50] sm:$0xff]  }
 0xb60   : > { %v2298_v47 = vpack.c.bf16 %v2650_v44, %v2649_v45  ;;  %v2301_v51 = vpack.c.bf16 %v2655_v48, %v2654_v49  ;;  %v2318_v45 = vld [vmem:[%s3573_s5 + $0xb8] sm:$0xff]  ;;  %v713_v48 = vld [vmem:[%s3575_s7 + $0x8] sm:$0xff]  ;;  %v712_v49 = vld [vmem:[%s3575_s7] sm:$0xff] }
 0xb62   : > { %2482 = vmatprep.subr.msk.bf16.mxu1 %vm3222_vm5, %v2298_v47 }
 0xb63   : > { %2483 = vmatpush3.bf16.msk.msra.mxu1 %vm3222_vm5, %v2298_v47  ;;  %v2315_v47 = vld [vmem:[%s3573_s5 + $0xa0] sm:$0xff] }
 0xb64   : > { %2484 = vmatprep.subr.bf16.mxu1 %v1511_v50 }
 0xb67   : > { %2485 = vmatpush3.bf16.msra.mxu1 %v1511_v50  ;;  %v2236_v50 = vld [vmem:[%s3575_s7 + $0x28] sm:$0xff] }
 0xb68   : > { %2486 = vmatprep.subr.msk.bf16.mxu1 %vm3236_vm7, %v2301_v51 }
 0xb6b   : > { %2487 = vmatpush3.bf16.msk.msra.mxu1 %vm3236_vm7, %v2301_v51  ;;  %v2235_v51 = vld [vmem:[%s3575_s7 + $0x20] sm:$0xff] }
 0xb6c   : > { %2534 = vmatprep.subr.msk.bf16.mxu1 %vm638_vm8, %v3240_v38 }
 0xb6e   : > { %v1536_v29 = vpop.permute.xlu0 %1535  ;;  %v1541_v57 = vpop.permute.xlu1 %1540 }
 0xb6f   : > { %2489 = vmatpush3.bf16.msra.mxu1 %v3250_v39 }
 0xb72   : > { %2491 = vmatmul.mubr.msk.bf16.vlgmr.msra.gmra.mrb[16].mxu1 %vm631_vm3, %v2684_v52  ;;  %v1526_v62 = vpop.permute.xlu0 %1525  ;;  %v1531_v1 = vpop.permute.xlu1 %1530  ;;  %v2260_v52 = vld [vmem:[%s3575_s7 + $0x48] sm:$0xff] }
 0xb76   : > { %v1648_v17 = vpop.permute.xlu0 %1647  ;;  %v1653_v34 = vpop.permute.xlu1 %1652 }
 0xc45   : > { %v2492_v54 = vpop.f32.mrb[16].mxu1 }
 0xc46   : > { %v1602_v55 = vadd.f32 %v2492_v54, %v1536_v29  ;;  %v1593_v56 = vpop.f32.mrb[17].mxu1  ;;  %v2284_v29 = vld [vmem:[%s3575_s7 + $0x68] sm:$0xff]  ;;  %v2283_v54 = vld [vmem:[%s3575_s7 + $0x60] sm:$0xff] }
 0xc47   : > { %v2493_v58 = vpop.f32.mrb[18].mxu1  ;;  %v1594_v63 = vadd.f32 %v1593_v56, %v1526_v62  ;;  %v2307_v56 = vld [vmem:[%s3575_s7 + $0x80] sm:$0xff] }
 0xc48   : > { %v2305_v59 = vmul.f32 -1.442695, %v1602_v55  ;;  %v1605_v36 = vadd.f32 %v2493_v58, %v1541_v57  ;;  %v1596_v60 = vpop.f32.mrb[19].mxu1  ;;  %v2308_v55 = vld [vmem:[%s3575_s7 + $0x88] sm:$0xff]  ;;  %v2331_v58 = vld [vmem:[%s3575_s7 + $0xa0] sm:$0xff] }
 0xc49   : > { %v1597_v3 = vadd.f32 %v1596_v60, %v1531_v1  ;;  %v2332_v57 = vld [vmem:[%s3575_s7 + $0xa8] sm:$0xff]  ;;  %v2018_v60 = vld [vmem:[%s3579_s11] sm:$0xf] }
 0xc4a   : > { %2740 = vpow2.f32 %v2305_v59  ;;  %v2306_v61 = vmul.f32 -1.442695, %v1605_v36  ;;  %v1954_v59 = vld [vmem:[%s3577_s9 + $0x8] sm:$0xff]  ;;  %v1953_v36 = vld [vmem:[%s3577_s9] sm:$0xff] }
 0xc4c   : > { %2742 = vpow2.f32 %v2306_v61 }
 0xc4d   : > { %2744 = vtanh.f32 %v1594_v63 }
 0xc54   : > { %v2741_v2 = vpop.eup %2740 }
 0xc55   : > { %v1616_v4 = vadd.f32 1.0, %v2741_v2 }
 0xc56   : > { %v2743_v5 = vpop.eup %2742 }
 0xc57   : > { %2746 = vrcp.f32 %v1616_v4  ;;  %v1617_v6 = vadd.f32 1.0, %v2743_v5  ;;  %v2745_v7 = vpop.eup %2744 }
 0xc58   : > { %2748 = vtanh.f32 %v1597_v3 }
 0xc59   : > { %2750 = vrcp.f32 %v1617_v6 }
 0xc61   : > { %v2747_v10 = vpop.eup %2746 }
 0xc62   : > { %v2749_v11 = vpop.eup %2748  ;;  %v1622_v14 = vmul.f32 %v2747_v10, %v2745_v7  ;;  %v2688_v10 = vld [vmem:[#allocation4 + $0x58] sm:$0xff]  }
 0xc63   : > { %v2751_v16 = vpop.eup %2750 }
 0xc64   : > { %v1623_v21 = vmul.f32 %v2751_v16, %v2749_v11 }
 0xc66   : > { %v1629_v15 = vpack.c.bf16 %v1623_v21, %v1622_v14 }
 0xc68   : > { %2494 = vmatprep.subr.bf16.mxu0 %v1629_v15 }
 0xc69   : > { %2495 = vmatpush3.bf16.msra.mxu0 %v1629_v15 }
 0xc6c   : > { %2497 = vmatmul.mubr.msk.bf16.vlgmr.msra.gmra.mrb[20].mxu0 %vm746_vm9, %v2686_v26 }
 0xc6d   : > { %2508 = vmatprep.mubr.msk.bf16.mxu0 %vm631_vm3, %v2687_v46 }
 0xd3f   : > { %v2498_v27 = vpop.f32.mrb[20].mxu0 }
 0xd40   : > { %v1714_v20 = vadd.f32 %v2498_v27, %v1648_v17  ;;  %v3462_v30 = vpop.f32.mrb[21].mxu0 }
 0xd41   : > { %v2499_v23 = vpop.f32.mrb[22].mxu0 }
 0xd42   : > { %v1722_v35 = vadd.f32 %v1714_v20, %v3419_v32  ;;  %v1717_v24 = vadd.f32 %v2499_v23, %v1653_v34  ;;  %v3465_v40 = vpop.f32.mrb[23].mxu0  ;;  %v2317_v32 = vld [vmem:[%s3573_s5 + $0xb0] sm:$0xff] }
 0xd44   : > { %v1723_v25 = vadd.f32 %v1717_v24, %v3421_v33  ;;  %v1724_v41 = vmul.f32 0.70710677, %v1722_v35  ;;  %v2316_v33 = vld [vmem:[%s3573_s5 + $0xa8] sm:$0xff] }
 0xd46   : > { %v1725_v42 = vmul.f32 0.70710677, %v1723_v25 }
 0xd48   : > { %v2661_v43 = vpack.i.bf16 %v1725_v42, %v1724_v41  ;;  %v1739_v44 = vpack.c.bf16 %v1725_v42, %v1724_v41 }
 0xd4a   : > { %2662 = vrot.lane.b32.xlu1 %v2661_v43, %s2936_s16  ;;  %2657 = vrot.lane.b32.xlu0 %v2661_v43, %s2937_s17 }
 0xd4e   : > { %1768 = vperm.xlu1 %2615, %v2318_v45   ;;  %1763 = vperm.xlu0 %2604, %v2317_v32  }
 0xd52   : > { %1758 = vperm.xlu1 %2615, %v2316_v33   ;;  %1753 = vperm.xlu0 %2604, %v2315_v47   ;;  %v2689_v33 = vld [vmem:[#allocation6 + $0x50] sm:$0xff]  }
 0xd53   : > { %2514 = vmatprep.mubr.msk.bf16.mxu1 %vm746_vm9, %v2689_v33 }
 0xd56   : > { %723 = vperm.xlu1 %2615, %v713_v48   ;;  %718 = vperm.xlu0 %2604, %v712_v49  }
 0xd5a   : > { %958 = vperm.xlu1 %2615, %v2236_v50   ;;  %953 = vperm.xlu0 %2604, %v2235_v51  }
 0xd5e   : > { %1186 = vperm.xlu1 %2615, %v2260_v52   ;;  %1181 = vperm.xlu0 %2604, %v2259_v53  }
 0xd62   : > { %1414 = vperm.xlu1 %2615, %v2284_v29   ;;  %1409 = vperm.xlu0 %2604, %v2283_v54  }
 0xd66   : > { %1642 = vperm.xlu1 %2615, %v2308_v55   ;;  %1637 = vperm.xlu0 %2604, %v2307_v56  }
 0xd6a   : > { %1870 = vperm.xlu1 %2615, %v2332_v57   ;;  %1865 = vperm.xlu0 %2604, %v2331_v58  }
 0xd6e   : > { %1962 = vperm.xlu1 %2615, %v1954_v59   ;;  %1957 = vperm.xlu0 %2604, %v1953_v36  }
 0xd72   : > { %2021 = vperm.xlu0 %2604, %v2018_v60  }
 0xdbc   : > { %v2658_v61 = vpop.permute.xlu0 %2657  ;;  %v2663_v1 = vpop.permute.xlu1 %2662 }
 0xdbd   : > { %v2660_v62 = vunpack.i.h.bf16 %v2658_v61  ;;  %v2659_v63 = vunpack.i.l.bf16 %v2658_v61  ;;  %v2665_v3 = vunpack.i.h.bf16 %v2663_v1  ;;  %v2664_v4 = vunpack.i.l.bf16 %v2663_v1  ;;  %v2690_v61 = vld [vmem:[#allocation6 + $0x58] sm:$0xff]  }
 0xdbf   : > { %v2322_v2 = vpack.c.bf16 %v2660_v62, %v2659_v63  ;;  %v2325_v5 = vpack.c.bf16 %v2665_v3, %v2664_v4 }
 0xdc1   : > { %2500 = vmatprep.subr.msk.bf16.mxu0 %vm3290_vm11, %v2322_v2 }
 0xdc2   : > { %2501 = vmatpush3.bf16.msk.msra.mxu0 %vm3290_vm11, %v2322_v2 }
 0xdc3   : > { %2502 = vmatprep.subr.bf16.mxu0 %v1739_v44 }
 0xdc6   : > { %2503 = vmatpush3.bf16.msra.mxu0 %v1739_v44 }
 0xdc7   : > { %2504 = vmatprep.subr.msk.bf16.mxu0 %vm3301_vm13, %v2325_v5 }
 0xdca   : > { %2505 = vmatpush3.bf16.msk.msra.mxu0 %vm3301_vm13, %v2325_v5 }
 0xdcb   : > { %2535 = vmatprep.subr.msk.bf16.mxu0 %vm638_vm8, %v3240_v38 }
 0xdcd   : > { %v1769_v6 = vpop.permute.xlu1 %1768  ;;  %v1764_v7 = vpop.permute.xlu0 %1763 }
 0xdce   : > { %2507 = vmatpush3.bf16.msra.mxu0 %v3250_v39 }
 0xdcf   : > { %2524 = vmatprep.subr.bf16.mxu0 %v2931_v0 }
 0xdd1   : > { %v1759_v31 = vpop.permute.xlu1 %1758  ;;  %v1754_v11 = vpop.permute.xlu0 %1753  ;;  %2509 = vmatmul.mubr.msk.bf16.vlgmr.msra.gmra.mrb[24].mxu0 %vm631_vm3, %v2688_v10 }
 0xdd2   : > { %2526 = vmatprep.mubr.msk.bf16.mxu0 %vm2932_vm0, %v2931_v0 }
 0xdd5   : > { %v724_v14 = vpop.permute.xlu1 %723  ;;  %v719_v37 = vpop.permute.xlu0 %718 }
 0xdd6   : > { %v791_v38 = vadd.f32 %v3259_v13, %v724_v14  ;;  %v788_v15 = vadd.f32 %v3256_v8, %v719_v37 }
 0xdd9   : > { %v959_v16 = vpop.permute.xlu1 %958  ;;  %v954_v21 = vpop.permute.xlu0 %953 }
 0xdda   : > { %v1025_v26 = vadd.f32 %v3318_v19, %v959_v16  ;;  %v1022_v39 = vadd.f32 %v3315_v9, %v954_v21  ;;  %v2691_v21 = vld [vmem:[#allocation7] sm:$0xff]  }
 0xddc   : > { %v1037_v17 = vadd.f32 %v1025_v26, %v791_v38  ;;  %v1036_v27 = vadd.f32 %v1022_v39, %v788_v15 }
 0xddd   : > { %v1187_v20 = vpop.permute.xlu1 %1186  ;;  %v1182_v34 = vpop.permute.xlu0 %1181 }
 0xdde   : > { %v1253_v23 = vadd.f32 %v3367_v22, %v1187_v20  ;;  %v1250_v35 = vadd.f32 %v3364_v12, %v1182_v34 }
 0xde0   : > { %v1265_v24 = vadd.f32 %v1253_v23, %v1037_v17  ;;  %v1264_v25 = vadd.f32 %v1250_v35, %v1036_v27 }
 0xde1   : > { %v1415_v41 = vpop.permute.xlu1 %1414  ;;  %v1410_v42 = vpop.permute.xlu0 %1409 }
 0xde2   : > { %v1481_v13 = vadd.f32 %v3416_v28, %v1415_v41  ;;  %v1478_v8 = vadd.f32 %v3413_v18, %v1410_v42 }
 0xde4   : > { %v1493_v43 = vadd.f32 %v1481_v13, %v1265_v24  ;;  %v1492_v19 = vadd.f32 %v1478_v8, %v1264_v25  ;;  %v2016_v24 = vld [vmem:[#allocation9] sm:$0x3] }
 0xde5   : > { %v1643_v44 = vpop.permute.xlu1 %1642  ;;  %v1638_v9 = vpop.permute.xlu0 %1637 }
 0xde6   : > { %v1709_v45 = vadd.f32 %v3465_v40, %v1643_v44  ;;  %v1706_v32 = vadd.f32 %v3462_v30, %v1638_v9 }
 0xde8   : > { %v1721_v46 = vadd.f32 %v1709_v45, %v1493_v43  ;;  %v1720_v22 = vadd.f32 %v1706_v32, %v1492_v19 }
 0xde9   : > { %v1866_v63 = vpop.permute.xlu0 %1865  ;;  %v1871_v4 = vpop.permute.xlu1 %1870 }
 0xded   : > { %v1963_v39 = vpop.permute.xlu1 %1962 }
 0xea4   : > { %v2510_v12 = vpop.f32.mrb[24].mxu0 }
 0xea5   : > { %v1830_v47 = vadd.f32 %v2510_v12, %v1764_v7  ;;  %v1821_v48 = vpop.f32.mrb[25].mxu0 }
 0xea6   : > { %v2511_v49 = vpop.f32.mrb[26].mxu0  ;;  %v1822_v52 = vadd.f32 %v1821_v48, %v1754_v11 }
 0xea7   : > { %v2329_v28 = vmul.f32 -1.442695, %v1830_v47  ;;  %v1833_v50 = vadd.f32 %v2511_v49, %v1769_v6  ;;  %v1824_v18 = vpop.f32.mrb[27].mxu0 }
 0xea8   : > { %v1825_v40 = vadd.f32 %v1824_v18, %v1759_v31 }
 0xea9   : > { %2752 = vpow2.f32 %v2329_v28  ;;  %v2330_v51 = vmul.f32 -1.442695, %v1833_v50 }
 0xeab   : > { %2754 = vpow2.f32 %v2330_v51 }
 0xeac   : > { %2756 = vtanh.f32 %v1822_v52 }
 0xeb3   : > { %v2753_v53 = vpop.eup %2752 }
 0xeb4   : > { %v1844_v29 = vadd.f32 1.0, %v2753_v53 }
 0xeb5   : > { %v2755_v30 = vpop.eup %2754 }
 0xeb6   : > { %2758 = vrcp.f32 %v1844_v29  ;;  %v1845_v54 = vadd.f32 1.0, %v2755_v30  ;;  %v2757_v55 = vpop.eup %2756 }
 0xeb7   : > { %2760 = vtanh.f32 %v1825_v40 }
 0xeb8   : > { %2762 = vrcp.f32 %v1845_v54 }
 0xec0   : > { %v2759_v56 = vpop.eup %2758 }
 0xec1   : > { %v2761_v57 = vpop.eup %2760  ;;  %v1850_v58 = vmul.f32 %v2759_v56, %v2757_v55 }
 0xec2   : > { %v2763_v59 = vpop.eup %2762 }
 0xec3   : > { %v1851_v36 = vmul.f32 %v2763_v59, %v2761_v57 }
 0xec5   : > { %v1857_v60 = vpack.c.bf16 %v1851_v36, %v1850_v58 }
 0xec7   : > { %2512 = vmatprep.subr.bf16.mxu1 %v1857_v60 }
 0xec8   : > { %2513 = vmatpush3.bf16.msra.mxu1 %v1857_v60 }
 0xec9   : > { %2518 = vmatprep.subr.bf16.mxu1 %v2931_v0 }
 0xecb   : > { %2515 = vmatmul.mubr.msk.bf16.vlgmr.msra.gmra.mrb[20].mxu1 %vm746_vm9, %v2690_v61 }
 0xecc   : > { %2520 = vmatprep.mubr.msk.bf16.mxu1 %vm2932_vm0, %v2931_v0  ;;  %v1958_v0 = vpop.permute.xlu0 %1957 }
 0xed0   : > { %v2022_v25 = vpop.permute.xlu0 %2021 }
 0xf9e   : > { %v2516_v62 = vpop.f32.mrb[20].mxu1 }
 0xf9f   : > { %v1931_v1 = vpop.f32.mrb[21].mxu1 }
 0xfa0   : > { %v1932_v2 = vadd.f32 %v1931_v1, %v1866_v63  ;;  %v2517_v3 = vpop.f32.mrb[22].mxu1 }
 0xfa1   : > { %v1934_v5 = vpop.f32.mrb[23].mxu1 }
 0xfa2   : > { %v1944_v6 = vadd.f32 %v1932_v2, %v1720_v22  ;;  %v1935_v7 = vadd.f32 %v1934_v5, %v1871_v4 }
 0xfa4   : > { %v1946_v10 = vmul.f32 0.4082483, %v1944_v6  ;;  %v1945_v31 = vadd.f32 %v1935_v7, %v1721_v46 }
 0xfa6   : > { %v1947_v11 = vmul.f32 0.4082483, %v1945_v31  ;;  %v1948_v14 = vmax.f32 %v1946_v10, 0.0 }
 0xfa8   : > { %v1949_v37 = vmax.f32 %v1947_v11, 0.0 }
 0xfaa   : > { %v1952_v16 = vpack.c.bf16 %v1949_v37, %v1948_v14 }
 0xfac   : > { %2519 = vmatpush3.bf16.msra.mxu1 %v1952_v16 }
 0xfaf   : > { %2521 = vmatmul.mubr.msk.bf16.vlgmr.msra.gmra.mrb[24].mxu1 %vm746_vm9, %v2691_v21 }
0x1082   : > { %v2007_v38 = vpop.f32.mrb[24].mxu1 }
0x1083   : > { %v2008_v15 = vadd.f32 %v2007_v38, %v1958_v0  ;;  %v2522_v26 = vpop.f32.mrb[25].mxu1 }
0x1084   : > { %v2010_v17 = vpop.f32.mrb[26].mxu1 }
0x1085   : > { %v2011_v27 = vadd.f32 %v2010_v17, %v1963_v39  ;;  %v2523_v20 = vpop.f32.mrb[27].mxu1  ;;  %v2014_v34 = vmax.f32 %v2008_v15, 0.0 }
0x1087   : > { %v2015_v23 = vmax.f32 %v2011_v27, 0.0 }
0x1089   : > { %v2017_v35 = vpack.c.bf16 %v2015_v23, %v2014_v34 }
0x108b   : > { %2525 = vmatpush3.bf16.msra.mxu0 %v2017_v35 }
0x108e   : > { %2527 = vmatmul.mubr.msk.bf16.vlgmr.msra.gmra.mrb[28].mxu0 %vm746_vm9, %v2016_v24 }
0x1161   : > { %v2061_v41 = vpop.f32.mrb[28].mxu0 }
0x1162   : > { %v2062_v42 = vadd.f32 %v2061_v41, %v2022_v25  ;;  %v2528_v13 = vpop.f32.mrb[29].mxu0 }
0x1163   : > { %v2064_v8 = vpop.f32.mrb[30].mxu0 }
0x1164   : > { %2067 = vst [vmem:[%s496_s19] sm:$0xf] %v2062_v42  ;;  %v2529_v43 = vpop.f32.mrb[31].mxu0 }
0x1165 PF: > { %s3605_s16 = sld [smem:[#allocation13_spill]] }
0x116b   : > { %s25_s21 = sadd.s32 1, %s3605_s16  }
0x116c   : > { %p22_p6 = scmp.ge.s32.totalorder %s25_s21, 4  }
0x116e   :  { %24 = sbr.rel (!%p22_p6) target bundleno = 5 (0x5), region = 142 }
0x1175   :  { %2087 = vsyncpa [#allocation3], 1 }
0x1176   :  { %2089 = vsyncpa [#allocation3 + $0x1], 1 }
0x1177   :  { %2090 = vsyncpa [#allocation5], 1 }
0x1178   :  { %2091 = vsyncpa [#allocation8], 1 }

// kernel: _lambda_.14
= control target key start
LH: loop header
LB: loop body
LE: loop exit
PB: predicated region body
PF: predicated region fallthrough
CT: control target
= control target key end

     0   :  { %s1107_s12 = smov 0   ;;  %s1567_s0 = inlined_call_operand.vmem [shape: f32[2,3,516], index: 0, kind: input, shape index: {}]   ;;  %s1568_s1 = inlined_call_operand.vmem [shape: f32[128,3], index: 1, kind: input, shape index: {}]   ;;  %s1569_s2 = inlined_call_operand.vmem [shape: f32[128,1], index: 2, kind: input, shape index: {}]   ;;  %s1570_s3 = inlined_call_operand.vmem [shape: f32[2,128,516], index: 3, kind: output, shape index: {}]  }
   0x1 LB: > { %s954_s13 = sadd.s32 4294967295, %s1083_s12   ;;  %p958_p0 = scmp.ge.s32.totalorder %s1083_s12, 1  ;;  %s1083_s12 = sphi %s1107_s12, %s13_s12  }
   0x2   : > { %p137_p1 = scmp.lt.s32.totalorder %s1083_s12, 3 }
   0x4   : > { %p138_p2 = pnand %p958_p0, %p137_p1 }
   0x5   : > { %p161_p3 = scmp.lt.s32.totalorder (!%p138_p2), %s954_s13, 1  ;;  %v1085_v0 = vmov (!%p138_p2), 0.0   ;;  %v1086_v1 = vmov (!%p138_p2), 0   ;;  %v190_v2 = vld [vmem:[%s1569_s2] sm:$0xff] (!%p138_p2)  ;;  %v192_v3 = vld [vmem:[%s1569_s2 + $0x10] sm:$0xff] (!%p138_p2)  ;;  %vm340_vm0 = vcmask (!%p138_p2), 1042432  }
   0x6   : > { %141 = sbr.rel (%p138_p2) target bundleno = 314 (0x13a), region = 32  ;;  %415 = vmatprep.mubr.f32.mxu0 (!%p138_p2), %v1085_v0  ;;  %487 = vmatprep.mubr.f32.mxu1 (!%p138_p2), %v1085_v0  ;;  %v1132_v7 = vld [vmem:[%s1568_s1] sm:$0xff] (!%p138_p2)  ;;  %vm291_vm1 = vcmask (!%p138_p2), 23552   ;;  %v1152_v11 = vld [vmem:[%s1568_s1 + $0x8] sm:$0xff] (!%p138_p2)  ;;  %v193_v14 = vld [vmem:[%s1569_s2 + $0x18] sm:$0xff] (!%p138_p2)  ;;  %vm822_vm2 = vcmask (!%p138_p2), 31744  }
   0x7   : > { %1073 = vset.pattern.permute.xlu0 (!%p138_p2), %v1086_v1  ;;  %1074 = vset.pattern.permute.xlu1 (!%p138_p2), %v1086_v1  ;;  %v1137_v8 = vld [vmem:[%s1568_s1 + $0x60] sm:$0xff] (!%p138_p2)  ;;  %v1157_v12 = vld [vmem:[%s1568_s1 + $0x68] sm:$0xff] (!%p138_p2)  ;;  %v1178_v15 = vld [vmem:[%s1568_s1 + $0x10] sm:$0xff] (!%p138_p2) }
   0x8   : > { %208 = vperm.xlu0 (!%p138_p2), %1073, %v190_v2   ;;  %218 = vperm.xlu1 (!%p138_p2), %1074, %v192_v3   ;;  %v191_v13 = vld [vmem:[%s1569_s2 + $0x8] sm:$0xff] (!%p138_p2)  ;;  %v1183_v16 = vld [vmem:[%s1568_s1 + $0x70] sm:$0xff] (!%p138_p2)  ;;  %v194_v17 = vld [vmem:[%s1569_s2 + $0x20] sm:$0xff] (!%p138_p2) }
   0x9   : > { %v195_v18 = vld [vmem:[%s1569_s2 + $0x28] sm:$0xff] (!%p138_p2)  ;;  %v1200_v19 = vld [vmem:[%s1568_s1 + $0x18] sm:$0xff] (!%p138_p2)  ;;  %v196_v21 = vld [vmem:[%s1569_s2 + $0x30] sm:$0xff] (!%p138_p2) }
   0xa   : > { %v1205_v20 = vld [vmem:[%s1568_s1 + $0x78] sm:$0xff] (!%p138_p2)  ;;  %v1222_v23 = vld [vmem:[%s1568_s1 + $0x20] sm:$0xff] (!%p138_p2)  ;;  %v199_v25 = vld [vmem:[%s1569_s2 + $0x48] sm:$0xff] (!%p138_p2) }
   0xb   : > { %v197_v22 = vld [vmem:[%s1569_s2 + $0x38] sm:$0xff] (!%p138_p2)  ;;  %v198_v24 = vld [vmem:[%s1569_s2 + $0x40] sm:$0xff] (!%p138_p2)  ;;  %v176_v26 = vld [vmem:[%s1568_s1 + $0x28] sm:$0xff] (!%p138_p2) }
   0xc   : > { %213 = vperm.xlu0 (!%p138_p2), %1073, %v191_v13   ;;  %223 = vperm.xlu1 (!%p138_p2), %1074, %v193_v14   ;;  %v200_v27 = vld [vmem:[%s1569_s2 + $0x50] sm:$0xff] (!%p138_p2)  ;;  %v201_v28 = vld [vmem:[%s1569_s2 + $0x58] sm:$0xff] (!%p138_p2)  ;;  %v202_v30 = vld [vmem:[%s1569_s2 + $0x60] sm:$0xff] (!%p138_p2) }
   0xd   : > { %s1572_s13 = smov (!%p161_p3, %s954_s13), 1  ;;  %v177_v29 = vld [vmem:[%s1568_s1 + $0x30] sm:$0xff]  ;;  %v203_v31 = vld [vmem:[%s1569_s2 + $0x68] sm:$0xff]  ;;  %v178_v32 = vld [vmem:[%s1568_s1 + $0x38] sm:$0xff] }
   0xe   : > { %s1061_s14 = smul.u32 20, %s1572_s13  ;;  %v204_v33 = vld [vmem:[%s1569_s2 + $0x70] sm:$0xff]  ;;  %v205_v34 = vld [vmem:[%s1569_s2 + $0x78] sm:$0xff]  ;;  %v179_v35 = vld [vmem:[%s1568_s1 + $0x40] sm:$0xff] }
   0xf   : > { %v180_v36 = vld [vmem:[%s1568_s1 + $0x48] sm:$0xff]  ;;  %v181_v37 = vld [vmem:[%s1568_s1 + $0x50] sm:$0xff]  ;;  %v182_v38 = vld [vmem:[%s1568_s1 + $0x58] sm:$0xff]  ;;  %s1062_s5 = smul.u32 640, %s1572_s13 }
  0x10   : > { %s165_s19 = scalar_lea.vmem %s1567_s0, %s1061_s14  ;;  %228 = vperm.xlu0 %1073, %v194_v17   ;;  %233 = vperm.xlu1 %1074, %v195_v18  }
  0x11   : > { %v187_v4 = vld [vmem:[%s165_s19] sm:$0x77]  ;;  %v188_v5 = vld [vmem:[%s165_s19 + $0x8] sm:$0x77]  ;;  %v189_v10 = vld [vmem:[%s165_s19 + $0x10] sm:$0x7]  ;;  %s1380_s8 = scalar_lea.vmem %s1570_s3, %s1062_s5 }
  0x12   : > { %v289_v6 = vcombine.high %v187_v4, %v187_v4  ;;  %v290_v9 = vcombine.high %v188_v5, %v188_v5 }
  0x14   : > { %961 = vmatprep.subr.msk.mxu0 %vm340_vm0, %v289_v6  ;;  %1059 = vmatprep.subr.msk.mxu1 %vm340_vm0, %v289_v6 }
  0x15   : > { %962 = vmatpush1.msk.msra.mxu0 %vm340_vm0, %v187_v4  ;;  %1060 = vmatpush1.msk.msra.mxu1 %vm340_vm0, %v187_v4 }
  0x16   : > { %963 = vmatmul.mubr.msk.f32.vlgmr.msra.gmra.mrb[0].mxu0 %vm291_vm1, %v1132_v7  ;;  %975 = vmatmul.mubr.msk.f32.vlgmr.msra.gmra.mrb[0].mxu1 %vm291_vm1, %v1137_v8 }
  0x17   : > { %979 = vmatprep.subr.msk.mxu1 %vm340_vm0, %v290_v9  ;;  %1033 = vmatprep.subr.msk.mxu0 %vm340_vm0, %v189_v10 }
  0x18   : > { %980 = vmatpush1.msk.msra.mxu1 %vm340_vm0, %v188_v5  ;;  %1034 = vmatpush3.msk.msra.mxu0 %vm340_vm0, %v189_v10 }
  0x19   : > { %421 = vmatprep.mubr.f32.mxu0 %v1085_v0  ;;  %493 = vmatprep.mubr.f32.mxu1 %v1085_v0 }
  0x1a   : > { %964 = vmatmul.mubr.msk.f32.gmra.mrb[2].mxu0 %vm291_vm1, %v1152_v11  ;;  %976 = vmatmul.mubr.msk.f32.gmra.mrb[2].mxu1 %vm291_vm1, %v1157_v12 }
  0x1b   : > { %427 = vmatprep.mubr.f32.mxu0 %v1085_v0  ;;  %499 = vmatprep.mubr.f32.mxu1 %v1085_v0 }
  0x1c   : > { %238 = vperm.xlu0 %1073, %v196_v21   ;;  %243 = vperm.xlu1 %1074, %v197_v22  }
  0x1e   : > { %965 = vmatmul.mubr.msk.f32.gmra.mrb[4].mxu0 %vm291_vm1, %v1178_v15  ;;  %977 = vmatmul.mubr.msk.f32.gmra.mrb[4].mxu1 %vm291_vm1, %v1183_v16 }
  0x1f   : > { %433 = vmatprep.mubr.f32.mxu0 %v1085_v0  ;;  %505 = vmatprep.mubr.f32.mxu1 %v1085_v0 }
  0x20   : > { %248 = vperm.xlu0 %1073, %v198_v24   ;;  %253 = vperm.xlu1 %1074, %v199_v25  }
  0x22   : > { %966 = vmatmul.mubr.msk.f32.gmra.mrb[6].mxu0 %vm291_vm1, %v1200_v19  ;;  %978 = vmatmul.mubr.msk.f32.gmra.mrb[6].mxu1 %vm291_vm1, %v1205_v20 }
  0x23   : > { %439 = vmatprep.mubr.f32.mxu0 %v1085_v0  ;;  %576 = vmatprep.mubr.f32.mxu1 %v1085_v0 }
  0x24   : > { %258 = vperm.xlu0 %1073, %v200_v27   ;;  %263 = vperm.xlu1 %1074, %v201_v28  }
  0x26   : > { %967 = vmatmul.mubr.msk.f32.gmra.mrb[8].mxu0 %vm291_vm1, %v1222_v23  ;;  %981 = vmatmul.mubr.msk.f32.vlgmr.msra.gmra.mrb[8].mxu1 %vm291_vm1, %v1132_v7 }
  0x27   : > { %445 = vmatprep.mubr.f32.mxu0 %v1085_v0  ;;  %582 = vmatprep.mubr.f32.mxu1 %v1085_v0 }
  0x28   : > { %268 = vperm.xlu0 %1073, %v202_v30   ;;  %273 = vperm.xlu1 %1074, %v203_v31  }
  0x2a   : > { %968 = vmatmul.mubr.msk.f32.gmra.mrb[10].mxu0 %vm291_vm1, %v176_v26  ;;  %982 = vmatmul.mubr.msk.f32.gmra.mrb[10].mxu1 %vm291_vm1, %v1152_v11 }
  0x2b   : > { %451 = vmatprep.mubr.f32.mxu0 %v1085_v0  ;;  %588 = vmatprep.mubr.f32.mxu1 %v1085_v0 }
  0x2c   : > { %278 = vperm.xlu0 %1073, %v204_v33   ;;  %283 = vperm.xlu1 %1074, %v205_v34  }
  0x2e   : > { %969 = vmatmul.mubr.msk.f32.gmra.mrb[12].mxu0 %vm291_vm1, %v177_v29  ;;  %983 = vmatmul.mubr.msk.f32.gmra.mrb[12].mxu1 %vm291_vm1, %v1178_v15 }
  0x2f   : > { %457 = vmatprep.mubr.f32.mxu0 %v1085_v0  ;;  %594 = vmatprep.mubr.f32.mxu1 %v1085_v0 }
  0x32   : > { %970 = vmatmul.mubr.msk.f32.gmra.mrb[14].mxu0 %vm291_vm1, %v178_v32  ;;  %984 = vmatmul.mubr.msk.f32.gmra.mrb[14].mxu1 %vm291_vm1, %v1200_v19 }
  0x33   : > { %463 = vmatprep.mubr.f32.mxu0 %v1085_v0  ;;  %600 = vmatprep.mubr.f32.mxu1 %v1085_v0 }
  0x36   : > { %971 = vmatmul.mubr.msk.f32.gmra.mrb[16].mxu0 %vm291_vm1, %v179_v35  ;;  %985 = vmatmul.mubr.msk.f32.gmra.mrb[16].mxu1 %vm291_vm1, %v1222_v23 }
  0x37   : > { %469 = vmatprep.mubr.f32.mxu0 %v1085_v0  ;;  %606 = vmatprep.mubr.f32.mxu1 %v1085_v0 }
  0x3a   : > { %972 = vmatmul.mubr.msk.f32.gmra.mrb[18].mxu0 %vm291_vm1, %v180_v36  ;;  %986 = vmatmul.mubr.msk.f32.gmra.mrb[18].mxu1 %vm291_vm1, %v176_v26 }
  0x3b   : > { %475 = vmatprep.mubr.f32.mxu0 %v1085_v0  ;;  %612 = vmatprep.mubr.f32.mxu1 %v1085_v0 }
  0x3e   : > { %973 = vmatmul.mubr.msk.f32.gmra.mrb[20].mxu0 %vm291_vm1, %v181_v37  ;;  %987 = vmatmul.mubr.msk.f32.gmra.mrb[20].mxu1 %vm291_vm1, %v177_v29 }
  0x3f   : > { %481 = vmatprep.mubr.f32.mxu0 %v1085_v0  ;;  %618 = vmatprep.mubr.f32.mxu1 %v1085_v0 }
  0x42   : > { %974 = vmatmul.mubr.msk.f32.gmra.mrb[22].mxu0 %vm291_vm1, %v182_v38  ;;  %988 = vmatmul.mubr.msk.f32.gmra.mrb[22].mxu1 %vm291_vm1, %v178_v32 }
  0x43   : > { %624 = vmatprep.mubr.f32.mxu1 %v1085_v0  ;;  %1035 = vmatprep.mubr.msk.f32.mxu0 %vm291_vm1, %v1132_v7 }
  0x46   : > { %989 = vmatmul.mubr.msk.f32.gmra.mrb[24].mxu1 %vm291_vm1, %v179_v35  ;;  %1036 = vmatmul.mubr.msk.f32.vlgmr.msra.gmra.mrb[24].mxu0 %vm291_vm1, %v1152_v11 }
  0x47   : > { %630 = vmatprep.mubr.f32.mxu1 %v1085_v0  ;;  %1038 = vmatprep.mubr.msk.f32.mxu0 %vm291_vm1, %v1178_v15 }
  0x4a   : > { %990 = vmatmul.mubr.msk.f32.gmra.mrb[26].mxu1 %vm291_vm1, %v180_v36  ;;  %1039 = vmatmul.mubr.msk.f32.gmra.mrb[26].mxu0 %vm291_vm1, %v1200_v19 }
  0x4b   : > { %636 = vmatprep.mubr.f32.mxu1 %v1085_v0  ;;  %1041 = vmatprep.mubr.msk.f32.mxu0 %vm291_vm1, %v1222_v23 }
  0x4e   : > { %991 = vmatmul.mubr.msk.f32.gmra.mrb[28].mxu1 %vm291_vm1, %v181_v37  ;;  %1042 = vmatmul.mubr.msk.f32.gmra.mrb[28].mxu0 %vm291_vm1, %v176_v26 }
  0x4f   : > { %642 = vmatprep.mubr.f32.mxu1 %v1085_v0  ;;  %1044 = vmatprep.mubr.msk.f32.mxu0 %vm291_vm1, %v177_v29 }
  0x52   : > { %992 = vmatmul.mubr.msk.f32.gmra.mrb[30].mxu1 %vm291_vm1, %v182_v38  ;;  %1045 = vmatmul.mubr.msk.f32.gmra.mrb[30].mxu0 %vm291_vm1, %v178_v32 }
  0x53   : > { %648 = vmatprep.mubr.f32.mxu1 %v1085_v0  ;;  %1047 = vmatprep.mubr.msk.f32.mxu0 %vm291_vm1, %v179_v35 }
  0x56   : > { %993 = vmatmul.mubr.msk.f32.gmra.mrb[32].mxu1 %vm291_vm1, %v1137_v8  ;;  %1048 = vmatmul.mubr.msk.f32.gmra.mrb[32].mxu0 %vm291_vm1, %v180_v36 }
  0x57   : > { %654 = vmatprep.mubr.f32.mxu1 %v1085_v0  ;;  %1050 = vmatprep.mubr.msk.f32.mxu0 %vm291_vm1, %v181_v37 }
  0x5a   : > { %994 = vmatmul.mubr.msk.f32.gmra.mrb[34].mxu1 %vm291_vm1, %v1157_v12  ;;  %1051 = vmatmul.mubr.msk.f32.gmra.mrb[34].mxu0 %vm291_vm1, %v182_v38 }
  0x5b   : > { %660 = vmatprep.mubr.f32.mxu1 %v1085_v0  ;;  %1053 = vmatprep.mubr.msk.f32.mxu0 %vm291_vm1, %v1137_v8 }
  0x5e   : > { %995 = vmatmul.mubr.msk.f32.gmra.mrb[36].mxu1 %vm291_vm1, %v1183_v16  ;;  %1054 = vmatmul.mubr.msk.f32.gmra.mrb[36].mxu0 %vm291_vm1, %v1157_v12 }
  0x5f   : > { %666 = vmatprep.mubr.f32.mxu1 %v1085_v0  ;;  %1056 = vmatprep.mubr.msk.f32.mxu0 %vm291_vm1, %v1183_v16 }
  0x62   : > { %996 = vmatmul.mubr.msk.f32.gmra.mrb[38].mxu1 %vm291_vm1, %v1205_v20  ;;  %1057 = vmatmul.mubr.msk.f32.gmra.mrb[38].mxu0 %vm291_vm1, %v1205_v20 }
  0x87   : > { %v1350_v39 = vpop.permute.xlu0 %208  ;;  %v1352_v40 = vpop.permute.xlu1 %218 }
  0x8b   : > { %v1354_v41 = vpop.permute.xlu0 %213  ;;  %v1356_v42 = vpop.permute.xlu1 %223 }
  0x8f   : > { %v1358_v43 = vpop.permute.xlu0 %228  ;;  %v1360_v44 = vpop.permute.xlu1 %233 }
  0x9b   : > { %v1362_v45 = vpop.permute.xlu0 %238  ;;  %v1364_v46 = vpop.permute.xlu1 %243 }
  0x9f   : > { %v1366_v47 = vpop.permute.xlu0 %248  ;;  %v1368_v48 = vpop.permute.xlu1 %253 }
  0xa3   : > { %v1370_v49 = vpop.permute.xlu0 %258  ;;  %v1373_v50 = vpop.permute.xlu1 %263 }
  0xa7   : > { %v1375_v51 = vpop.permute.xlu0 %268  ;;  %v1386_v60 = vpop.permute.xlu1 %273 }
  0xab   : > { %v1396_v5 = vpop.permute.xlu0 %278  ;;  %v1406_v14 = vpop.permute.xlu1 %283 }
  0xe9   : > { %v417_v52 = vpop.f32.mrb[0].mxu0  ;;  %v489_v53 = vpop.f32.mrb[0].mxu1 }
  0xea   : > { %v418_v54 = vadd.f32 %v417_v52, %v1350_v39  ;;  %v490_v55 = vadd.f32 %v489_v53, %v1375_v51  ;;  %v419_v56 = vpop.f32.mrb[1].mxu0  ;;  %v491_v57 = vpop.f32.mrb[1].mxu1 }
  0xeb   : > { %v420_v58 = vadd.f32 %v419_v56, %v1350_v39  ;;  %v492_v59 = vadd.f32 %v491_v57, %v1375_v51 }
  0xec   : > { %818 = vst [vmem:[%s1380_s8] sm:$0xff] %v418_v54  ;;  %879 = vst [vmem:[%s1380_s8 + $0x1e0] sm:$0xff] %v490_v55 }
  0xed   : > { %819 = vst [vmem:[%s1380_s8 + $0x8] sm:$0xff] %v420_v58  ;;  %880 = vst [vmem:[%s1380_s8 + $0x1e8] sm:$0xff] %v492_v59  ;;  %v423_v61 = vpop.f32.mrb[2].mxu0  ;;  %v495_v62 = vpop.f32.mrb[2].mxu1 }
  0xee   : > { %v424_v63 = vadd.f32 %v423_v61, %v1354_v41  ;;  %v496_v0 = vadd.f32 %v495_v62, %v1386_v60  ;;  %v425_v1 = vpop.f32.mrb[3].mxu0  ;;  %v497_v2 = vpop.f32.mrb[3].mxu1 }
  0xef   : > { %v426_v3 = vadd.f32 %v425_v1, %v1354_v41  ;;  %v498_v4 = vadd.f32 %v497_v2, %v1386_v60 }
  0xf0   : > { %824 = vst [vmem:[%s1380_s8 + $0x28] sm:$0xff] %v424_v63  ;;  %884 = vst [vmem:[%s1380_s8 + $0x208] sm:$0xff] %v496_v0 }
  0xf1   : > { %825 = vst [vmem:[%s1380_s8 + $0x30] sm:$0xff] %v426_v3  ;;  %885 = vst [vmem:[%s1380_s8 + $0x210] sm:$0xff] %v498_v4  ;;  %v429_v6 = vpop.f32.mrb[4].mxu0  ;;  %v501_v7 = vpop.f32.mrb[4].mxu1 }
  0xf2   : > { %v430_v8 = vadd.f32 %v429_v6, %v1352_v40  ;;  %v502_v9 = vadd.f32 %v501_v7, %v1396_v5  ;;  %v431_v10 = vpop.f32.mrb[5].mxu0  ;;  %v503_v11 = vpop.f32.mrb[5].mxu1 }
  0xf3   : > { %v432_v12 = vadd.f32 %v431_v10, %v1352_v40  ;;  %v504_v13 = vadd.f32 %v503_v11, %v1396_v5 }
  0xf4   : > { %829 = vst [vmem:[%s1380_s8 + $0x50] sm:$0xff] %v430_v8  ;;  %889 = vst [vmem:[%s1380_s8 + $0x230] sm:$0xff] %v502_v9 }
  0xf5   : > { %830 = vst [vmem:[%s1380_s8 + $0x58] sm:$0xff] %v432_v12  ;;  %890 = vst [vmem:[%s1380_s8 + $0x238] sm:$0xff] %v504_v13  ;;  %v435_v15 = vpop.f32.mrb[6].mxu0  ;;  %v507_v16 = vpop.f32.mrb[6].mxu1 }
  0xf6   : > { %v436_v17 = vadd.f32 %v435_v15, %v1356_v42  ;;  %v508_v18 = vadd.f32 %v507_v16, %v1406_v14  ;;  %v437_v19 = vpop.f32.mrb[7].mxu0  ;;  %v509_v20 = vpop.f32.mrb[7].mxu1 }
  0xf7   : > { %v438_v21 = vadd.f32 %v437_v19, %v1356_v42  ;;  %v510_v22 = vadd.f32 %v509_v20, %v1406_v14 }
  0xf8   : > { %834 = vst [vmem:[%s1380_s8 + $0x78] sm:$0xff] %v436_v17  ;;  %894 = vst [vmem:[%s1380_s8 + $0x258] sm:$0xff] %v508_v18 }
  0xf9   : > { %835 = vst [vmem:[%s1380_s8 + $0x80] sm:$0xff] %v438_v21  ;;  %895 = vst [vmem:[%s1380_s8 + $0x260] sm:$0xff] %v510_v22  ;;  %v441_v23 = vpop.f32.mrb[8].mxu0  ;;  %v578_v24 = vpop.f32.mrb[8].mxu1 }
  0xfa   : > { %v442_v25 = vadd.f32 %v441_v23, %v1358_v43  ;;  %v579_v26 = vadd.f32 %v578_v24, %v1350_v39  ;;  %v443_v27 = vpop.f32.mrb[9].mxu0  ;;  %v580_v28 = vpop.f32.mrb[9].mxu1 }
  0xfb   : > { %v444_v29 = vadd.f32 %v443_v27, %v1358_v43  ;;  %v581_v30 = vadd.f32 %v580_v28, %v1350_v39 }
  0xfc   : > { %839 = vst [vmem:[%s1380_s8 + $0xa0] sm:$0xff] %v442_v25  ;;  %820 = vst [vmem:[%s1380_s8 + $0x10] sm:$0xff] %v579_v26 }
  0xfd   : > { %840 = vst [vmem:[%s1380_s8 + $0xa8] sm:$0xff] %v444_v29  ;;  %821 = vst [vmem:[%s1380_s8 + $0x18] sm:$0xff] %v581_v30  ;;  %v447_v31 = vpop.f32.mrb[10].mxu0  ;;  %v584_v32 = vpop.f32.mrb[10].mxu1 }
  0xfe   : > { %v448_v33 = vadd.f32 %v447_v31, %v1360_v44  ;;  %v585_v34 = vadd.f32 %v584_v32, %v1354_v41  ;;  %v449_v35 = vpop.f32.mrb[11].mxu0  ;;  %v586_v36 = vpop.f32.mrb[11].mxu1 }
  0xff   : > { %v450_v37 = vadd.f32 %v449_v35, %v1360_v44  ;;  %v587_v38 = vadd.f32 %v586_v36, %v1354_v41 }
 0x100   : > { %844 = vst [vmem:[%s1380_s8 + $0xc8] sm:$0xff] %v448_v33  ;;  %826 = vst [vmem:[%s1380_s8 + $0x38] sm:$0xff] %v585_v34 }
 0x101   : > { %845 = vst [vmem:[%s1380_s8 + $0xd0] sm:$0xff] %v450_v37  ;;  %827 = vst [vmem:[%s1380_s8 + $0x40] sm:$0xff] %v587_v38  ;;  %v453_v52 = vpop.f32.mrb[12].mxu0  ;;  %v590_v53 = vpop.f32.mrb[12].mxu1 }
 0x102   : > { %v454_v54 = vadd.f32 %v453_v52, %v1362_v45  ;;  %v591_v55 = vadd.f32 %v590_v53, %v1352_v40  ;;  %v455_v56 = vpop.f32.mrb[13].mxu0  ;;  %v592_v57 = vpop.f32.mrb[13].mxu1 }
 0x103   : > { %v456_v58 = vadd.f32 %v455_v56, %v1362_v45  ;;  %v593_v59 = vadd.f32 %v592_v57, %v1352_v40 }
 0x104   : > { %849 = vst [vmem:[%s1380_s8 + $0xf0] sm:$0xff] %v454_v54  ;;  %831 = vst [vmem:[%s1380_s8 + $0x60] sm:$0xff] %v591_v55 }
 0x105   : > { %850 = vst [vmem:[%s1380_s8 + $0xf8] sm:$0xff] %v456_v58  ;;  %832 = vst [vmem:[%s1380_s8 + $0x68] sm:$0xff] %v593_v59  ;;  %v459_v61 = vpop.f32.mrb[14].mxu0  ;;  %v596_v62 = vpop.f32.mrb[14].mxu1 }
 0x106   : > { %v460_v63 = vadd.f32 %v459_v61, %v1364_v46  ;;  %v597_v0 = vadd.f32 %v596_v62, %v1356_v42  ;;  %v461_v1 = vpop.f32.mrb[15].mxu0  ;;  %v598_v2 = vpop.f32.mrb[15].mxu1 }
 0x107   : > { %v462_v3 = vadd.f32 %v461_v1, %v1364_v46  ;;  %v599_v4 = vadd.f32 %v598_v2, %v1356_v42 }
 0x108   : > { %854 = vst [vmem:[%s1380_s8 + $0x118] sm:$0xff] %v460_v63  ;;  %836 = vst [vmem:[%s1380_s8 + $0x88] sm:$0xff] %v597_v0 }
 0x109   : > { %855 = vst [vmem:[%s1380_s8 + $0x120] sm:$0xff] %v462_v3  ;;  %837 = vst [vmem:[%s1380_s8 + $0x90] sm:$0xff] %v599_v4  ;;  %v465_v6 = vpop.f32.mrb[16].mxu0  ;;  %v602_v7 = vpop.f32.mrb[16].mxu1 }
 0x10a   : > { %v466_v8 = vadd.f32 %v465_v6, %v1366_v47  ;;  %v603_v9 = vadd.f32 %v602_v7, %v1358_v43  ;;  %v467_v10 = vpop.f32.mrb[17].mxu0  ;;  %v604_v11 = vpop.f32.mrb[17].mxu1 }
 0x10b   : > { %v468_v12 = vadd.f32 %v467_v10, %v1366_v47  ;;  %v605_v13 = vadd.f32 %v604_v11, %v1358_v43 }
 0x10c   : > { %859 = vst [vmem:[%s1380_s8 + $0x140] sm:$0xff] %v466_v8  ;;  %841 = vst [vmem:[%s1380_s8 + $0xb0] sm:$0xff] %v603_v9 }
 0x10d   : > { %860 = vst [vmem:[%s1380_s8 + $0x148] sm:$0xff] %v468_v12  ;;  %842 = vst [vmem:[%s1380_s8 + $0xb8] sm:$0xff] %v605_v13  ;;  %v471_v15 = vpop.f32.mrb[18].mxu0  ;;  %v608_v16 = vpop.f32.mrb[18].mxu1 }
 0x10e   : > { %v472_v17 = vadd.f32 %v471_v15, %v1368_v48  ;;  %v609_v18 = vadd.f32 %v608_v16, %v1360_v44  ;;  %v473_v19 = vpop.f32.mrb[19].mxu0  ;;  %v610_v20 = vpop.f32.mrb[19].mxu1 }
 0x10f   : > { %v474_v21 = vadd.f32 %v473_v19, %v1368_v48  ;;  %v611_v22 = vadd.f32 %v610_v20, %v1360_v44 }
 0x110   : > { %864 = vst [vmem:[%s1380_s8 + $0x168] sm:$0xff] %v472_v17  ;;  %846 = vst [vmem:[%s1380_s8 + $0xd8] sm:$0xff] %v609_v18 }
 0x111   : > { %865 = vst [vmem:[%s1380_s8 + $0x170] sm:$0xff] %v474_v21  ;;  %847 = vst [vmem:[%s1380_s8 + $0xe0] sm:$0xff] %v611_v22  ;;  %v477_v23 = vpop.f32.mrb[20].mxu0  ;;  %v614_v24 = vpop.f32.mrb[20].mxu1 }
 0x112   : > { %v478_v25 = vadd.f32 %v477_v23, %v1370_v49  ;;  %v615_v26 = vadd.f32 %v614_v24, %v1362_v45  ;;  %v479_v27 = vpop.f32.mrb[21].mxu0  ;;  %v616_v28 = vpop.f32.mrb[21].mxu1 }
 0x113   : > { %v480_v29 = vadd.f32 %v479_v27, %v1370_v49  ;;  %v617_v30 = vadd.f32 %v616_v28, %v1362_v45 }
 0x114   : > { %869 = vst [vmem:[%s1380_s8 + $0x190] sm:$0xff] %v478_v25  ;;  %851 = vst [vmem:[%s1380_s8 + $0x100] sm:$0xff] %v615_v26 }
 0x115   : > { %870 = vst [vmem:[%s1380_s8 + $0x198] sm:$0xff] %v480_v29  ;;  %852 = vst [vmem:[%s1380_s8 + $0x108] sm:$0xff] %v617_v30  ;;  %v483_v31 = vpop.f32.mrb[22].mxu0  ;;  %v620_v32 = vpop.f32.mrb[22].mxu1 }
 0x116   : > { %v484_v33 = vadd.f32 %v483_v31, %v1373_v50  ;;  %v621_v34 = vadd.f32 %v620_v32, %v1364_v46  ;;  %v485_v35 = vpop.f32.mrb[23].mxu0  ;;  %v622_v36 = vpop.f32.mrb[23].mxu1 }
 0x117   : > { %v486_v37 = vadd.f32 %v485_v35, %v1373_v50  ;;  %v623_v38 = vadd.f32 %v622_v36, %v1364_v46 }
 0x118   : > { %874 = vst [vmem:[%s1380_s8 + $0x1b8] sm:$0xff] %v484_v33  ;;  %856 = vst [vmem:[%s1380_s8 + $0x128] sm:$0xff] %v621_v34 }
 0x119   : > { %875 = vst [vmem:[%s1380_s8 + $0x1c0] sm:$0xff] %v486_v37  ;;  %857 = vst [vmem:[%s1380_s8 + $0x130] sm:$0xff] %v623_v38  ;;  %v626_v52 = vpop.f32.mrb[24].mxu1  ;;  %v1037_v53 = vpop.f32.mrb[24].mxu0 }
 0x11a   : > { %v627_v54 = vadd.f32 %v626_v52, %v1366_v47  ;;  %v745_v55 = vadd.f32 %v1037_v53, %v1354_v41  ;;  %v628_v56 = vpop.f32.mrb[25].mxu1  ;;  %v739_v57 = vpop.f32.mrb[25].mxu0 }
 0x11b   : > { %v629_v58 = vadd.f32 %v628_v56, %v1366_v47  ;;  %v740_v59 = vadd.f32 %v739_v57, %v1350_v39 }
 0x11c   : > { %861 = vst [vmem:[%s1380_s8 + $0x150] sm:$0xff] %v627_v54  ;;  %828 = vst.msk [vmem:[%s1380_s8 + $0x48] sm:$0xff] %vm822_vm2, %v745_v55 }
 0x11d   : > { %862 = vst [vmem:[%s1380_s8 + $0x158] sm:$0xff] %v629_v58  ;;  %823 = vst.msk [vmem:[%s1380_s8 + $0x20] sm:$0xff] %vm822_vm2, %v740_v59  ;;  %v632_v61 = vpop.f32.mrb[26].mxu1  ;;  %v1040_v62 = vpop.f32.mrb[26].mxu0 }
 0x11e   : > { %v633_v41 = vadd.f32 %v632_v61, %v1368_v48  ;;  %v755_v63 = vadd.f32 %v1040_v62, %v1356_v42  ;;  %v634_v0 = vpop.f32.mrb[27].mxu1  ;;  %v749_v1 = vpop.f32.mrb[27].mxu0 }
 0x11f   : > { %v635_v2 = vadd.f32 %v634_v0, %v1368_v48  ;;  %v750_v39 = vadd.f32 %v749_v1, %v1352_v40 }
 0x120   : > { %866 = vst [vmem:[%s1380_s8 + $0x178] sm:$0xff] %v633_v41  ;;  %838 = vst.msk [vmem:[%s1380_s8 + $0x98] sm:$0xff] %vm822_vm2, %v755_v63 }
 0x121   : > { %867 = vst [vmem:[%s1380_s8 + $0x180] sm:$0xff] %v635_v2  ;;  %833 = vst.msk [vmem:[%s1380_s8 + $0x70] sm:$0xff] %vm822_vm2, %v750_v39  ;;  %v638_v3 = vpop.f32.mrb[28].mxu1  ;;  %v1043_v4 = vpop.f32.mrb[28].mxu0 }
 0x122   : > { %v639_v42 = vadd.f32 %v638_v3, %v1370_v49  ;;  %v765_v6 = vadd.f32 %v1043_v4, %v1360_v44  ;;  %v640_v7 = vpop.f32.mrb[29].mxu1  ;;  %v759_v8 = vpop.f32.mrb[29].mxu0 }
 0x123   : > { %v641_v9 = vadd.f32 %v640_v7, %v1370_v49  ;;  %v760_v40 = vadd.f32 %v759_v8, %v1358_v43 }
 0x124   : > { %871 = vst [vmem:[%s1380_s8 + $0x1a0] sm:$0xff] %v639_v42  ;;  %848 = vst.msk [vmem:[%s1380_s8 + $0xe8] sm:$0xff] %vm822_vm2, %v765_v6 }
 0x125   : > { %872 = vst [vmem:[%s1380_s8 + $0x1a8] sm:$0xff] %v641_v9  ;;  %843 = vst.msk [vmem:[%s1380_s8 + $0xc0] sm:$0xff] %vm822_vm2, %v760_v40  ;;  %v644_v10 = vpop.f32.mrb[30].mxu1  ;;  %v1046_v11 = vpop.f32.mrb[30].mxu0 }
 0x126   : > { %v645_v44 = vadd.f32 %v644_v10, %v1373_v50  ;;  %v775_v12 = vadd.f32 %v1046_v11, %v1364_v46  ;;  %v646_v13 = vpop.f32.mrb[31].mxu1  ;;  %v769_v15 = vpop.f32.mrb[31].mxu0 }
 0x127   : > { %v647_v16 = vadd.f32 %v646_v13, %v1373_v50  ;;  %v770_v43 = vadd.f32 %v769_v15, %v1362_v45 }
 0x128   : > { %876 = vst [vmem:[%s1380_s8 + $0x1c8] sm:$0xff] %v645_v44  ;;  %858 = vst.msk [vmem:[%s1380_s8 + $0x138] sm:$0xff] %vm822_vm2, %v775_v12 }
 0x129   : > { %877 = vst [vmem:[%s1380_s8 + $0x1d0] sm:$0xff] %v647_v16  ;;  %853 = vst.msk [vmem:[%s1380_s8 + $0x110] sm:$0xff] %vm822_vm2, %v770_v43  ;;  %v650_v17 = vpop.f32.mrb[32].mxu1  ;;  %v1049_v18 = vpop.f32.mrb[32].mxu0 }
 0x12a   : > { %v651_v46 = vadd.f32 %v650_v17, %v1375_v51  ;;  %v785_v19 = vadd.f32 %v1049_v18, %v1368_v48  ;;  %v652_v20 = vpop.f32.mrb[33].mxu1  ;;  %v779_v21 = vpop.f32.mrb[33].mxu0 }
 0x12b   : > { %v653_v22 = vadd.f32 %v652_v20, %v1375_v51  ;;  %v780_v45 = vadd.f32 %v779_v21, %v1366_v47 }
 0x12c   : > { %881 = vst [vmem:[%s1380_s8 + $0x1f0] sm:$0xff] %v651_v46  ;;  %868 = vst.msk [vmem:[%s1380_s8 + $0x188] sm:$0xff] %vm822_vm2, %v785_v19 }
 0x12d   : > { %882 = vst [vmem:[%s1380_s8 + $0x1f8] sm:$0xff] %v653_v22  ;;  %863 = vst.msk [vmem:[%s1380_s8 + $0x160] sm:$0xff] %vm822_vm2, %v780_v45  ;;  %v656_v23 = vpop.f32.mrb[34].mxu1  ;;  %v1052_v24 = vpop.f32.mrb[34].mxu0 }
 0x12e   : > { %v657_v48 = vadd.f32 %v656_v23, %v1386_v60  ;;  %v795_v25 = vadd.f32 %v1052_v24, %v1373_v50  ;;  %v658_v26 = vpop.f32.mrb[35].mxu1  ;;  %v789_v27 = vpop.f32.mrb[35].mxu0 }
 0x12f   : > { %v659_v28 = vadd.f32 %v658_v26, %v1386_v60  ;;  %v790_v47 = vadd.f32 %v789_v27, %v1370_v49 }
 0x130   : > { %886 = vst [vmem:[%s1380_s8 + $0x218] sm:$0xff] %v657_v48  ;;  %878 = vst.msk [vmem:[%s1380_s8 + $0x1d8] sm:$0xff] %vm822_vm2, %v795_v25 }
 0x131   : > { %887 = vst [vmem:[%s1380_s8 + $0x220] sm:$0xff] %v659_v28  ;;  %873 = vst.msk [vmem:[%s1380_s8 + $0x1b0] sm:$0xff] %vm822_vm2, %v790_v47  ;;  %v662_v29 = vpop.f32.mrb[36].mxu1  ;;  %v1055_v30 = vpop.f32.mrb[36].mxu0 }
 0x132   : > { %v663_v50 = vadd.f32 %v662_v29, %v1396_v5  ;;  %v805_v31 = vadd.f32 %v1055_v30, %v1386_v60  ;;  %v664_v32 = vpop.f32.mrb[37].mxu1  ;;  %v799_v33 = vpop.f32.mrb[37].mxu0 }
 0x133   : > { %v665_v34 = vadd.f32 %v664_v32, %v1396_v5  ;;  %v800_v49 = vadd.f32 %v799_v33, %v1375_v51 }
 0x134   : > { %891 = vst [vmem:[%s1380_s8 + $0x240] sm:$0xff] %v663_v50  ;;  %888 = vst.msk [vmem:[%s1380_s8 + $0x228] sm:$0xff] %vm822_vm2, %v805_v31 }
 0x135   : > { %892 = vst [vmem:[%s1380_s8 + $0x248] sm:$0xff] %v665_v34  ;;  %883 = vst.msk [vmem:[%s1380_s8 + $0x200] sm:$0xff] %vm822_vm2, %v800_v49  ;;  %v668_v35 = vpop.f32.mrb[38].mxu1  ;;  %v1058_v36 = vpop.f32.mrb[38].mxu0 }
 0x136   : > { %v669_v60 = vadd.f32 %v668_v35, %v1406_v14  ;;  %v815_v37 = vadd.f32 %v1058_v36, %v1406_v14  ;;  %v670_v38 = vpop.f32.mrb[39].mxu1  ;;  %v809_v52 = vpop.f32.mrb[39].mxu0 }
 0x137   : > { %v671_v53 = vadd.f32 %v670_v38, %v1406_v14  ;;  %v810_v54 = vadd.f32 %v809_v52, %v1396_v5 }
 0x138   : > { %896 = vst [vmem:[%s1380_s8 + $0x268] sm:$0xff] %v669_v60  ;;  %898 = vst.msk [vmem:[%s1380_s8 + $0x278] sm:$0xff] %vm822_vm2, %v815_v37 }
 0x139   : > { %897 = vst [vmem:[%s1380_s8 + $0x270] sm:$0xff] %v671_v53  ;;  %893 = vst.msk [vmem:[%s1380_s8 + $0x250] sm:$0xff] %vm822_vm2, %v810_v54 }
 0x13a PF: > { %s13_s12 = sadd.s32 1, %s1083_s12  }
 0x13b   : > { %p10_p4 = scmp.ge.s32.totalorder %s13_s12, 4  }
 0x13d   :  { %12 = sbr.rel (!%p10_p4) target bundleno = 1 (0x1), region = 62 }

// kernel: _lambda_.15
= control target key start
LH: loop header
LB: loop body
LE: loop exit
PB: predicated region body
PF: predicated region fallthrough
CT: control target
= control target key end

     0   :  { %s1866_s0 = inlined_call_operand.vmem [shape: f32[2,384,520], index: 0, kind: input, shape index: {}]   ;;  %s1867_s1 = inlined_call_operand.vmem [shape: f32[1,384], index: 1, kind: input, shape index: {}]   ;;  %s1868_s2 = inlined_call_operand.<no memory space> [shape: f32[1,1], index: 2, kind: input, shape index: {}]   ;;  %s1869_s3 = inlined_call_operand.hbm [shape: f32[2,1,520], index: 3, kind: output, shape index: {}]  }
   0x1   :  { %v8_v0 = vstv %s1868_s2 }
   0x2   :  { %9 = vst [vmem:[#allocation2] sm:$0x1] %v8_v0 }
   0x3   :  { %10 = vsyncpa [#allocation4], 0 }
   0x4   :  { %12 = vsyncpa [#allocation4 + $0x1], 0  ;;  %s1478_s14 = smov 0   ;;  %s1480_s15 = smov 0  }
   0x5   :  { %s1482_s16 = smov 0   ;;  %s1484_s17 = smov 0  }
   0x6 LB: > { %s1499_s2 = sadd.s32 4294967295, %s1447_s17   ;;  %s986_s18 = sadd.s32 4294967294, %s1447_s17   ;;  %s1447_s17 = sphi %s1484_s17, %s1875_s17   ;;  %s1443_s16 = sphi %s1482_s16, %s1874_s16   ;;  %s1439_s15 = sphi %s1480_s15, %s1873_s15   ;;  %s1435_s14 = sphi %s1478_s14, %s1872_s14  }
   0x7   : > { %s1503_s19 = sadd.s32 1, %s1447_s17   ;;  %s93_s20 = sadd.s32 1, %s1443_s16 }
   0x8   : > { %s90_s21 = ssub.s32 %s1447_s17, %s1503_s19  ;;  %p103_p0 = scmp.ne.s32.totalorder %s1443_s16, %s1439_s15 }
   0x9   : > { %p91_p1 = scmp.eq.s32.totalorder %s90_s21, 0  ;;  %p104_p2 = scmp.eq.s32.totalorder %s1499_s2, 1 }
   0xa   : > { %p109_p3 = scmp.ne.s32.totalorder %s1439_s15, %s1435_s14  ;;  %p110_p4 = scmp.eq.s32.totalorder %s986_s18, 1 }
   0xb   : > { %s1514_s22 = scalar_select %p91_p1, %s1443_s16, %s93_s20  }
   0xc   : > { %p1516_p5 = por %p104_p2, %p103_p0  ;;  %p1520_p6 = por %p110_p4, %p109_p3 }
   0xd   : > { %p989_p7 = scmp.ge.s32.totalorder %s1447_s17, 1  ;;  %p142_p8 = scmp.lt.s32.totalorder %s1447_s17, 3 }
   0xf   : > { %p143_p9 = pnand %p989_p7, %p142_p8 }
  0x10   : > { %p166_p10 = scmp.lt.s32.totalorder (!%p143_p9), %s1499_s2, 1  ;;  %v418_v1 = vlaneseq (!%p143_p9)  ;;  %v1534_v3 = vld [vmem:[%s1867_s1] sm:$0x7] (!%p143_p9)  ;;  %v1449_v31 = vmov (!%p143_p9), 0   ;;  %vm1452_vm0 = vmmov (!%p143_p9), 0   ;;  %s163_s5 = sand.u32 (!%p143_p9), 1, %s1439_s15  }
  0x11   : > { %146 = sbr.rel (%p143_p9) target bundleno = 400 (0x190), region = 32  ;;  %1384 = vset.pattern.permute.xlu0 (!%p143_p9), %v1449_v31  ;;  %s913_s13 = scalar_lea.sflag (!%p143_p9), [#allocation4], %s163_s5 }
  0x12   : > { %v1529_v2 = vshrl.u32 (!%p143_p9), %v418_v1, 7  ;;  %s1337_s6 = smul.u32 (!%p143_p9), 5, %s163_s5  ;;  %vm909_vm1 = vcmp.lt.s32.totalorder (!%p143_p9), %v418_v1, 520  ;;  %s1454_s18 = smov (!%p143_p9), [#allocation3]  }
  0x13   : > { %s1339_s7 = smul.u32 (!%p143_p9), 80, %s1499_s2  ;;  %s1389_s20 = sshll.u32 (!%p143_p9), %s1454_s18, 4  ;;  %s1390_s20 = int_to_ptr.vmem [resolvable:$false] %s1389_s20 }
  0x14   : > { %v429_v4 = vsub.s32 (!%p143_p9), 1, %v1529_v2  ;;  %s165_s8 = scalar_lea.vmem (!%p143_p9), [#allocation3], %s1337_s6  ;;  %s1391_s21 = scalar_lea.vmem (!%p143_p9), %s1390_s20, 160 }
  0x15   : > { %s927_s9 = sshll.u32 (!%p143_p9), %s165_s8, 4  ;;  %s1824_s12 = scalar_lea.hbm (!%p143_p9), %s1869_s3, %s1339_s7  ;;  %s1826_s9 = int_to_ptr.vmem [resolvable:$true] %s927_s9 }
  0x16   : > { %v1543_v5 = vrot.slane (!%p143_p9), %v1534_v3, %v429_v4  ;;  %p1392_p0 = scmp.lt.s32.totalorder (!%p143_p9), %s1826_s9, %s1390_s20 }
  0x18   : > { %s167_s25 = scalar_select %p166_p10, %s1499_s2, 1  ;;  %502 = vmatprep.mubr.f32.mxu0 %v1543_v5  ;;  %644 = vmatprep.mubr.f32.mxu1 %v1543_v5 }
  0x19   : > { %s1385_s2 = scalar_lea.vmem %s1826_s9, 80 }
  0x1a   : > { %s1338_s28 = smul.u32 1920, %s167_s25  ;;  %p1386_p11 = scmp.ne.s32.totalorder %s1826_s9, %s1385_s2 }
  0x1b   : > { %p1393_p1 = scmp.lt.s32.totalorder %s1391_s21, %s1385_s2 }
  0x1c   : > { %s1540_s4 = scalar_lea.vmem %s1866_s0, %s1338_s28  ;;  %p1387_p12 = pnand %p1386_p11, %p1516_p5 }
  0x1d   : > { %v173_v6 = vld [vmem:[%s1540_s4 + $0x8] sm:$0xff]  ;;  %v178_v7 = vld [vmem:[%s1540_s4 + $0x30] sm:$0xff]  ;;  %v175_v8 = vld [vmem:[%s1540_s4 + $0x18] sm:$0xff]  ;;  %p1394_p2 = por %p1393_p1, %p1392_p0 }
  0x1e   : > { %v1081_v9 = vpack.c.bf16 %v178_v7, %v173_v6  ;;  %v180_v10 = vld [vmem:[%s1540_s4 + $0x40] sm:$0xff]  ;;  %v177_v12 = vld [vmem:[%s1540_s4 + $0x28] sm:$0xff]  ;;  %v174_v15 = vld [vmem:[%s1540_s4 + $0x10] sm:$0xff]  ;;  %p1388_p13 = pneg %p1387_p12 }
  0x1f   : > { %v172_v11 = vld [vmem:[%s1540_s4] sm:$0xff]  ;;  %v1177_v13 = vpack.c.bf16 %v180_v10, %v175_v8  ;;  %v179_v16 = vld [vmem:[%s1540_s4 + $0x38] sm:$0xff]  ;;  %v185_v20 = vld [vmem:[%s1540_s4 + $0x68] sm:$0xff] }
  0x20   : > { %v1083_v14 = vpack.c.bf16 %v177_v12, %v172_v11  ;;  %v183_v17 = vld [vmem:[%s1540_s4 + $0x58] sm:$0xff]  ;;  %1082 = vmatprep.subr.bf16.mxu0 %v1081_v9  ;;  %v1179_v18 = vpack.c.bf16 %v179_v16, %v174_v15  ;;  %v188_v19 = vld [vmem:[%s1540_s4 + $0x80] sm:$0xff]  ;;  %v190_v21 = vld [vmem:[%s1540_s4 + $0x90] sm:$0xff]  ;;  %p1395_p3 = pnand %p1394_p2, %p1388_p13 }
  0x21   : > { %1178 = vmatprep.subr.bf16.mxu1 %v1177_v13  ;;  %v1085_v22 = vpack.c.bf16 %v188_v19, %v183_v17  ;;  %v1181_v23 = vpack.c.bf16 %v190_v21, %v185_v20  ;;  %v182_v24 = vld [vmem:[%s1540_s4 + $0x50] sm:$0xff]  ;;  %v187_v25 = vld [vmem:[%s1540_s4 + $0x78] sm:$0xff]  ;;  %v184_v26 = vld [vmem:[%s1540_s4 + $0x60] sm:$0xff] }
  0x22   : > { %1084 = vmatpush1.bf16.msra.mxu0 %v1083_v14  ;;  %1180 = vmatpush1.bf16.msra.mxu1 %v1179_v18  ;;  %v1087_v27 = vpack.c.bf16 %v187_v25, %v182_v24  ;;  %v189_v28 = vld [vmem:[%s1540_s4 + $0x88] sm:$0xff]  ;;  %v198_v30 = vld [vmem:[%s1540_s4 + $0xd0] sm:$0xff]  ;;  %v195_v34 = vld [vmem:[%s1540_s4 + $0xb8] sm:$0xff] }
  0x23   : > { %v193_v29 = vld [vmem:[%s1540_s4 + $0xa8] sm:$0xff]  ;;  %1086 = vmatprep.subr.bf16.mxu0 %v1085_v22  ;;  %1182 = vmatprep.subr.bf16.mxu1 %v1181_v23  ;;  %v1183_v32 = vpack.c.bf16 %v189_v28, %v184_v26  ;;  %v200_v35 = vld [vmem:[%s1540_s4 + $0xe0] sm:$0xff]  ;;  %v194_v39 = vld [vmem:[%s1540_s4 + $0xb0] sm:$0xff] }
  0x24   : > { %v1089_v33 = vpack.c.bf16 %v198_v30, %v193_v29  ;;  %v192_v36 = vld [vmem:[%s1540_s4 + $0xa0] sm:$0xff]  ;;  %v1185_v37 = vpack.c.bf16 %v200_v35, %v195_v34  ;;  %v197_v38 = vld [vmem:[%s1540_s4 + $0xc8] sm:$0xff]  ;;  %v199_v40 = vld [vmem:[%s1540_s4 + $0xd8] sm:$0xff] }
  0x25   : > { %v1091_v41 = vpack.c.bf16 %v197_v38, %v192_v36  ;;  %v203_v42 = vld [vmem:[%s1540_s4 + $0xf8] sm:$0xff]  ;;  %v208_v43 = vld [vmem:[%s1540_s4 + $0x120] sm:$0xff]  ;;  %v205_v44 = vld [vmem:[%s1540_s4 + $0x108] sm:$0xff]  ;;  %v1187_v45 = vpack.c.bf16 %v199_v40, %v194_v39 }
  0x26   : > { %1088 = vmatpush1.bf16.msra.mxu0 %v1087_v27  ;;  %1184 = vmatpush1.bf16.msra.mxu1 %v1183_v32  ;;  %v1093_v46 = vpack.c.bf16 %v208_v43, %v203_v42  ;;  %v210_v47 = vld [vmem:[%s1540_s4 + $0x130] sm:$0xff]  ;;  %v207_v49 = vld [vmem:[%s1540_s4 + $0x118] sm:$0xff]  ;;  %v204_v51 = vld [vmem:[%s1540_s4 + $0x100] sm:$0xff] }
  0x27   : > { %1090 = vmatprep.subr.bf16.mxu0 %v1089_v33  ;;  %v202_v48 = vld [vmem:[%s1540_s4 + $0xf0] sm:$0xff]  ;;  %1186 = vmatprep.subr.bf16.mxu1 %v1185_v37  ;;  %v1189_v50 = vpack.c.bf16 %v210_v47, %v205_v44  ;;  %v209_v52 = vld [vmem:[%s1540_s4 + $0x128] sm:$0xff]  ;;  %v215_v55 = vld [vmem:[%s1540_s4 + $0x158] sm:$0xff] }
  0x28   : > { %v213_v53 = vld [vmem:[%s1540_s4 + $0x148] sm:$0xff]  ;;  %v218_v54 = vld [vmem:[%s1540_s4 + $0x170] sm:$0xff]  ;;  %v220_v56 = vld [vmem:[%s1540_s4 + $0x180] sm:$0xff]  ;;  %v1095_v57 = vpack.c.bf16 %v207_v49, %v202_v48  ;;  %v1191_v58 = vpack.c.bf16 %v209_v52, %v204_v51 }
  0x29   : > { %v1097_v59 = vpack.c.bf16 %v218_v54, %v213_v53  ;;  %v212_v60 = vld [vmem:[%s1540_s4 + $0x140] sm:$0xff]  ;;  %v217_v61 = vld [vmem:[%s1540_s4 + $0x168] sm:$0xff]  ;;  %v214_v62 = vld [vmem:[%s1540_s4 + $0x150] sm:$0xff]  ;;  %v1193_v63 = vpack.c.bf16 %v220_v56, %v215_v55 }
  0x2a   : > { %1092 = vmatpush1.bf16.msra.mxu0 %v1091_v41  ;;  %1188 = vmatpush1.bf16.msra.mxu1 %v1187_v45  ;;  %v219_v0 = vld [vmem:[%s1540_s4 + $0x178] sm:$0xff]  ;;  %v228_v6 = vld [vmem:[%s1540_s4 + $0x1c0] sm:$0xff]  ;;  %v225_v7 = vld [vmem:[%s1540_s4 + $0x1a8] sm:$0xff]  ;;  %v1099_v9 = vpack.c.bf16 %v217_v61, %v212_v60 }
  0x2b   : > { %1094 = vmatprep.subr.bf16.mxu0 %v1093_v46  ;;  %1190 = vmatprep.subr.bf16.mxu1 %v1189_v50  ;;  %v223_v4 = vld [vmem:[%s1540_s4 + $0x198] sm:$0xff]  ;;  %v230_v8 = vld [vmem:[%s1540_s4 + $0x1d0] sm:$0xff]  ;;  %v1195_v10 = vpack.c.bf16 %v219_v0, %v214_v62  ;;  %v224_v14 = vld [vmem:[%s1540_s4 + $0x1a0] sm:$0xff] }
  0x2c   : > { %v1101_v11 = vpack.c.bf16 %v228_v6, %v223_v4  ;;  %v222_v12 = vld [vmem:[%s1540_s4 + $0x190] sm:$0xff]  ;;  %v227_v13 = vld [vmem:[%s1540_s4 + $0x1b8] sm:$0xff]  ;;  %v1197_v15 = vpack.c.bf16 %v230_v8, %v225_v7  ;;  %v229_v16 = vld [vmem:[%s1540_s4 + $0x1c8] sm:$0xff] }
  0x2d   : > { %v233_v17 = vld [vmem:[%s1540_s4 + $0x1e8] sm:$0xff]  ;;  %v238_v18 = vld [vmem:[%s1540_s4 + $0x210] sm:$0xff]  ;;  %v235_v19 = vld [vmem:[%s1540_s4 + $0x1f8] sm:$0xff]  ;;  %v1103_v21 = vpack.c.bf16 %v227_v13, %v222_v12  ;;  %v1199_v22 = vpack.c.bf16 %v229_v16, %v224_v14 }
  0x2e   : > { %1096 = vmatpush1.bf16.msra.mxu0 %v1095_v57  ;;  %1192 = vmatpush1.bf16.msra.mxu1 %v1191_v58  ;;  %v240_v20 = vld [vmem:[%s1540_s4 + $0x220] sm:$0xff]  ;;  %v1105_v23 = vpack.c.bf16 %v238_v18, %v233_v17  ;;  %v237_v25 = vld [vmem:[%s1540_s4 + $0x208] sm:$0xff]  ;;  %v234_v26 = vld [vmem:[%s1540_s4 + $0x1f0] sm:$0xff] }
  0x2f   : > { %1098 = vmatprep.subr.bf16.mxu0 %v1097_v59  ;;  %1194 = vmatprep.subr.bf16.mxu1 %v1193_v63  ;;  %v232_v24 = vld [vmem:[%s1540_s4 + $0x1e0] sm:$0xff]  ;;  %v1201_v27 = vpack.c.bf16 %v240_v20, %v235_v19  ;;  %v239_v28 = vld [vmem:[%s1540_s4 + $0x218] sm:$0xff]  ;;  %v245_v31 = vld [vmem:[%s1540_s4 + $0x248] sm:$0xff] }
  0x30   : > { %v243_v29 = vld [vmem:[%s1540_s4 + $0x238] sm:$0xff]  ;;  %v248_v30 = vld [vmem:[%s1540_s4 + $0x260] sm:$0xff]  ;;  %v250_v32 = vld [vmem:[%s1540_s4 + $0x270] sm:$0xff]  ;;  %v1107_v33 = vpack.c.bf16 %v237_v25, %v232_v24  ;;  %v1203_v34 = vpack.c.bf16 %v239_v28, %v234_v26 }
  0x31   : > { %v1109_v35 = vpack.c.bf16 %v248_v30, %v243_v29  ;;  %v242_v36 = vld [vmem:[%s1540_s4 + $0x230] sm:$0xff]  ;;  %v247_v37 = vld [vmem:[%s1540_s4 + $0x258] sm:$0xff]  ;;  %v244_v38 = vld [vmem:[%s1540_s4 + $0x240] sm:$0xff]  ;;  %v1205_v39 = vpack.c.bf16 %v250_v32, %v245_v31 }
  0x32   : > { %1100 = vmatpush1.bf16.msra.mxu0 %v1099_v9  ;;  %1196 = vmatpush1.bf16.msra.mxu1 %v1195_v10  ;;  %v249_v40 = vld [vmem:[%s1540_s4 + $0x268] sm:$0xff]  ;;  %v258_v42 = vld [vmem:[%s1540_s4 + $0x2b0] sm:$0xff]  ;;  %v255_v43 = vld [vmem:[%s1540_s4 + $0x298] sm:$0xff]  ;;  %v1111_v45 = vpack.c.bf16 %v247_v37, %v242_v36 }
  0x33   : > { %1102 = vmatprep.subr.bf16.mxu0 %v1101_v11  ;;  %1198 = vmatprep.subr.bf16.mxu1 %v1197_v15  ;;  %v253_v41 = vld [vmem:[%s1540_s4 + $0x288] sm:$0xff]  ;;  %v260_v44 = vld [vmem:[%s1540_s4 + $0x2c0] sm:$0xff]  ;;  %v1207_v46 = vpack.c.bf16 %v249_v40, %v244_v38  ;;  %v254_v50 = vld [vmem:[%s1540_s4 + $0x290] sm:$0xff] }
  0x34   : > { %v1113_v47 = vpack.c.bf16 %v258_v42, %v253_v41  ;;  %v252_v48 = vld [vmem:[%s1540_s4 + $0x280] sm:$0xff]  ;;  %v257_v49 = vld [vmem:[%s1540_s4 + $0x2a8] sm:$0xff]  ;;  %v1209_v51 = vpack.c.bf16 %v260_v44, %v255_v43  ;;  %v259_v52 = vld [vmem:[%s1540_s4 + $0x2b8] sm:$0xff] }
  0x35   : > { %v263_v53 = vld [vmem:[%s1540_s4 + $0x2d8] sm:$0xff]  ;;  %v268_v54 = vld [vmem:[%s1540_s4 + $0x300] sm:$0xff]  ;;  %v265_v55 = vld [vmem:[%s1540_s4 + $0x2e8] sm:$0xff]  ;;  %v1115_v57 = vpack.c.bf16 %v257_v49, %v252_v48  ;;  %v1211_v58 = vpack.c.bf16 %v259_v52, %v254_v50 }
  0x36   : > { %1104 = vmatpush1.bf16.msra.mxu0 %v1103_v21  ;;  %1200 = vmatpush1.bf16.msra.mxu1 %v1199_v22  ;;  %v270_v56 = vld [vmem:[%s1540_s4 + $0x310] sm:$0xff]  ;;  %v1117_v59 = vpack.c.bf16 %v268_v54, %v263_v53  ;;  %v267_v61 = vld [vmem:[%s1540_s4 + $0x2f8] sm:$0xff]  ;;  %v264_v62 = vld [vmem:[%s1540_s4 + $0x2e0] sm:$0xff] }
  0x37   : > { %1106 = vmatprep.subr.bf16.mxu0 %v1105_v23  ;;  %1202 = vmatprep.subr.bf16.mxu1 %v1201_v27  ;;  %v262_v60 = vld [vmem:[%s1540_s4 + $0x2d0] sm:$0xff]  ;;  %v1213_v63 = vpack.c.bf16 %v270_v56, %v265_v55  ;;  %v269_v0 = vld [vmem:[%s1540_s4 + $0x308] sm:$0xff]  ;;  %v275_v7 = vld [vmem:[%s1540_s4 + $0x338] sm:$0xff] }
  0x38   : > { %v273_v4 = vld [vmem:[%s1540_s4 + $0x328] sm:$0xff]  ;;  %v278_v6 = vld [vmem:[%s1540_s4 + $0x350] sm:$0xff]  ;;  %v280_v8 = vld [vmem:[%s1540_s4 + $0x360] sm:$0xff]  ;;  %v1119_v9 = vpack.c.bf16 %v267_v61, %v262_v60  ;;  %v1215_v10 = vpack.c.bf16 %v269_v0, %v264_v62 }
  0x39   : > { %v1121_v11 = vpack.c.bf16 %v278_v6, %v273_v4  ;;  %v272_v12 = vld [vmem:[%s1540_s4 + $0x320] sm:$0xff]  ;;  %v277_v13 = vld [vmem:[%s1540_s4 + $0x348] sm:$0xff]  ;;  %v274_v14 = vld [vmem:[%s1540_s4 + $0x330] sm:$0xff]  ;;  %v1217_v15 = vpack.c.bf16 %v280_v8, %v275_v7 }
  0x3a   : > { %1108 = vmatpush1.bf16.msra.mxu0 %v1107_v33  ;;  %1204 = vmatpush1.bf16.msra.mxu1 %v1203_v34  ;;  %v279_v16 = vld [vmem:[%s1540_s4 + $0x358] sm:$0xff]  ;;  %v288_v18 = vld [vmem:[%s1540_s4 + $0x3a0] sm:$0xff]  ;;  %v285_v19 = vld [vmem:[%s1540_s4 + $0x388] sm:$0xff]  ;;  %v1123_v21 = vpack.c.bf16 %v277_v13, %v272_v12 }
  0x3b   : > { %1110 = vmatprep.subr.bf16.mxu0 %v1109_v35  ;;  %1206 = vmatprep.subr.bf16.mxu1 %v1205_v39  ;;  %v283_v17 = vld [vmem:[%s1540_s4 + $0x378] sm:$0xff]  ;;  %v290_v20 = vld [vmem:[%s1540_s4 + $0x3b0] sm:$0xff]  ;;  %v1219_v22 = vpack.c.bf16 %v279_v16, %v274_v14  ;;  %v284_v26 = vld [vmem:[%s1540_s4 + $0x380] sm:$0xff] }
  0x3c   : > { %v1125_v23 = vpack.c.bf16 %v288_v18, %v283_v17  ;;  %v282_v24 = vld [vmem:[%s1540_s4 + $0x370] sm:$0xff]  ;;  %v287_v25 = vld [vmem:[%s1540_s4 + $0x398] sm:$0xff]  ;;  %v1221_v27 = vpack.c.bf16 %v290_v20, %v285_v19  ;;  %v289_v28 = vld [vmem:[%s1540_s4 + $0x3a8] sm:$0xff] }
  0x3d   : > { %v293_v29 = vld [vmem:[%s1540_s4 + $0x3c8] sm:$0xff]  ;;  %v298_v30 = vld [vmem:[%s1540_s4 + $0x3f0] sm:$0xff]  ;;  %v295_v31 = vld [vmem:[%s1540_s4 + $0x3d8] sm:$0xff]  ;;  %v1127_v33 = vpack.c.bf16 %v287_v25, %v282_v24  ;;  %v1223_v34 = vpack.c.bf16 %v289_v28, %v284_v26 }
  0x3e   : > { %1112 = vmatpush1.bf16.msra.mxu0 %v1111_v45  ;;  %1208 = vmatpush1.bf16.msra.mxu1 %v1207_v46  ;;  %v300_v32 = vld [vmem:[%s1540_s4 + $0x400] sm:$0xff]  ;;  %v1129_v35 = vpack.c.bf16 %v298_v30, %v293_v29  ;;  %v297_v37 = vld [vmem:[%s1540_s4 + $0x3e8] sm:$0xff]  ;;  %v294_v38 = vld [vmem:[%s1540_s4 + $0x3d0] sm:$0xff] }
  0x3f   : > { %1114 = vmatprep.subr.bf16.mxu0 %v1113_v47  ;;  %1210 = vmatprep.subr.bf16.mxu1 %v1209_v51  ;;  %v292_v36 = vld [vmem:[%s1540_s4 + $0x3c0] sm:$0xff]  ;;  %v1225_v39 = vpack.c.bf16 %v300_v32, %v295_v31  ;;  %v299_v40 = vld [vmem:[%s1540_s4 + $0x3f8] sm:$0xff]  ;;  %v305_v43 = vld [vmem:[%s1540_s4 + $0x428] sm:$0xff] }
  0x40   : > { %v303_v41 = vld [vmem:[%s1540_s4 + $0x418] sm:$0xff]  ;;  %v308_v42 = vld [vmem:[%s1540_s4 + $0x440] sm:$0xff]  ;;  %v310_v44 = vld [vmem:[%s1540_s4 + $0x450] sm:$0xff]  ;;  %v1131_v45 = vpack.c.bf16 %v297_v37, %v292_v36  ;;  %v1227_v46 = vpack.c.bf16 %v299_v40, %v294_v38 }
  0x41   : > { %v1133_v47 = vpack.c.bf16 %v308_v42, %v303_v41  ;;  %v302_v48 = vld [vmem:[%s1540_s4 + $0x410] sm:$0xff]  ;;  %v307_v49 = vld [vmem:[%s1540_s4 + $0x438] sm:$0xff]  ;;  %v304_v50 = vld [vmem:[%s1540_s4 + $0x420] sm:$0xff]  ;;  %v1229_v51 = vpack.c.bf16 %v310_v44, %v305_v43 }
  0x42   : > { %1116 = vmatpush1.bf16.msra.mxu0 %v1115_v57  ;;  %1212 = vmatpush1.bf16.msra.mxu1 %v1211_v58  ;;  %v309_v52 = vld [vmem:[%s1540_s4 + $0x448] sm:$0xff]  ;;  %v318_v54 = vld [vmem:[%s1540_s4 + $0x490] sm:$0xff]  ;;  %v315_v55 = vld [vmem:[%s1540_s4 + $0x478] sm:$0xff]  ;;  %v1135_v57 = vpack.c.bf16 %v307_v49, %v302_v48 }
  0x43   : > { %1118 = vmatprep.subr.bf16.mxu0 %v1117_v59  ;;  %1214 = vmatprep.subr.bf16.mxu1 %v1213_v63  ;;  %v313_v53 = vld [vmem:[%s1540_s4 + $0x468] sm:$0xff]  ;;  %v320_v56 = vld [vmem:[%s1540_s4 + $0x4a0] sm:$0xff]  ;;  %v1231_v58 = vpack.c.bf16 %v309_v52, %v304_v50  ;;  %v314_v62 = vld [vmem:[%s1540_s4 + $0x470] sm:$0xff] }
  0x44   : > { %v1137_v59 = vpack.c.bf16 %v318_v54, %v313_v53  ;;  %v312_v60 = vld [vmem:[%s1540_s4 + $0x460] sm:$0xff]  ;;  %v317_v61 = vld [vmem:[%s1540_s4 + $0x488] sm:$0xff]  ;;  %v1233_v63 = vpack.c.bf16 %v320_v56, %v315_v55  ;;  %v319_v0 = vld [vmem:[%s1540_s4 + $0x498] sm:$0xff] }
  0x45   : > { %v323_v4 = vld [vmem:[%s1540_s4 + $0x4b8] sm:$0xff]  ;;  %v328_v6 = vld [vmem:[%s1540_s4 + $0x4e0] sm:$0xff]  ;;  %v325_v7 = vld [vmem:[%s1540_s4 + $0x4c8] sm:$0xff] }
  0x46   : > { %1120 = vmatpush1.bf16.msra.mxu0 %v1119_v9  ;;  %1216 = vmatpush1.bf16.msra.mxu1 %v1215_v10  ;;  %v330_v8 = vld [vmem:[%s1540_s4 + $0x4f0] sm:$0xff]  ;;  %v1139_v9 = vpack.c.bf16 %v317_v61, %v312_v60  ;;  %v1235_v10 = vpack.c.bf16 %v319_v0, %v314_v62  ;;  %v327_v13 = vld [vmem:[%s1540_s4 + $0x4d8] sm:$0xff]  ;;  %v324_v14 = vld [vmem:[%s1540_s4 + $0x4c0] sm:$0xff] }
  0x47   : > { %1122 = vmatprep.subr.bf16.mxu0 %v1121_v11  ;;  %1218 = vmatprep.subr.bf16.mxu1 %v1217_v15  ;;  %v1141_v11 = vpack.c.bf16 %v328_v6, %v323_v4  ;;  %v322_v12 = vld [vmem:[%s1540_s4 + $0x4b0] sm:$0xff]  ;;  %v1237_v15 = vpack.c.bf16 %v330_v8, %v325_v7  ;;  %v329_v16 = vld [vmem:[%s1540_s4 + $0x4e8] sm:$0xff]  ;;  %v335_v19 = vld [vmem:[%s1540_s4 + $0x518] sm:$0xff] }
  0x48   : > { %v333_v17 = vld [vmem:[%s1540_s4 + $0x508] sm:$0xff]  ;;  %v338_v18 = vld [vmem:[%s1540_s4 + $0x530] sm:$0xff]  ;;  %v340_v20 = vld [vmem:[%s1540_s4 + $0x540] sm:$0xff] }
  0x49   : > { %v1145_v24 = vpack.c.bf16 %v338_v18, %v333_v17  ;;  %v332_v25 = vld [vmem:[%s1540_s4 + $0x500] sm:$0xff]  ;;  %v337_v26 = vld [vmem:[%s1540_s4 + $0x528] sm:$0xff]  ;;  %v1241_v28 = vpack.c.bf16 %v340_v20, %v335_v19  ;;  %v339_v29 = vld [vmem:[%s1540_s4 + $0x538] sm:$0xff] }
  0x4a   : > { %1124 = vmatpush1.bf16.msra.mxu0 %v1123_v21  ;;  %1220 = vmatpush1.bf16.msra.mxu1 %v1219_v22  ;;  %v420_v21 = vsub.s32 0, %v1529_v2  ;;  %v1143_v22 = vpack.c.bf16 %v327_v13, %v322_v12  ;;  %v343_v30 = vld [vmem:[%s1540_s4 + $0x558] sm:$0xff]  ;;  %v348_v31 = vld [vmem:[%s1540_s4 + $0x580] sm:$0xff]  ;;  %v342_v38 = vld [vmem:[%s1540_s4 + $0x550] sm:$0xff] }
  0x4b   : > { %1126 = vmatprep.subr.bf16.mxu0 %v1125_v23  ;;  %1222 = vmatprep.subr.bf16.mxu1 %v1221_v27  ;;  %v1239_v23 = vpack.c.bf16 %v329_v16, %v324_v14  ;;  %v334_v27 = vld [vmem:[%s1540_s4 + $0x510] sm:$0xff]  ;;  %v1149_v37 = vpack.c.bf16 %v348_v31, %v343_v30  ;;  %v344_v40 = vld [vmem:[%s1540_s4 + $0x560] sm:$0xff]  ;;  %v349_v42 = vld [vmem:[%s1540_s4 + $0x588] sm:$0xff] }
  0x4c   : > { %v1689_v32 = vrot.slane %v1534_v3, %v420_v21  ;;  %v1243_v36 = vpack.c.bf16 %v339_v29, %v334_v27  ;;  %v353_v43 = vld [vmem:[%s1540_s4 + $0x5a8] sm:$0xff]  ;;  %v358_v44 = vld [vmem:[%s1540_s4 + $0x5d0] sm:$0xff]  ;;  %v1247_v48 = vpack.c.bf16 %v349_v42, %v344_v40  ;;  %v352_v50 = vld [vmem:[%s1540_s4 + $0x5a0] sm:$0xff] }
  0x4d   : > { %v1153_v49 = vpack.c.bf16 %v358_v44, %v353_v43  ;;  %v354_v52 = vld [vmem:[%s1540_s4 + $0x5b0] sm:$0xff]  ;;  %v359_v54 = vld [vmem:[%s1540_s4 + $0x5d8] sm:$0xff]  ;;  %v368_v56 = vld [vmem:[%s1540_s4 + $0x620] sm:$0xff] }
  0x4e   : > { %1128 = vmatpush1.bf16.msra.mxu0 %v1127_v33  ;;  %1224 = vmatpush1.bf16.msra.mxu1 %v1223_v34  ;;  %v345_v33 = vld [vmem:[%s1540_s4 + $0x568] sm:$0xff]  ;;  %v350_v34 = vld [vmem:[%s1540_s4 + $0x590] sm:$0xff]  ;;  %v363_v55 = vld [vmem:[%s1540_s4 + $0x5f8] sm:$0xff]  ;;  %v1251_v61 = vpack.c.bf16 %v359_v54, %v354_v52 }
  0x4f   : > { %1130 = vmatprep.subr.bf16.mxu0 %v1129_v35  ;;  %1226 = vmatprep.subr.bf16.mxu1 %v1225_v39  ;;  %v1147_v35 = vpack.c.bf16 %v337_v26, %v332_v25  ;;  %v347_v39 = vld [vmem:[%s1540_s4 + $0x578] sm:$0xff]  ;;  %v1245_v41 = vpack.c.bf16 %v350_v34, %v345_v33  ;;  %v1157_v62 = vpack.c.bf16 %v368_v56, %v363_v55  ;;  %v364_v4 = vld [vmem:[%s1540_s4 + $0x600] sm:$0xff]  ;;  %v369_v7 = vld [vmem:[%s1540_s4 + $0x628] sm:$0xff] }
  0x50   : > { %v367_v0 = vld [vmem:[%s1540_s4 + $0x618] sm:$0xff]  ;;  %v373_v8 = vld [vmem:[%s1540_s4 + $0x648] sm:$0xff]  ;;  %v1255_v13 = vpack.c.bf16 %v369_v7, %v364_v4  ;;  %v374_v17 = vld [vmem:[%s1540_s4 + $0x650] sm:$0xff] }
  0x51   : > { %v377_v16 = vld [vmem:[%s1540_s4 + $0x668] sm:$0xff]  ;;  %v379_v19 = vld [vmem:[%s1540_s4 + $0x678] sm:$0xff]  ;;  %v412_v26 = vld [vmem:[#allocation2] sm:$0x1] }
  0x52   : > { %1132 = vmatpush1.bf16.msra.mxu0 %v1131_v45  ;;  %1228 = vmatpush1.bf16.msra.mxu1 %v1227_v46  ;;  %v355_v45 = vld [vmem:[%s1540_s4 + $0x5b8] sm:$0xff]  ;;  %v360_v46 = vld [vmem:[%s1540_s4 + $0x5e0] sm:$0xff]  ;;  %v1259_v27 = vpack.c.bf16 %v379_v19, %v374_v17  ;;  %v382_v29 = vld [vmem:[%s1540_s4 + $0x690] sm:$0xff]  ;;  %v1451_v19 = vmov 0.0|0.0  }
  0x53   : > { %1134 = vmatprep.subr.bf16.mxu0 %v1133_v47  ;;  %1230 = vmatprep.subr.bf16.mxu1 %v1229_v51  ;;  %v1151_v47 = vpack.c.bf16 %v347_v39, %v342_v38  ;;  %v357_v51 = vld [vmem:[%s1540_s4 + $0x5c8] sm:$0xff]  ;;  %v1249_v53 = vpack.c.bf16 %v360_v46, %v355_v45  ;;  %v383_v20 = vld [vmem:[%s1540_s4 + $0x698] sm:$0xff]  ;;  %v384_v31 = vld [vmem:[%s1540_s4 + $0x6a0] sm:$0xff] }
  0x54   : > { %v1155_v60 = vpack.c.bf16 %v357_v51, %v352_v50  ;;  %v387_v30 = vld [vmem:[%s1540_s4 + $0x6b8] sm:$0xff]  ;;  %v389_v34 = vld [vmem:[%s1540_s4 + $0x6c8] sm:$0xff]  ;;  %415 = vperm.xlu0 %1384, %v412_v26   ;;  %v400_v38 = vld [vmem:[%s1540_s4 + $0x720] sm:$0xff] }
  0x55   : > { %v1167_v39 = vpack.c.bf16 %v387_v30, %v382_v29  ;;  %v1263_v40 = vpack.c.bf16 %v389_v34, %v384_v31  ;;  %v392_v42 = vld [vmem:[%s1540_s4 + $0x6e0] sm:$0xff]  ;;  %v397_v43 = vld [vmem:[%s1540_s4 + $0x708] sm:$0xff]  ;;  %v394_v44 = vld [vmem:[%s1540_s4 + $0x6f0] sm:$0xff] }
  0x56   : > { %1136 = vmatpush1.bf16.msra.mxu0 %v1135_v57  ;;  %1232 = vmatpush1.bf16.msra.mxu1 %v1231_v58  ;;  %v1450_v57 = vmov 0.0   ;;  %v365_v58 = vld [vmem:[%s1540_s4 + $0x608] sm:$0xff]  ;;  %v399_v46 = vld [vmem:[%s1540_s4 + $0x718] sm:$0xff]  ;;  %v410_v50 = vld [vmem:[%s1540_s4 + $0x770] sm:$0xff]  ;;  %v1171_v51 = vpack.c.bf16 %v397_v43, %v392_v42 }
  0x57   : > { %1138 = vmatprep.subr.bf16.mxu0 %v1137_v59  ;;  %1234 = vmatprep.subr.bf16.mxu1 %v1233_v63  ;;  %v370_v59 = vld [vmem:[%s1540_s4 + $0x630] sm:$0xff]  ;;  %v1267_v52 = vpack.c.bf16 %v399_v46, %v394_v44  ;;  %v407_v55 = vld [vmem:[%s1540_s4 + $0x758] sm:$0xff]  ;;  %v404_v56 = vld [vmem:[%s1540_s4 + $0x740] sm:$0xff] }
  0x58   : > { %v362_v63 = vld [vmem:[%s1540_s4 + $0x5f0] sm:$0xff]  ;;  %v1253_v6 = vpack.c.bf16 %v370_v59, %v365_v58  ;;  %v409_v59 = vld [vmem:[%s1540_s4 + $0x768] sm:$0xff]  ;;  %v291_v29 = vld [vmem:[%s1540_s4 + $0x3b8] sm:$0xff] }
  0x59   : > { %v1159_v12 = vpack.c.bf16 %v367_v0, %v362_v63  ;;  %v402_v54 = vld [vmem:[%s1540_s4 + $0x730] sm:$0xff]  ;;  %v1271_v0 = vpack.c.bf16 %v409_v59, %v404_v56  ;;  %v181_v7 = vld [vmem:[%s1540_s4 + $0x48] sm:$0xff]  ;;  %v356_v30 = vld [vmem:[%s1540_s4 + $0x5c0] sm:$0xff] }
  0x5a   : > { %1140 = vmatpush1.bf16.msra.mxu0 %v1139_v9  ;;  %1236 = vmatpush1.bf16.msra.mxu1 %v1235_v10  ;;  %v378_v9 = vld [vmem:[%s1540_s4 + $0x670] sm:$0xff]  ;;  %v375_v10 = vld [vmem:[%s1540_s4 + $0x658] sm:$0xff]  ;;  %v1175_v63 = vpack.c.bf16 %v407_v55, %v402_v54  ;;  %v201_v26 = vld [vmem:[%s1540_s4 + $0xe8] sm:$0xff] }
  0x5b   : > { %1142 = vmatprep.subr.bf16.mxu0 %v1141_v11  ;;  %1238 = vmatprep.subr.bf16.mxu1 %v1237_v15  ;;  %v380_v11 = vld [vmem:[%s1540_s4 + $0x680] sm:$0xff]  ;;  %v1161_v14 = vpack.c.bf16 %v378_v9, %v373_v8  ;;  %v266_v8 = vld [vmem:[%s1540_s4 + $0x2f0] sm:$0xff]  ;;  %v271_v9 = vld [vmem:[%s1540_s4 + $0x318] sm:$0xff] }
  0x5c   : > { %v372_v15 = vld [vmem:[%s1540_s4 + $0x640] sm:$0xff]  ;;  %v1257_v18 = vpack.c.bf16 %v380_v11, %v375_v10  ;;  %v341_v11 = vld [vmem:[%s1540_s4 + $0x548] sm:$0xff]  ;;  %v311_v46 = vld [vmem:[%s1540_s4 + $0x458] sm:$0xff] }
  0x5d   : > { %v1163_v25 = vpack.c.bf16 %v377_v16, %v372_v15  ;;  %v336_v10 = vld [vmem:[%s1540_s4 + $0x520] sm:$0xff]  ;;  %v186_v15 = vld [vmem:[%s1540_s4 + $0x70] sm:$0xff]  ;;  %v191_v16 = vld [vmem:[%s1540_s4 + $0x98] sm:$0xff] }
  0x5e   : > { %1144 = vmatpush1.bf16.msra.mxu0 %v1143_v22  ;;  %1240 = vmatpush1.bf16.msra.mxu1 %v1239_v23  ;;  %v388_v22 = vld [vmem:[%s1540_s4 + $0x6c0] sm:$0xff]  ;;  %v385_v23 = vld [vmem:[%s1540_s4 + $0x6a8] sm:$0xff]  ;;  %v1306_v17 = vpack.c.bf16 %v341_v11, %v336_v10  ;;  %v386_v56 = vld [vmem:[%s1540_s4 + $0x6b0] sm:$0xff] }
  0x5f   : > { %1146 = vmatprep.subr.bf16.mxu0 %v1145_v24  ;;  %1242 = vmatprep.subr.bf16.mxu1 %v1241_v28  ;;  %v390_v24 = vld [vmem:[%s1540_s4 + $0x6d0] sm:$0xff]  ;;  %v1165_v28 = vpack.c.bf16 %v388_v22, %v383_v20  ;;  %v281_v20 = vld [vmem:[%s1540_s4 + $0x368] sm:$0xff]  ;;  %v351_v22 = vld [vmem:[%s1540_s4 + $0x598] sm:$0xff] }
  0x60   : > { %v1261_v33 = vpack.c.bf16 %v390_v24, %v385_v23  ;;  %v1279_v23 = vpack.c.bf16 %v191_v16, %v186_v15  ;;  %v361_v31 = vld [vmem:[%s1540_s4 + $0x5e8] sm:$0xff]  ;;  %v216_v42 = vld [vmem:[%s1540_s4 + $0x160] sm:$0xff]  ;;  %v246_v10 = vld [vmem:[%s1540_s4 + $0x250] sm:$0xff] }
  0x61   : > { %503 = vmatmul.mubr.f32.vlgmr.msra.gmra.mrb[0].mxu0 %v1689_v32  ;;  %645 = vmatmul.mubr.f32.vlgmr.msra.gmra.mrb[0].mxu1 %v1689_v32  ;;  %v221_v43 = vld [vmem:[%s1540_s4 + $0x188] sm:$0xff]  ;;  %v316_v54 = vld [vmem:[%s1540_s4 + $0x480] sm:$0xff]  ;;  %v251_v11 = vld [vmem:[%s1540_s4 + $0x278] sm:$0xff] }
  0x62   : > { %1148 = vmatpush1.bf16.msra.mxu0 %v1147_v35  ;;  %1244 = vmatpush1.bf16.msra.mxu1 %v1243_v36  ;;  %v393_v35 = vld [vmem:[%s1540_s4 + $0x6e8] sm:$0xff]  ;;  %v398_v36 = vld [vmem:[%s1540_s4 + $0x710] sm:$0xff]  ;;  %v411_v15 = vld [vmem:[%s1540_s4 + $0x778] sm:$0xff]  ;;  %v1303_v16 = vpack.c.bf16 %v251_v11, %v246_v10 }
  0x63   : > { %1150 = vmatprep.subr.bf16.mxu0 %v1149_v37  ;;  %1246 = vmatprep.subr.bf16.mxu1 %v1245_v41  ;;  %v395_v37 = vld [vmem:[%s1540_s4 + $0x6f8] sm:$0xff]  ;;  %v1169_v41 = vpack.c.bf16 %v398_v36, %v393_v35  ;;  %v206_v35 = vld [vmem:[%s1540_s4 + $0x110] sm:$0xff]  ;;  %v321_v55 = vld [vmem:[%s1540_s4 + $0x4a8] sm:$0xff] }
  0x64   : > { %573 = vmatprep.mubr.f32.mxu0 %v1450_v57  ;;  %715 = vmatprep.mubr.f32.mxu1 %v1450_v57  ;;  %v1265_v45 = vpack.c.bf16 %v400_v38, %v395_v37  ;;  %v211_v36 = vld [vmem:[%s1540_s4 + $0x138] sm:$0xff]  ;;  %v1312_v37 = vpack.c.bf16 %v361_v31, %v356_v30  ;;  %v296_v38 = vld [vmem:[%s1540_s4 + $0x3e0] sm:$0xff] }
  0x66   : > { %1152 = vmatpush1.bf16.msra.mxu0 %v1151_v47  ;;  %1248 = vmatpush1.bf16.msra.mxu1 %v1247_v48  ;;  %v403_v47 = vld [vmem:[%s1540_s4 + $0x738] sm:$0xff]  ;;  %v408_v48 = vld [vmem:[%s1540_s4 + $0x760] sm:$0xff] }
  0x67   : > { %1154 = vmatprep.subr.bf16.mxu0 %v1153_v49  ;;  %1250 = vmatprep.subr.bf16.mxu1 %v1249_v53  ;;  %v405_v49 = vld [vmem:[%s1540_s4 + $0x748] sm:$0xff]  ;;  %v1173_v53 = vpack.c.bf16 %v408_v48, %v403_v47  ;;  %v376_v47 = vld [vmem:[%s1540_s4 + $0x660] sm:$0xff] }
  0x68   : > { %v1269_v58 = vpack.c.bf16 %v410_v50, %v405_v49  ;;  %v381_v48 = vld [vmem:[%s1540_s4 + $0x688] sm:$0xff]  ;;  %v1291_v49 = vpack.c.bf16 %v221_v43, %v216_v42 }
  0x6a   : > { %1156 = vmatpush1.bf16.msra.mxu0 %v1155_v60  ;;  %1252 = vmatpush1.bf16.msra.mxu1 %v1251_v61  ;;  %v256_v60 = vld [vmem:[%s1540_s4 + $0x2a0] sm:$0xff]  ;;  %v261_v61 = vld [vmem:[%s1540_s4 + $0x2c8] sm:$0xff] }
  0x6b   : > { %1158 = vmatprep.subr.bf16.mxu0 %v1157_v62  ;;  %1254 = vmatprep.subr.bf16.mxu1 %v1253_v6  ;;  %v433_v62 = vsub.s32 2, %v1529_v2  ;;  %v1273_v4 = vpack.c.bf16 %v261_v61, %v256_v60  ;;  %v176_v6 = vld [vmem:[%s1540_s4 + $0x20] sm:$0xff]  ;;  %v1297_v60 = vpack.c.bf16 %v321_v55, %v316_v54 }
  0x6c   : > { %v236_v61 = vld [vmem:[%s1540_s4 + $0x200] sm:$0xff] }
  0x6e   : > { %1160 = vmatpush1.bf16.msra.mxu0 %v1159_v12  ;;  %1256 = vmatpush1.bf16.msra.mxu1 %v1255_v13  ;;  %v1759_v12 = vrot.slane %v1534_v3, %v433_v62  ;;  %v1275_v13 = vpack.c.bf16 %v181_v7, %v176_v6  ;;  %v346_v3 = vld [vmem:[%s1540_s4 + $0x570] sm:$0xff]  ;;  %v241_v62 = vld [vmem:[%s1540_s4 + $0x228] sm:$0xff]  ;;  %v396_v6 = vld [vmem:[%s1540_s4 + $0x700] sm:$0xff] }
  0x6f   : > { %1162 = vmatprep.subr.bf16.mxu0 %v1161_v14  ;;  %1258 = vmatprep.subr.bf16.mxu1 %v1257_v18  ;;  %v1277_v14 = vpack.c.bf16 %v271_v9, %v266_v8  ;;  %v276_v18 = vld [vmem:[%s1540_s4 + $0x340] sm:$0xff]  ;;  %v401_v7 = vld [vmem:[%s1540_s4 + $0x728] sm:$0xff]  ;;  %v1299_v8 = vpack.c.bf16 %v241_v62, %v236_v61 }
  0x70   : > { %v1281_v24 = vpack.c.bf16 %v281_v20, %v276_v18  ;;  %v1453_v20 = vmov 1966171168  }
  0x72   : > { %1164 = vmatpush1.bf16.msra.mxu0 %v1163_v25  ;;  %1260 = vmatpush1.bf16.msra.mxu1 %v1259_v27  ;;  %v196_v25 = vld [vmem:[%s1540_s4 + $0xc0] sm:$0xff]  ;;  %v1309_v27 = vpack.c.bf16 %v351_v22, %v346_v3  ;;  %v870_v3 = vunpack.c.l.s4 %v1453_v20 }
  0x73   : > { %1166 = vmatprep.subr.bf16.mxu0 %v1165_v28  ;;  %1262 = vmatprep.subr.bf16.mxu1 %v1261_v33  ;;  %v286_v28 = vld [vmem:[%s1540_s4 + $0x390] sm:$0xff]  ;;  %v1283_v33 = vpack.c.bf16 %v201_v26, %v196_v25 }
  0x74   : > { %v1285_v34 = vpack.c.bf16 %v291_v29, %v286_v28 }
  0x76   : > { %1168 = vmatpush1.bf16.msra.mxu0 %v1167_v39  ;;  %1264 = vmatpush1.bf16.msra.mxu1 %v1263_v40  ;;  %v366_v39 = vld [vmem:[%s1540_s4 + $0x610] sm:$0xff]  ;;  %v1287_v40 = vpack.c.bf16 %v211_v36, %v206_v35 }
  0x77   : > { %1170 = vmatprep.subr.bf16.mxu0 %v1169_v41  ;;  %1266 = vmatprep.subr.bf16.mxu1 %v1265_v45  ;;  %v306_v45 = vld [vmem:[%s1540_s4 + $0x430] sm:$0xff] }
  0x78   : > { %v1293_v50 = vpack.c.bf16 %v311_v46, %v306_v45 }
  0x7a   : > { %1172 = vmatpush1.bf16.msra.mxu0 %v1171_v51  ;;  %1268 = vmatpush1.bf16.msra.mxu1 %v1267_v52  ;;  %v226_v51 = vld [vmem:[%s1540_s4 + $0x1b0] sm:$0xff]  ;;  %v231_v52 = vld [vmem:[%s1540_s4 + $0x1d8] sm:$0xff] }
  0x7b   : > { %1174 = vmatprep.subr.bf16.mxu0 %v1173_v53  ;;  %1270 = vmatprep.subr.bf16.mxu1 %v1269_v58  ;;  %v1318_v53 = vpack.c.bf16 %v381_v48, %v376_v47  ;;  %v391_v58 = vld [vmem:[%s1540_s4 + $0x6d8] sm:$0xff]  ;;  %v1295_v59 = vpack.c.bf16 %v231_v52, %v226_v51 }
  0x7e   : > { %1176 = vmatpush1.bf16.msra.mxu0 %v1175_v63  ;;  %1272 = vmatpush1.bf16.msra.mxu1 %v1271_v0  ;;  %v1321_v63 = vpack.c.bf16 %v391_v58, %v386_v56  ;;  %v326_v0 = vld [vmem:[%s1540_s4 + $0x4d0] sm:$0xff] }
  0x7f   : > { %1274 = vmatprep.subr.bf16.mxu0 %v1273_v4  ;;  %1305 = vmatprep.subr.bf16.mxu1 %v1451_v19  ;;  %v331_v4 = vld [vmem:[%s1540_s4 + $0x4f8] sm:$0xff] }
  0x80   : > { %v1301_v9 = vpack.c.bf16 %v331_v4, %v326_v0 }
  0x81   : > { %574 = vmatmul.mubr.f32.vlgmr.msra.gmra.mrb[0].mxu0 %v1759_v12  ;;  %716 = vmatmul.mubr.f32.vlgmr.msra.gmra.mrb[0].mxu1 %v1759_v12 }
  0x82   : > { %1276 = vmatpush3.bf16.msra.mxu0 %v1275_v13  ;;  %1307 = vmatpush3.bf16.msra.mxu1 %v1306_v17  ;;  %v1324_v13 = vpack.c.bf16 %v401_v7, %v396_v6 }
  0x83   : > { %1278 = vmatprep.subr.bf16.mxu0 %v1277_v14  ;;  %1308 = vmatprep.subr.bf16.mxu1 %v1451_v19  ;;  %v406_v14 = vld [vmem:[%s1540_s4 + $0x750] sm:$0xff] }
  0x84   : > { %786 = vmatprep.mubr.f32.mxu0 %v1543_v5  ;;  %1078 = vmatprep.mubr.msk.f32.mxu1 %vm1452_vm0, %v1450_v57  ;;  %v301_v5 = vld [vmem:[%s1540_s4 + $0x408] sm:$0xff]  ;;  %v371_v57 = vld [vmem:[%s1540_s4 + $0x638] sm:$0xff]  ;;  %v1327_v17 = vpack.c.bf16 %v411_v15, %v406_v14 }
  0x85   : > { %v1289_v41 = vpack.c.bf16 %v301_v5, %v296_v38  ;;  %v1315_v44 = vpack.c.bf16 %v371_v57, %v366_v39 }
  0x86   : > { %1280 = vmatpush3.bf16.msra.mxu0 %v1279_v23  ;;  %1310 = vmatpush3.bf16.msra.mxu1 %v1309_v27  ;;  %v871_v23 = vunpack.c.0.s8 %v870_v3 }
  0x87   : > { %1282 = vmatprep.subr.bf16.mxu0 %v1281_v24  ;;  %1311 = vmatprep.subr.bf16.mxu1 %v1451_v19 }
  0x88   : > { %v874_v29 = vsub.s32 %v871_v23, %v1529_v2 }
  0x8a   : > { %1284 = vmatpush3.bf16.msra.mxu0 %v1283_v33  ;;  %1313 = vmatpush3.bf16.msra.mxu1 %v1312_v37 }
  0x8b   : > { %1286 = vmatprep.subr.bf16.mxu0 %v1285_v34  ;;  %1314 = vmatprep.subr.bf16.mxu1 %v1451_v19 }
  0x8e   : > { %1288 = vmatpush3.bf16.msra.mxu0 %v1287_v40  ;;  %1316 = vmatpush3.bf16.msra.mxu1 %v1315_v44 }
  0x8f   : > { %1290 = vmatprep.subr.bf16.mxu0 %v1289_v41  ;;  %1317 = vmatprep.subr.bf16.mxu1 %v1451_v19 }
  0x92   : > { %1292 = vmatpush3.bf16.msra.mxu0 %v1291_v49  ;;  %1319 = vmatpush3.bf16.msra.mxu1 %v1318_v53 }
  0x93   : > { %1294 = vmatprep.subr.bf16.mxu0 %v1293_v50  ;;  %1320 = vmatprep.subr.bf16.mxu1 %v1451_v19 }
  0x96   : > { %1296 = vmatpush3.bf16.msra.mxu0 %v1295_v59  ;;  %1322 = vmatpush3.bf16.msra.mxu1 %v1321_v63 }
  0x97   : > { %1298 = vmatprep.subr.bf16.mxu0 %v1297_v60  ;;  %1323 = vmatprep.subr.bf16.mxu1 %v1451_v19 }
  0x9a   : > { %1300 = vmatpush3.bf16.msra.mxu0 %v1299_v8  ;;  %1325 = vmatpush3.bf16.msra.mxu1 %v1324_v13 }
  0x9b   : > { %1302 = vmatprep.subr.bf16.mxu0 %v1301_v9  ;;  %1326 = vmatprep.subr.bf16.mxu1 %v1451_v19 }
  0x9e   : > { %1304 = vmatpush3.bf16.msra.mxu0 %v1303_v16  ;;  %1328 = vmatpush3.bf16.msra.mxu1 %v1327_v17 }
  0xa1   : > { %787 = vmatmul.mubr.f32.vlgmr.msra.gmra.mrb[2].mxu0 %v1689_v32  ;;  %1079 = vmatmul.mubr.f32.vlgmr.msra.gmra.mrb[2].mxu1 %v1759_v12 }
  0xd3   : > { %v416_v18 = vpop.permute.xlu0 %415 }
  0xd4   : > { %v421_v22 = vrot.slane %v416_v18, %v420_v21 }
 0x154   : > { %v575_v24 = vpop.f32.mrb[0].mxu0  ;;  %v717_v26 = vpop.f32.mrb[0].mxu1 }
 0x155   : > { %v1329_v25 = vadd.f32 %v575_v24, %v421_v22  ;;  %v577_v27 = vpop.f32.mrb[1].mxu0  ;;  %v1331_v28 = vadd.f32 %v717_v26, %v421_v22  ;;  %v719_v30 = vpop.f32.mrb[1].mxu1 }
 0x156   : > { %v1330_v19 = vadd.f32 %v577_v27, %v421_v22  ;;  %v1332_v32 = vadd.f32 %v719_v30, %v421_v22 }
 0x158   : > { %v867_v12 = vcombine.low %v1329_v25, %v1330_v19  ;;  %v868_v31 = vcombine.low %v1331_v28, %v1332_v32 }
 0x15a   : > { %v875_v33 = vrot.slane %v867_v12, %v874_v29  ;;  %v882_v34 = vrot.slane %v868_v31, %v874_v29 }
 0x15c   : > { %v890_v35 = vcombine.low %v875_v33, %v882_v34 }
 0x15e   : > { %v897_v2 = vrot.slane %v890_v35, %v874_v29 }
 0x174   : > { %v1026_v21 = vpop.f32.mrb[2].mxu0  ;;  %v858_v37 = vpop.f32.mrb[2].mxu1 }
 0x175   : > { %v1027_v36 = vpop.f32.mrb[3].mxu0  ;;  %v1080_v5 = vpop.f32.mrb[3].mxu1 }
 0x176   : > { %v1028_v38 = vadd.f32 %v1027_v36, %v1026_v21 }
 0x178   : > { %v789_v39 = vadd.f32 %v1028_v38, %v421_v22 }
 0x17a   : > { %v859_v57 = vadd.f32 %v858_v37, %v789_v39 }
 0x17c   : > { %v889_v40 = vrot.slane %v859_v57, %v874_v29 }
 0x17e   : > { %v904_v41 = vrot.slane %v889_v40, %v874_v29 }
 0x180   : > { %v905_v42 = vcombine.low %v897_v2, %v904_v41 }
 0x182   : > { %911 = vst.msk [vmem:[%s165_s8] sm:$0x1f] %vm909_vm1, %v905_v42 }
 0x183   : > { %1398 = shalt.err (!%p1395_p3)
}
 0x184   : > { %s1399_s25 = scalar_lea.hbm %s1824_s12, 80  ;;  %s1403_s28 = scalar_lea.hbm %s1869_s3, 160 }
 0x185   : > { %p1400_p4 = scmp.ne.s32.totalorder %s1824_s12, %s1399_s25  ;;  %p1404_p9 = scmp.lt.u32.totalorder %s1824_s12, %s1869_s3 }
 0x186   : > { %p1405_p10 = scmp.lt.u32.totalorder %s1403_s28, %s1399_s25  ;;  %p1407_p12 = scmp.lt.u32.totalorder %s1399_s25, %s1824_s12 }
 0x187   : > { %p1401_p7 = pnand %p1400_p4, %p1516_p5 }
 0x188   : > { %p1406_p11 = por %p1405_p10, %p1404_p9 }
 0x189   : > { %p1402_p8 = pneg %p1401_p7 }
 0x18a   : > { %p1408_p13 = por %p1407_p12, %p1406_p11 }
 0x18c   : > { %p1409_p0 = pnand %p1408_p13, %p1402_p8 }
 0x18e   : > { %1412 = shalt.err (!%p1409_p0)
}
 0x18f   : > { %1340 = dma.vmem_to_hbm [thread:$0]  (%p1516_p5), %s1826_s9, 80, %s1824_s12, %s913_s13  }
 0x190 PF: > { %p1346_p1 = scmp.ge.s32.totalorder %s1447_s17, 2  ;;  %s939_s4 = sand.u32 1, %s1435_s14  }
 0x191   : > { %s940_s5 = scalar_lea.sflag [#allocation4], %s939_s4 }
 0x192   : > { %p1343_p2 = pnand %p1346_p1, %p1520_p6 }
 0x194   : > { %1430 = dma.done.wait (!%p1343_p2), %s940_s5, 80  }
 0x195   : > { %1432 = vsyncadd (!%p1343_p2), %s940_s5, 4294967216  ;;  %p15_p3 = scmp.ge.s32.totalorder %s1503_s19, 4   ;;  %s1872_s14 = smov %s1439_s15 }
 0x196   : > { %s1873_s15 = smov %s1443_s16  ;;  %s1874_s16 = smov %s1514_s22 }
 0x197   : > { %s1875_s17 = smov %s1503_s19  ;;  %17 = sbr.rel (!%p15_p3) target bundleno = 6 (0x6), region = 67 }
 0x19e   :  { %945 = vsyncpa [#allocation4], 1 }
 0x19f   :  { %947 = vsyncpa [#allocation4 + $0x1], 1 }

</bundles_post_ra>
